<compile_context>
chip_gen: v7x
topology: tpu7x:2x2x1
jax: 0.10.0
libtpu: 0.0.40
codegen_flags: <defaults>
</compile_context>

<pallas_src>
import functools

import jax
import jax.numpy as jnp
from jax import lax
from jax.experimental import pallas as pl
from jax.experimental.pallas import tpu as pltpu

LANE = 128  # lane-dense channel padding


# ---------------------------------------------------------------------------
# small helpers
# ---------------------------------------------------------------------------
def _pick_tile(total, target, step):
    """Largest multiple of `step` that divides `total` and is <= `target`.
    Falls back to `total` (full extent) when no such divisor exists."""
    if total <= target:
        return total
    best = None
    t = step
    while t <= target:
        if total % t == 0:
            best = t
        t += step
    return best if best is not None else total


def _vmem_limit(*block_bytes):
    """Scoped-VMEM limit: tiled blocks (double-buffered) + generous headroom,
    capped safely under the smallest physical VMEM (v7x: 64 MiB)."""
    total = 4 * sum(block_bytes) + (4 << 20)
    return int(min(max(total, 8 << 20), 56 << 20))


# ---------------------------------------------------------------------------
# Kernel 1: 3x3 conv (+bias, +ReLU) as a tiled K=128 bf16 MXU matmul over a
# lane-packed 9-tap im2col.  f32 accumulation, bf16 store.
# ---------------------------------------------------------------------------
def _convmm_kernel(x_ref, w_ref, b_ref, o_ref, *, apply_relu):
    # x_ref: (TILE, 128) bf16 im2col rows; w_ref: (128, 128) bf16; b_ref: (1, 128) f32
    acc = jnp.dot(x_ref[...], w_ref[...], preferred_element_type=jnp.float32)
    acc = acc + b_ref[...]
    if apply_relu:
        acc = jnp.maximum(acc, 0.0)
    o_ref[...] = acc.astype(o_ref.dtype)  # bf16 store: half the HBM writeback


def conv3x3_mm(x_nhwc, wmat, bias, *, apply_relu=True, row_target=4096):
    """'same' 3x3 conv.  x_nhwc: (B, H, W, Cin) with 9*Cin <= 128.
    Returns (B, H*W, 128) bf16; true output channels in the leading lanes, padded
    lanes exactly zero (zero-padded weights & bias + ReLU)."""
    B, H, W, C = x_nhwc.shape
    if 9 * C > LANE:
        # TODO(synk): wide-Cin layers need the halo-tiled 3-dot conv (overlapping row
        # windows via pl.Element offsets / manual DMA); not needed for this backbone.
        raise NotImplementedError("conv3x3_mm requires 9*Cin <= 128")
    xp = jnp.pad(x_nhwc, ((0, 0), (1, 1), (1, 1), (0, 0)))
    taps = [xp[:, kh:kh + H, kw:kw + W, :] for kh in range(3) for kw in range(3)]
    xc = jnp.concatenate(taps, axis=-1)                       # (B, H, W, 9C)
    xc = jnp.pad(xc, ((0, 0), (0, 0), (0, 0), (0, LANE - 9 * C)))
    rows = B * H * W
    xflat = xc.reshape(rows, LANE).astype(jnp.bfloat16)
    tile = _pick_tile(rows, row_target, 8)

    out = pl.pallas_call(
        functools.partial(_convmm_kernel, apply_relu=apply_relu),
        out_shape=jax.ShapeDtypeStruct((rows, LANE), jnp.bfloat16),
        grid_spec=pltpu.PrefetchScalarGridSpec(
            num_scalar_prefetch=0,
            grid=(rows // tile,),
            in_specs=[
                pl.BlockSpec((tile, LANE), lambda i: (i, 0)),
                pl.BlockSpec((LANE, LANE), lambda i: (0, 0)),
                pl.BlockSpec((1, LANE), lambda i: (0, 0)),
            ],
            out_specs=pl.BlockSpec((tile, LANE), lambda i: (i, 0)),
        ),
        compiler_params=pltpu.CompilerParams(
            dimension_semantics=("parallel",),
            vmem_limit_bytes=_vmem_limit(
                tile * LANE * 2,      # x block (bf16)
                LANE * LANE * 2,      # weights (bf16)
                LANE * 4,             # bias (f32)
                tile * LANE * 2,      # out block (bf16)
                tile * LANE * 4,      # f32 accumulator temp
            ),
        ),
    )(xflat, wmat, bias)
    return out.reshape(B, H * W, LANE)


# ---------------------------------------------------------------------------
# Kernel 2: fused per-layer feature-L1 + gram-L1, tiled over H*W, per-image
# partial sums.  Both grams in one 256-wide bf16 MXU dot via feature concat.
# ---------------------------------------------------------------------------
def _feat_gram_kernel(fin_ref, fout_ref, fsum_ref, gsum_ref, gacc_ref, *,
                      gram_scale, c_pad):
    t = pl.program_id(1)

    @pl.when(t == 0)
    def _():
        fsum_ref[...] = jnp.zeros_like(fsum_ref)
        gacc_ref[...] = jnp.zeros_like(gacc_ref)

    fin = fin_ref[0]                                   # (TILE, 128) bf16
    fout = fout_ref[0]

    d = fin.astype(jnp.float32) - fout.astype(jnp.float32)
    fsum_ref[...] += jnp.sum(jnp.abs(d))

    # gram(concat([fin, fout], lanes)) has gram(fin) / gram(fout) as its two
    # diagonal 128x128 blocks -> one 256-wide MXU matmul, H*W axis contracted
    # directly (no transpose), bf16 operands, f32 accumulation.
    fcat = jnp.concatenate([fin, fout], axis=1)        # (TILE, 256) bf16
    dims = (((0,), (0,)), ((), ()))
    gacc_ref[...] += lax.dot_general(fcat, fcat, dims,
                                     preferred_element_type=jnp.float32)

    @pl.when(t == pl.num_programs(1) - 1)
    def _():
        g_in = gacc_ref[0:c_pad, 0:c_pad]
        g_out = gacc_ref[c_pad:2 * c_pad, c_pad:2 * c_pad]
        gsum_ref[...] = jnp.reshape(
            jnp.sum(jnp.abs(g_in - g_out)) * gram_scale, (1, 1, 1))


def feat_gram_l1(f_cat, n_img, c_true, hw, *, hw_target=2048):
    """f_cat: (2*n_img, H*W, 128) bf16 (first n_img = input feats, rest = target).
    Returns per-image partial sums, each (n_img, 1, 1) f32:
      fsum_img[i] = sum |f_in_i - f_out_i|
      gsum_img[i] = sum |gram(f_in_i) - gram(f_out_i)|   (grams already /(c*h*w))
    """
    _, HW, c_pad = f_cat.shape
    tile = _pick_tile(HW, hw_target, 8)
    kern = functools.partial(_feat_gram_kernel,
                             gram_scale=1.0 / (c_true * hw), c_pad=c_pad)
    fsum_img, gsum_img = pl.pallas_call(
        kern,
        out_shape=(jax.ShapeDtypeStruct((n_img, 1, 1), jnp.float32),
                   jax.ShapeDtypeStruct((n_img, 1, 1), jnp.float32)),
        grid_spec=pltpu.PrefetchScalarGridSpec(
            num_scalar_prefetch=0,
            grid=(n_img, HW // tile),
            in_specs=[
                pl.BlockSpec((1, tile, c_pad), lambda i, t: (i, t, 0)),
                pl.BlockSpec((1, tile, c_pad), lambda i, t: (i + n_img, t, 0)),
            ],
            out_specs=(pl.BlockSpec((1, 1, 1), lambda i, t: (i, 0, 0)),
                       pl.BlockSpec((1, 1, 1), lambda i, t: (i, 0, 0))),
            scratch_shapes=[pltpu.VMEM((2 * c_pad, 2 * c_pad), jnp.float32)],
        ),
        compiler_params=pltpu.CompilerParams(
            dimension_semantics=("parallel", "arbitrary"),
            vmem_limit_bytes=_vmem_limit(
                2 * tile * c_pad * 2,        # fin + fout blocks (bf16)
                4 * c_pad * c_pad * 4,       # (256,256) f32 gram accumulator
                2 * tile * c_pad * 4,        # f32 temps (diff / concat)
            ),
        ),
    )(f_cat, f_cat)
    return fsum_img, gsum_img


# ---------------------------------------------------------------------------
# Kernel 3: fused pixel stats: sum|a-b|, sum(a-b)^2, pEPs count; per-image
# partial sums, tiled over H*W.
# ---------------------------------------------------------------------------
def _pixel_stats_kernel(a_ref, b_ref, l1_ref, sq_ref, pep_ref):
    t = pl.program_id(1)

    @pl.when(t == 0)
    def _():
        l1_ref[...] = jnp.zeros_like(l1_ref)
        sq_ref[...] = jnp.zeros_like(sq_ref)
        pep_ref[...] = jnp.zeros_like(pep_ref)

    d = a_ref[0] - b_ref[0]                            # (C, TILE) f32, lane-dense HW
    l1_ref[...] += jnp.sum(jnp.abs(d))
    sq_ref[...] += jnp.sum(d * d)
    near = (jnp.abs(d) * 255.0 <= 0.1).astype(jnp.float32)
    # reference hard-codes `.eq(3)`: a pixel counts only if ALL 3 channels are close
    all_ch = (jnp.sum(near, axis=0, keepdims=True) == 3.0).astype(jnp.float32)
    pep_ref[...] += jnp.sum(all_ch)


def pixel_stats(a, b, *, hw_target=8192):
    n, c, h, w = a.shape
    hw = h * w
    a3 = a.reshape(n, c, hw).astype(jnp.float32)
    b3 = b.reshape(n, c, hw).astype(jnp.float32)
    tile = _pick_tile(hw, hw_target, 128)
    outs = pl.pallas_call(
        _pixel_stats_kernel,
        out_shape=(jax.ShapeDtypeStruct((n, 1, 1), jnp.float32),) * 3,
        grid_spec=pltpu.PrefetchScalarGridSpec(
            num_scalar_prefetch=0,
            grid=(n, hw // tile),
            in_specs=[pl.BlockSpec((1, c, tile), lambda i, t: (i, 0, t)),
                      pl.BlockSpec((1, c, tile), lambda i, t: (i, 0, t))],
            out_specs=tuple(pl.BlockSpec((1, 1, 1), lambda i, t: (i, 0, 0))
                            for _ in range(3)),
        ),
        compiler_params=pltpu.CompilerParams(
            dimension_semantics=("parallel", "arbitrary"),
            vmem_limit_bytes=_vmem_limit(2 * c * tile * 4, c * tile * 4, 3 * 4),
        ),
    )(a3, b3)
    return outs  # (l1_img, sq_img, pep_img), each (n, 1, 1)


# ---------------------------------------------------------------------------
# Parameter prep (lane-packed im2col weights) + FeatureLoss forward
# ---------------------------------------------------------------------------
def prep_conv_params(w, b):
    """PyTorch (Cout, Cin, 3, 3) -> (128, 128) bf16 matmul weights whose rows are
    ordered (kh*3+kw)*Cin + ci (matching the im2col lane packing) + (1,128) f32 bias.
    Padded rows/cols/bias are zero so padded feature lanes stay exactly zero."""
    cout, cin, kh, kw = w.shape
    assert kh == 3 and kw == 3 and 9 * cin <= LANE and cout <= LANE
    wt = jnp.transpose(w, (2, 3, 1, 0)).reshape(9 * cin, cout)
    wmat = jnp.zeros((LANE, LANE), jnp.float32).at[:9 * cin, :cout].set(wt)
    bias = jnp.zeros((1, LANE), jnp.float32).at[0, :cout].set(b)
    return wmat.astype(jnp.bfloat16), bias


def feature_loss_forward(inp, tgt, params, wgts, reduction="sum"):
    n, c_in, h, w = inp.shape
    hw = h * w
    c1 = params["w1"].shape[0]
    c2 = params["w2"].shape[0]
    w1m, b1 = prep_conv_params(params["w1"], params["b1"])
    w2m, b2 = prep_conv_params(params["w2"], params["b2"])

    # fused pixel L1 / MSE / pEPs (per-image partials, summed in XLA)
    l1_img, sq_img, pep_img = pixel_stats(inp, tgt)
    size = inp.size
    pixel_l1 = jnp.sum(l1_img) / size
    mse = jnp.sum(sq_img) / size
    psnr = 10.0 * jnp.log10(1.0 / mse)
    peps = jnp.sum(pep_img) / (size / c_in) * 100.0

    # one backbone pass over [input; target]
    x_cat = jnp.transpose(jnp.concatenate([inp, tgt], axis=0), (0, 2, 3, 1))
    f1 = conv3x3_mm(x_cat, w1m, b1, apply_relu=True)            # (2n, HW, 128) bf16
    # TODO(synk): optionally fuse layer-2 feat+gram into the conv-2 kernel to skip
    # one feature-map HBM round trip (per review); kept separate for clarity here.
    f2 = conv3x3_mm(f1.reshape(2 * n, h, w, LANE)[..., :c1], w2m, b2, apply_relu=True)

    feat_losses = [pixel_l1]
    feat_terms, gram_terms = [], []
    for f_cat, c_true, wgt in zip([f1, f2], [c1, c2], wgts):
        fsum_img, gsum_img = feat_gram_l1(f_cat, n, c_true, hw)
        feat_terms.append(jnp.sum(fsum_img) / (n * c_true * hw) * wgt)
        gram_terms.append(jnp.sum(gsum_img) / (n * c_true * c_true) * wgt * 5000.0)
    feat_losses += feat_terms + gram_terms

    # TODO(synk): SSIM(window_size=11) side-metric not implemented (it does not
    # contribute to the returned loss).
    names = (["pixel"] + [f"feat_{i}" for i in range(len(wgts))]
             + [f"gram_{i}" for i in range(len(wgts))] + ["PSNR", "pEPs"])
    metrics = dict(zip(names, feat_losses + [psnr, peps]))

    if reduction == "mean":
        total = jnp.mean(jnp.stack(feat_losses))
    elif reduction == "sum":
        total = sum(feat_losses)
    else:
        raise ValueError(f"Invalid reduction: {reduction}")
    return total, metrics


# ---------------------------------------------------------------------------
# Pure-JAX reference with the SAME dtype policy (bf16 conv inputs/weights/features,
# f32 accumulation) -- isolates kernel plumbing from bf16 quantisation effects.
# ---------------------------------------------------------------------------
def reference_forward(inp, tgt, params, wgts, reduction="sum"):
    n, c_in, h, w = inp.shape

    def conv(x_nhwc, wt, bias):
        B, H, W, C = x_nhwc.shape
        xp = jnp.pad(x_nhwc, ((0, 0), (1, 1), (1, 1), (0, 0)))
        taps = [xp[:, kh:kh + H, kw:kw + W, :] for kh in range(3) for kw in range(3)]
        xc = jnp.concatenate(taps, axis=-1).astype(jnp.bfloat16)
        wm = jnp.transpose(wt, (2, 3, 1, 0)).reshape(9 * C, -1).astype(jnp.bfloat16)
        y = jnp.einsum("bhwk,kc->bhwc", xc, wm, preferred_element_type=jnp.float32)
        y = jnp.maximum(y + bias, 0.0)
        return y.astype(jnp.bfloat16)

    def feats(x_nchw):
        x = jnp.transpose(x_nchw, (0, 2, 3, 1))
        f1 = conv(x, params["w1"], params["b1"])
        f2 = conv(f1, params["w2"], params["b2"])
        return [f1.astype(jnp.float32), f2.astype(jnp.float32)]

    in_f, out_f = feats(inp), feats(tgt)

    def gram(f):
        B, H, W, C = f.shape
        x = f.reshape(B, H * W, C)
        return jnp.einsum("bnc,bnd->bcd", x, x) / (C * H * W)

    d = inp - tgt
    pixel = jnp.mean(jnp.abs(d))
    mse = jnp.mean(d * d)
    psnr = 10.0 * jnp.log10(1.0 / mse)
    near = jnp.abs(d) * 255.0 <= 0.1
    peps = jnp.sum((jnp.sum(near, axis=1) == 3).astype(jnp.float32)) / (inp.size / c_in) * 100.0

    losses = [pixel]
    losses += [jnp.mean(jnp.abs(fi - fo)) * wg for fi, fo, wg in zip(in_f, out_f, wgts)]
    losses += [jnp.mean(jnp.abs(gram(fi) - gram(fo))) * wg * 5000.0
               for fi, fo, wg in zip(in_f, out_f, wgts)]
    names = (["pixel"] + [f"feat_{i}" for i in range(len(wgts))]
             + [f"gram_{i}" for i in range(len(wgts))] + ["PSNR", "pEPs"])
    metrics = dict(zip(names, losses + [psnr, peps]))
    total = sum(losses) if reduction == "sum" else jnp.mean(jnp.stack(losses))
    return total, metrics


# ---------------------------------------------------------------------------
if __name__ == "__main__":
    key = jax.random.PRNGKey(0)
    k1, k2, k3, k4, k5, k6 = jax.random.split(key, 6)

    N, CIN, H, W = 2, 3, 16, 16
    C1, C2 = 8, 16

    inp = jax.random.uniform(k1, (N, CIN, H, W), jnp.float32)
    tgt = jax.random.uniform(k2, (N, CIN, H, W), jnp.float32)

    params = {
        "w1": 0.1 * jax.random.normal(k3, (C1, CIN, 3, 3), jnp.float32),
        "b1": 0.05 * jax.random.normal(k5, (C1,), jnp.float32),
        "w2": 0.1 * jax.random.normal(k4, (C2, C1, 3, 3), jnp.float32),
        "b2": 0.05 * jax.random.normal(k6, (C2,), jnp.float32),
    }
    wgts = (20.0, 70.0)

    fwd = jax.jit(lambda a, b: feature_loss_forward(a, b, params, wgts, reduction="sum"))
    total, metrics = fwd(inp, tgt)
    jax.block_until_ready(total)

    # tolerance check against the pure-JAX reference (same dtype policy)
    ref_total, ref_metrics = jax.jit(
        lambda a, b: reference_forward(a, b, params, wgts, reduction="sum"))(inp, tgt)

    def close(x, y, rtol=5e-3, atol=1e-4):
        x, y = float(x), float(y)
        return abs(x - y) <= atol + rtol * abs(y)

    for name, ref_val in ref_metrics.items():
        assert close(metrics[name], ref_val), (name, float(metrics[name]), float(ref_val))
    assert close(total, ref_total), (float(total), float(ref_total))

    print("KERNEL_OK")
</pallas_src>

<mosaic_0001>
module attributes {stable_mosaic.version = 11 : i64} {
  func.func @_convmm_kernel(%arg0: i32, %arg1: memref<1024x128xbf16, #tpu.memory_space<vmem>>, %arg2: memref<128x128xbf16, #tpu.memory_space<vmem>>, %arg3: memref<1x128xf32, #tpu.memory_space<vmem>>, %arg4: memref<1024x128xbf16, #tpu.memory_space<vmem>>) attributes {dimension_semantics = [#tpu.dimension_semantics<parallel>], iteration_bounds = array<i64: 1>, scalar_prefetch = 0 : i64, scratch_operands = 0 : i64, tpu.core_type = #tpu.core_type<tc>, window_params = [{transform_indices = @transform_0, window_bounds = array<i64: 1024, 128>}, {pipeline_mode = #tpu.pipeline_mode<synchronous>, transform_indices = @transform_1, window_bounds = array<i64: 128, 128>}, {pipeline_mode = #tpu.pipeline_mode<synchronous>, transform_indices = @transform_2, window_bounds = array<i64: 1, 128>}, {transform_indices = @transform_3, window_bounds = array<i64: 1024, 128>}]} {
    %c0 = arith.constant 0 : index
    %c0_0 = arith.constant 0 : index
    %0 = vector.load %arg1[%c0, %c0_0] : memref<1024x128xbf16, #tpu.memory_space<vmem>>, vector<1024x128xbf16>
    %c0_1 = arith.constant 0 : index
    %c0_2 = arith.constant 0 : index
    %1 = vector.load %arg2[%c0_1, %c0_2] : memref<128x128xbf16, #tpu.memory_space<vmem>>, vector<128x128xbf16>
    %cst = arith.constant dense<0.000000e+00> : vector<1024x128xf32>
    %2 = tpu.matmul %0, %1, %cst {dimension_numbers = #tpu.dot_dimension_numbers<[1], [0], [0], [1], [0, 0, 1, 1], [], []>} : vector<1024x128xbf16>, vector<128x128xbf16>, vector<1024x128xf32> -> vector<1024x128xf32>
    %c0_3 = arith.constant 0 : index
    %c0_4 = arith.constant 0 : index
    %3 = vector.load %arg3[%c0_3, %c0_4] : memref<1x128xf32, #tpu.memory_space<vmem>>, vector<1x128xf32>
    %4 = vector.broadcast %3 : vector<1x128xf32> to vector<1024x128xf32>
    %5 = arith.addf %2, %4 : vector<1024x128xf32>
    %cst_5 = arith.constant 0.000000e+00 : f32
    %6 = vector.broadcast %cst_5 : f32 to vector<1024x128xf32>
    %7 = arith.maximumf %5, %6 : vector<1024x128xf32>
    %8 = arith.truncf %7 : vector<1024x128xf32> to vector<1024x128xbf16>
    %c0_6 = arith.constant 0 : index
    %c0_7 = arith.constant 0 : index
    %9 = vector.load %arg4[%c0_6, %c0_7] : memref<1024x128xbf16, #tpu.memory_space<vmem>>, vector<1024x128xbf16>
    tpu.vector_store %arg4[%c0_6, %c0_7], %8 {strides = array<i32>} : memref<1024x128xbf16, #tpu.memory_space<vmem>>, vector<1024x128xbf16>,
    return
  }
  func.func @transform_0(%arg0: i32) -> (i32, i32) {
    %c0_i32 = arith.constant 0 : i32
    %c0_i32_0 = arith.constant 0 : i32
    return %arg0, %c0_i32 : i32, i32
  }
  func.func @transform_1(%arg0: i32) -> (i32, i32) {
    %c0_i32 = arith.constant 0 : i32
    %c0_i32_0 = arith.constant 0 : i32
    %c0_i32_1 = arith.constant 0 : i32
    return %c0_i32, %c0_i32_0 : i32, i32
  }
  func.func @transform_2(%arg0: i32) -> (i32, i32) {
    %c0_i32 = arith.constant 0 : i32
    %c0_i32_0 = arith.constant 0 : i32
    %c0_i32_1 = arith.constant 0 : i32
    return %c0_i32, %c0_i32_0 : i32, i32
  }
  func.func @transform_3(%arg0: i32) -> (i32, i32) {
    %c0_i32 = arith.constant 0 : i32
    %c0_i32_0 = arith.constant 0 : i32
    return %arg0, %c0_i32 : i32, i32
  }
}

module attributes {stable_mosaic.version = 11 : i64} {
  func.func @_feat_gram_kernel(%arg0: i32, %arg1: i32, %arg2: memref<1x256x128xbf16, #tpu.memory_space<vmem>>, %arg3: memref<1x256x128xbf16, #tpu.memory_space<vmem>>, %arg4: memref<1x1x1xf32, #tpu.memory_space<vmem>>, %arg5: memref<1x1x1xf32, #tpu.memory_space<vmem>>, %arg6: memref<256x256xf32, #tpu.memory_space<vmem>>) attributes {dimension_semantics = [#tpu.dimension_semantics<parallel>, #tpu.dimension_semantics<arbitrary>], iteration_bounds = array<i64: 2, 1>, scalar_prefetch = 0 : i64, scratch_operands = 1 : i64, tpu.core_type = #tpu.core_type<tc>, window_params = [{transform_indices = @transform_0, window_bounds = array<i64: 1, 256, 128>}, {transform_indices = @transform_1, window_bounds = array<i64: 1, 256, 128>}, {transform_indices = @transform_2, window_bounds = array<i64: 1, 1, 1>}, {transform_indices = @transform_3, window_bounds = array<i64: 1, 1, 1>}]} {
    %c0_i32 = arith.constant 0 : i32
    %0 = arith.cmpi eq, %arg1, %c0_i32 : i32
    %1 = arith.extui %0 : i1 to i32
    %c0_i32_0 = arith.constant 0 : i32
    %2 = arith.cmpi ne, %1, %c0_i32_0 : i32
    scf.if %2 {
      %cst_19 = arith.constant 0.000000e+00 : f32
      %27 = vector.broadcast %cst_19 : f32 to vector<1x1x1xf32>
      %c0_20 = arith.constant 0 : index
      %c0_21 = arith.constant 0 : index
      %c0_22 = arith.constant 0 : index
      %28 = vector.load %arg4[%c0_20, %c0_21, %c0_22] : memref<1x1x1xf32, #tpu.memory_space<vmem>>, vector<1x1x1xf32>
      tpu.vector_store %arg4[%c0_20, %c0_21, %c0_22], %27 {strides = array<i32>} : memref<1x1x1xf32, #tpu.memory_space<vmem>>, vector<1x1x1xf32>,
      %cst_23 = arith.constant 0.000000e+00 : f32
      %29 = vector.broadcast %cst_23 : f32 to vector<256x256xf32>
      %c0_24 = arith.constant 0 : index
      %c0_25 = arith.constant 0 : index
      %30 = vector.load %arg6[%c0_24, %c0_25] : memref<256x256xf32, #tpu.memory_space<vmem>>, vector<256x256xf32>
      tpu.vector_store %arg6[%c0_24, %c0_25], %29 {strides = array<i32>} : memref<256x256xf32, #tpu.memory_space<vmem>>, vector<256x256xf32>,
    } else {
    }
    %c0 = arith.constant 0 : index
    %c0_1 = arith.constant 0 : index
    %c0_2 = arith.constant 0 : index
    %3 = vector.load %arg2[%c0, %c0_1, %c0_2] : memref<1x256x128xbf16, #tpu.memory_space<vmem>>, vector<1x256x128xbf16>
    %4 = vector.shape_cast %3 : vector<1x256x128xbf16> to vector<256x128xbf16>
    %c0_3 = arith.constant 0 : index
    %c0_4 = arith.constant 0 : index
    %c0_5 = arith.constant 0 : index
    %5 = vector.load %arg3[%c0_3, %c0_4, %c0_5] : memref<1x256x128xbf16, #tpu.memory_space<vmem>>, vector<1x256x128xbf16>
    %6 = vector.shape_cast %5 : vector<1x256x128xbf16> to vector<256x128xbf16>
    %7 = arith.extf %4 : vector<256x128xbf16> to vector<256x128xf32>
    %8 = arith.extf %6 : vector<256x128xbf16> to vector<256x128xf32>
    %9 = arith.subf %7, %8 : vector<256x128xf32>
    %c0_6 = arith.constant 0 : index
    %c0_7 = arith.constant 0 : index
    %c0_8 = arith.constant 0 : index
    %10 = vector.load %arg4[%c0_6, %c0_7, %c0_8] : memref<1x1x1xf32, #tpu.memory_space<vmem>>, vector<1x1x1xf32>
    %11 = math.absf %9 : vector<256x128xf32>
    %12 = vector.shape_cast %11 : vector<256x128xf32> to vector<1x256x128xf32>
    %cst = arith.constant dense<0.000000e+00> : vector<1xf32>
    %13 = vector.multi_reduction <add>, %12, %cst [1, 2] : vector<1x256x128xf32> to vector<1xf32>
    %14 = vector.shape_cast %13 : vector<1xf32> to vector<1x1x1xf32>
    %15 = vector.extract %14[0, 0, 0] : f32 from vector<1x1x1xf32>
    %16 = vector.broadcast %15 : f32 to vector<1x1x1xf32>
    %17 = arith.addf %10, %16 : vector<1x1x1xf32>
    %c0_9 = arith.constant 0 : index
    %c0_10 = arith.constant 0 : index
    %c0_11 = arith.constant 0 : index
    %18 = vector.load %arg4[%c0_9, %c0_10, %c0_11] : memref<1x1x1xf32, #tpu.memory_space<vmem>>, vector<1x1x1xf32>
    tpu.vector_store %arg4[%c0_9, %c0_10, %c0_11], %17 {strides = array<i32>} : memref<1x1x1xf32, #tpu.memory_space<vmem>>, vector<1x1x1xf32>,
    %19 = tpu.concatenate %4, %6 in 1 : vector<256x128xbf16>, vector<256x128xbf16> -> vector<256x256xbf16>
    %c0_12 = arith.constant 0 : index
    %c0_13 = arith.constant 0 : index
    %20 = vector.load %arg6[%c0_12, %c0_13] : memref<256x256xf32, #tpu.memory_space<vmem>>, vector<256x256xf32>
    %cst_14 = arith.constant dense<0.000000e+00> : vector<256x256xf32>
    %21 = tpu.matmul %19, %19, %cst_14 {dimension_numbers = #tpu.dot_dimension_numbers<[0], [0], [1], [1], [0, 1, 1, 1], [], []>} : vector<256x256xbf16>, vector<256x256xbf16>, vector<256x256xf32> -> vector<256x256xf32>
    %22 = arith.addf %20, %21 : vector<256x256xf32>
    %c0_15 = arith.constant 0 : index
    %c0_16 = arith.constant 0 : index
    %23 = vector.load %arg6[%c0_15, %c0_16] : memref<256x256xf32, #tpu.memory_space<vmem>>, vector<256x256xf32>
    tpu.vector_store %arg6[%c0_15, %c0_16], %22 {strides = array<i32>} : memref<256x256xf32, #tpu.memory_space<vmem>>, vector<256x256xf32>,
    %c0_i32_17 = arith.constant 0 : i32
    %24 = arith.cmpi eq, %arg1, %c0_i32_17 : i32
    %25 = arith.extui %24 : i1 to i32
    %c0_i32_18 = arith.constant 0 : i32
    %26 = arith.cmpi ne, %25, %c0_i32_18 : i32
    scf.if %26 {
      %c0_19 = arith.constant 0 : index
      %c0_20 = arith.constant 0 : index
      %27 = vector.load %arg6[%c0_19, %c0_20] : memref<256x256xf32, #tpu.memory_space<vmem>>, vector<128x128xf32>
      %c128 = arith.constant 128 : index
      %c128_21 = arith.constant 128 : index
      %28 = vector.load %arg6[%c128, %c128_21] : memref<256x256xf32, #tpu.memory_space<vmem>>, vector<128x128xf32>
      %29 = arith.subf %27, %28 : vector<128x128xf32>
      %30 = math.absf %29 : vector<128x128xf32>
      %31 = vector.shape_cast %30 : vector<128x128xf32> to vector<1x128x128xf32>
      %cst_22 = arith.constant dense<0.000000e+00> : vector<1xf32>
      %32 = vector.multi_reduction <add>, %31, %cst_22 [1, 2] : vector<1x128x128xf32> to vector<1xf32>
      %33 = vector.shape_cast %32 : vector<1xf32> to vector<1x1x1xf32>
      %34 = vector.extract %33[0, 0, 0] : f32 from vector<1x1x1xf32>
      %cst_23 = arith.constant 2.44140625E-4 : f32
      %35 = arith.mulf %34, %cst_23 : f32
      %36 = vector.broadcast %35 : f32 to vector<1x1x1xf32>
      %c0_24 = arith.constant 0 : index
      %c0_25 = arith.constant 0 : index
      %c0_26 = arith.constant 0 : index
      %37 = vector.load %arg5[%c0_24, %c0_25, %c0_26] : memref<1x1x1xf32, #tpu.memory_space<vmem>>, vector<1x1x1xf32>
      tpu.vector_store %arg5[%c0_24, %c0_25, %c0_26], %36 {strides = array<i32>} : memref<1x1x1xf32, #tpu.memory_space<vmem>>, vector<1x1x1xf32>,
    } else {
    }
    return
  }
  func.func @transform_0(%arg0: i32, %arg1: i32) -> (i32, i32, i32) {
    %c0_i32 = arith.constant 0 : i32
    %c0_i32_0 = arith.constant 0 : i32
    return %arg0, %arg1, %c0_i32 : i32, i32, i32
  }
  func.func @transform_1(%arg0: i32, %arg1: i32) -> (i32, i32, i32) {
    %c2_i32 = arith.constant 2 : i32
    %0 = arith.addi %arg0, %c2_i32 : i32
    %c0_i32 = arith.constant 0 : i32
    %c0_i32_0 = arith.constant 0 : i32
    return %0, %arg1, %c0_i32 : i32, i32, i32
  }
  func.func @transform_2(%arg0: i32, %arg1: i32) -> (i32, i32, i32) {
    %c0_i32 = arith.constant 0 : i32
    %c0_i32_0 = arith.constant 0 : i32
    %c0_i32_1 = arith.constant 0 : i32
    return %arg0, %c0_i32, %c0_i32_0 : i32, i32, i32
  }
  func.func @transform_3(%arg0: i32, %arg1: i32) -> (i32, i32, i32) {
    %c0_i32 = arith.constant 0 : i32
    %c0_i32_0 = arith.constant 0 : i32
    %c0_i32_1 = arith.constant 0 : i32
    return %arg0, %c0_i32, %c0_i32_0 : i32, i32, i32
  }
}

module attributes {stable_mosaic.version = 11 : i64} {
  func.func @_feat_gram_kernel(%arg0: i32, %arg1: i32, %arg2: memref<1x256x128xbf16, #tpu.memory_space<vmem>>, %arg3: memref<1x256x128xbf16, #tpu.memory_space<vmem>>, %arg4: memref<1x1x1xf32, #tpu.memory_space<vmem>>, %arg5: memref<1x1x1xf32, #tpu.memory_space<vmem>>, %arg6: memref<256x256xf32, #tpu.memory_space<vmem>>) attributes {dimension_semantics = [#tpu.dimension_semantics<parallel>, #tpu.dimension_semantics<arbitrary>], iteration_bounds = array<i64: 2, 1>, scalar_prefetch = 0 : i64, scratch_operands = 1 : i64, tpu.core_type = #tpu.core_type<tc>, window_params = [{transform_indices = @transform_0, window_bounds = array<i64: 1, 256, 128>}, {transform_indices = @transform_1, window_bounds = array<i64: 1, 256, 128>}, {transform_indices = @transform_2, window_bounds = array<i64: 1, 1, 1>}, {transform_indices = @transform_3, window_bounds = array<i64: 1, 1, 1>}]} {
    %c0_i32 = arith.constant 0 : i32
    %0 = arith.cmpi eq, %arg1, %c0_i32 : i32
    %1 = arith.extui %0 : i1 to i32
    %c0_i32_0 = arith.constant 0 : i32
    %2 = arith.cmpi ne, %1, %c0_i32_0 : i32
    scf.if %2 {
      %cst_19 = arith.constant 0.000000e+00 : f32
      %27 = vector.broadcast %cst_19 : f32 to vector<1x1x1xf32>
      %c0_20 = arith.constant 0 : index
      %c0_21 = arith.constant 0 : index
      %c0_22 = arith.constant 0 : index
      %28 = vector.load %arg4[%c0_20, %c0_21, %c0_22] : memref<1x1x1xf32, #tpu.memory_space<vmem>>, vector<1x1x1xf32>
      tpu.vector_store %arg4[%c0_20, %c0_21, %c0_22], %27 {strides = array<i32>} : memref<1x1x1xf32, #tpu.memory_space<vmem>>, vector<1x1x1xf32>,
      %cst_23 = arith.constant 0.000000e+00 : f32
      %29 = vector.broadcast %cst_23 : f32 to vector<256x256xf32>
      %c0_24 = arith.constant 0 : index
      %c0_25 = arith.constant 0 : index
      %30 = vector.load %arg6[%c0_24, %c0_25] : memref<256x256xf32, #tpu.memory_space<vmem>>, vector<256x256xf32>
      tpu.vector_store %arg6[%c0_24, %c0_25], %29 {strides = array<i32>} : memref<256x256xf32, #tpu.memory_space<vmem>>, vector<256x256xf32>,
    } else {
    }
    %c0 = arith.constant 0 : index
    %c0_1 = arith.constant 0 : index
    %c0_2 = arith.constant 0 : index
    %3 = vector.load %arg2[%c0, %c0_1, %c0_2] : memref<1x256x128xbf16, #tpu.memory_space<vmem>>, vector<1x256x128xbf16>
    %4 = vector.shape_cast %3 : vector<1x256x128xbf16> to vector<256x128xbf16>
    %c0_3 = arith.constant 0 : index
    %c0_4 = arith.constant 0 : index
    %c0_5 = arith.constant 0 : index
    %5 = vector.load %arg3[%c0_3, %c0_4, %c0_5] : memref<1x256x128xbf16, #tpu.memory_space<vmem>>, vector<1x256x128xbf16>
    %6 = vector.shape_cast %5 : vector<1x256x128xbf16> to vector<256x128xbf16>
    %7 = arith.extf %4 : vector<256x128xbf16> to vector<256x128xf32>
    %8 = arith.extf %6 : vector<256x128xbf16> to vector<256x128xf32>
    %9 = arith.subf %7, %8 : vector<256x128xf32>
    %c0_6 = arith.constant 0 : index
    %c0_7 = arith.constant 0 : index
    %c0_8 = arith.constant 0 : index
    %10 = vector.load %arg4[%c0_6, %c0_7, %c0_8] : memref<1x1x1xf32, #tpu.memory_space<vmem>>, vector<1x1x1xf32>
    %11 = math.absf %9 : vector<256x128xf32>
    %12 = vector.shape_cast %11 : vector<256x128xf32> to vector<1x256x128xf32>
    %cst = arith.constant dense<0.000000e+00> : vector<1xf32>
    %13 = vector.multi_reduction <add>, %12, %cst [1, 2] : vector<1x256x128xf32> to vector<1xf32>
    %14 = vector.shape_cast %13 : vector<1xf32> to vector<1x1x1xf32>
    %15 = vector.extract %14[0, 0, 0] : f32 from vector<1x1x1xf32>
    %16 = vector.broadcast %15 : f32 to vector<1x1x1xf32>
    %17 = arith.addf %10, %16 : vector<1x1x1xf32>
    %c0_9 = arith.constant 0 : index
    %c0_10 = arith.constant 0 : index
    %c0_11 = arith.constant 0 : index
    %18 = vector.load %arg4[%c0_9, %c0_10, %c0_11] : memref<1x1x1xf32, #tpu.memory_space<vmem>>, vector<1x1x1xf32>
    tpu.vector_store %arg4[%c0_9, %c0_10, %c0_11], %17 {strides = array<i32>} : memref<1x1x1xf32, #tpu.memory_space<vmem>>, vector<1x1x1xf32>,
    %19 = tpu.concatenate %4, %6 in 1 : vector<256x128xbf16>, vector<256x128xbf16> -> vector<256x256xbf16>
    %c0_12 = arith.constant 0 : index
    %c0_13 = arith.constant 0 : index
    %20 = vector.load %arg6[%c0_12, %c0_13] : memref<256x256xf32, #tpu.memory_space<vmem>>, vector<256x256xf32>
    %cst_14 = arith.constant dense<0.000000e+00> : vector<256x256xf32>
    %21 = tpu.matmul %19, %19, %cst_14 {dimension_numbers = #tpu.dot_dimension_numbers<[0], [0], [1], [1], [0, 1, 1, 1], [], []>} : vector<256x256xbf16>, vector<256x256xbf16>, vector<256x256xf32> -> vector<256x256xf32>
    %22 = arith.addf %20, %21 : vector<256x256xf32>
    %c0_15 = arith.constant 0 : index
    %c0_16 = arith.constant 0 : index
    %23 = vector.load %arg6[%c0_15, %c0_16] : memref<256x256xf32, #tpu.memory_space<vmem>>, vector<256x256xf32>
    tpu.vector_store %arg6[%c0_15, %c0_16], %22 {strides = array<i32>} : memref<256x256xf32, #tpu.memory_space<vmem>>, vector<256x256xf32>,
    %c0_i32_17 = arith.constant 0 : i32
    %24 = arith.cmpi eq, %arg1, %c0_i32_17 : i32
    %25 = arith.extui %24 : i1 to i32
    %c0_i32_18 = arith.constant 0 : i32
    %26 = arith.cmpi ne, %25, %c0_i32_18 : i32
    scf.if %26 {
      %c0_19 = arith.constant 0 : index
      %c0_20 = arith.constant 0 : index
      %27 = vector.load %arg6[%c0_19, %c0_20] : memref<256x256xf32, #tpu.memory_space<vmem>>, vector<128x128xf32>
      %c128 = arith.constant 128 : index
      %c128_21 = arith.constant 128 : index
      %28 = vector.load %arg6[%c128, %c128_21] : memref<256x256xf32, #tpu.memory_space<vmem>>, vector<128x128xf32>
      %29 = arith.subf %27, %28 : vector<128x128xf32>
      %30 = math.absf %29 : vector<128x128xf32>
      %31 = vector.shape_cast %30 : vector<128x128xf32> to vector<1x128x128xf32>
      %cst_22 = arith.constant dense<0.000000e+00> : vector<1xf32>
      %32 = vector.multi_reduction <add>, %31, %cst_22 [1, 2] : vector<1x128x128xf32> to vector<1xf32>
      %33 = vector.shape_cast %32 : vector<1xf32> to vector<1x1x1xf32>
      %34 = vector.extract %33[0, 0, 0] : f32 from vector<1x1x1xf32>
      %cst_23 = arith.constant 4.8828125E-4 : f32
      %35 = arith.mulf %34, %cst_23 : f32
      %36 = vector.broadcast %35 : f32 to vector<1x1x1xf32>
      %c0_24 = arith.constant 0 : index
      %c0_25 = arith.constant 0 : index
      %c0_26 = arith.constant 0 : index
      %37 = vector.load %arg5[%c0_24, %c0_25, %c0_26] : memref<1x1x1xf32, #tpu.memory_space<vmem>>, vector<1x1x1xf32>
      tpu.vector_store %arg5[%c0_24, %c0_25, %c0_26], %36 {strides = array<i32>} : memref<1x1x1xf32, #tpu.memory_space<vmem>>, vector<1x1x1xf32>,
    } else {
    }
    return
  }
  func.func @transform_0(%arg0: i32, %arg1: i32) -> (i32, i32, i32) {
    %c0_i32 = arith.constant 0 : i32
    %c0_i32_0 = arith.constant 0 : i32
    return %arg0, %arg1, %c0_i32 : i32, i32, i32
  }
  func.func @transform_1(%arg0: i32, %arg1: i32) -> (i32, i32, i32) {
    %c2_i32 = arith.constant 2 : i32
    %0 = arith.addi %arg0, %c2_i32 : i32
    %c0_i32 = arith.constant 0 : i32
    %c0_i32_0 = arith.constant 0 : i32
    return %0, %arg1, %c0_i32 : i32, i32, i32
  }
  func.func @transform_2(%arg0: i32, %arg1: i32) -> (i32, i32, i32) {
    %c0_i32 = arith.constant 0 : i32
    %c0_i32_0 = arith.constant 0 : i32
    %c0_i32_1 = arith.constant 0 : i32
    return %arg0, %c0_i32, %c0_i32_0 : i32, i32, i32
  }
  func.func @transform_3(%arg0: i32, %arg1: i32) -> (i32, i32, i32) {
    %c0_i32 = arith.constant 0 : i32
    %c0_i32_0 = arith.constant 0 : i32
    %c0_i32_1 = arith.constant 0 : i32
    return %arg0, %c0_i32, %c0_i32_0 : i32, i32, i32
  }
}

module attributes {stable_mosaic.version = 11 : i64} {
  func.func @_pixel_stats_kernel(%arg0: i32, %arg1: i32, %arg2: memref<1x3x256xf32, #tpu.memory_space<vmem>>, %arg3: memref<1x3x256xf32, #tpu.memory_space<vmem>>, %arg4: memref<1x1x1xf32, #tpu.memory_space<vmem>>, %arg5: memref<1x1x1xf32, #tpu.memory_space<vmem>>, %arg6: memref<1x1x1xf32, #tpu.memory_space<vmem>>) attributes {dimension_semantics = [#tpu.dimension_semantics<parallel>, #tpu.dimension_semantics<arbitrary>], iteration_bounds = array<i64: 2, 1>, scalar_prefetch = 0 : i64, scratch_operands = 0 : i64, tpu.core_type = #tpu.core_type<tc>, window_params = [{transform_indices = @transform_0, window_bounds = array<i64: 1, 3, 256>}, {transform_indices = @transform_1, window_bounds = array<i64: 1, 3, 256>}, {transform_indices = @transform_2, window_bounds = array<i64: 1, 1, 1>}, {transform_indices = @transform_3, window_bounds = array<i64: 1, 1, 1>}, {transform_indices = @transform_4, window_bounds = array<i64: 1, 1, 1>}]} {
    %c0_i32 = arith.constant 0 : i32
    %0 = arith.cmpi eq, %arg1, %c0_i32 : i32
    %1 = arith.extui %0 : i1 to i32
    %c0_i32_0 = arith.constant 0 : i32
    %2 = arith.cmpi ne, %1, %c0_i32_0 : i32
    scf.if %2 {
      %cst_30 = arith.constant 0.000000e+00 : f32
      %47 = vector.broadcast %cst_30 : f32 to vector<1x1x1xf32>
      %c0_31 = arith.constant 0 : index
      %c0_32 = arith.constant 0 : index
      %c0_33 = arith.constant 0 : index
      %48 = vector.load %arg4[%c0_31, %c0_32, %c0_33] : memref<1x1x1xf32, #tpu.memory_space<vmem>>, vector<1x1x1xf32>
      tpu.vector_store %arg4[%c0_31, %c0_32, %c0_33], %47 {strides = array<i32>} : memref<1x1x1xf32, #tpu.memory_space<vmem>>, vector<1x1x1xf32>,
      %cst_34 = arith.constant 0.000000e+00 : f32
      %49 = vector.broadcast %cst_34 : f32 to vector<1x1x1xf32>
      %c0_35 = arith.constant 0 : index
      %c0_36 = arith.constant 0 : index
      %c0_37 = arith.constant 0 : index
      %50 = vector.load %arg5[%c0_35, %c0_36, %c0_37] : memref<1x1x1xf32, #tpu.memory_space<vmem>>, vector<1x1x1xf32>
      tpu.vector_store %arg5[%c0_35, %c0_36, %c0_37], %49 {strides = array<i32>} : memref<1x1x1xf32, #tpu.memory_space<vmem>>, vector<1x1x1xf32>,
      %cst_38 = arith.constant 0.000000e+00 : f32
      %51 = vector.broadcast %cst_38 : f32 to vector<1x1x1xf32>
      %c0_39 = arith.constant 0 : index
      %c0_40 = arith.constant 0 : index
      %c0_41 = arith.constant 0 : index
      %52 = vector.load %arg6[%c0_39, %c0_40, %c0_41] : memref<1x1x1xf32, #tpu.memory_space<vmem>>, vector<1x1x1xf32>
      tpu.vector_store %arg6[%c0_39, %c0_40, %c0_41], %51 {strides = array<i32>} : memref<1x1x1xf32, #tpu.memory_space<vmem>>, vector<1x1x1xf32>,
    } else {
    }
    %c0 = arith.constant 0 : index
    %c0_1 = arith.constant 0 : index
    %c0_2 = arith.constant 0 : index
    %3 = vector.load %arg2[%c0, %c0_1, %c0_2] : memref<1x3x256xf32, #tpu.memory_space<vmem>>, vector<1x3x256xf32>
    %4 = vector.shape_cast %3 : vector<1x3x256xf32> to vector<3x256xf32>
    %c0_3 = arith.constant 0 : index
    %c0_4 = arith.constant 0 : index
    %c0_5 = arith.constant 0 : index
    %5 = vector.load %arg3[%c0_3, %c0_4, %c0_5] : memref<1x3x256xf32, #tpu.memory_space<vmem>>, vector<1x3x256xf32>
    %6 = vector.shape_cast %5 : vector<1x3x256xf32> to vector<3x256xf32>
    %7 = arith.subf %4, %6 : vector<3x256xf32>
    %c0_6 = arith.constant 0 : index
    %c0_7 = arith.constant 0 : index
    %c0_8 = arith.constant 0 : index
    %8 = vector.load %arg4[%c0_6, %c0_7, %c0_8] : memref<1x1x1xf32, #tpu.memory_space<vmem>>, vector<1x1x1xf32>
    %9 = math.absf %7 : vector<3x256xf32>
    %10 = vector.shape_cast %9 : vector<3x256xf32> to vector<1x3x256xf32>
    %cst = arith.constant dense<0.000000e+00> : vector<1xf32>
    %11 = vector.multi_reduction <add>, %10, %cst [1, 2] : vector<1x3x256xf32> to vector<1xf32>
    %12 = vector.shape_cast %11 : vector<1xf32> to vector<1x1x1xf32>
    %13 = vector.extract %12[0, 0, 0] : f32 from vector<1x1x1xf32>
    %14 = vector.broadcast %13 : f32 to vector<1x1x1xf32>
    %15 = arith.addf %8, %14 : vector<1x1x1xf32>
    %c0_9 = arith.constant 0 : index
    %c0_10 = arith.constant 0 : index
    %c0_11 = arith.constant 0 : index
    %16 = vector.load %arg4[%c0_9, %c0_10, %c0_11] : memref<1x1x1xf32, #tpu.memory_space<vmem>>, vector<1x1x1xf32>
    tpu.vector_store %arg4[%c0_9, %c0_10, %c0_11], %15 {strides = array<i32>} : memref<1x1x1xf32, #tpu.memory_space<vmem>>, vector<1x1x1xf32>,
    %c0_12 = arith.constant 0 : index
    %c0_13 = arith.constant 0 : index
    %c0_14 = arith.constant 0 : index
    %17 = vector.load %arg5[%c0_12, %c0_13, %c0_14] : memref<1x1x1xf32, #tpu.memory_space<vmem>>, vector<1x1x1xf32>
    %18 = arith.mulf %7, %7 : vector<3x256xf32>
    %19 = vector.shape_cast %18 : vector<3x256xf32> to vector<1x3x256xf32>
    %cst_15 = arith.constant dense<0.000000e+00> : vector<1xf32>
    %20 = vector.multi_reduction <add>, %19, %cst_15 [1, 2] : vector<1x3x256xf32> to vector<1xf32>
    %21 = vector.shape_cast %20 : vector<1xf32> to vector<1x1x1xf32>
    %22 = vector.extract %21[0, 0, 0] : f32 from vector<1x1x1xf32>
    %23 = vector.broadcast %22 : f32 to vector<1x1x1xf32>
    %24 = arith.addf %17, %23 : vector<1x1x1xf32>
    %c0_16 = arith.constant 0 : index
    %c0_17 = arith.constant 0 : index
    %c0_18 = arith.constant 0 : index
    %25 = vector.load %arg5[%c0_16, %c0_17, %c0_18] : memref<1x1x1xf32, #tpu.memory_space<vmem>>, vector<1x1x1xf32>
    tpu.vector_store %arg5[%c0_16, %c0_17, %c0_18], %24 {strides = array<i32>} : memref<1x1x1xf32, #tpu.memory_space<vmem>>, vector<1x1x1xf32>,
    %26 = math.absf %7 : vector<3x256xf32>
    %cst_19 = arith.constant 2.550000e+02 : f32
    %27 = vector.broadcast %cst_19 : f32 to vector<3x256xf32>
    %28 = arith.mulf %26, %27 : vector<3x256xf32>
    %cst_20 = arith.constant 1.000000e-01 : f32
    %29 = vector.broadcast %cst_20 : f32 to vector<3x256xf32>
    %30 = arith.cmpf ole, %28, %29 : vector<3x256xf32>
    %31 = arith.extui %30 : vector<3x256xi1> to vector<3x256xi32>
    %32 = arith.sitofp %31 : vector<3x256xi32> to vector<3x256xf32>
    %cst_21 = arith.constant dense<0.000000e+00> : vector<256xf32>
    %33 = vector.multi_reduction <add>, %32, %cst_21 [0] : vector<3x256xf32> to vector<256xf32>
    %34 = vector.shape_cast %33 : vector<256xf32> to vector<1x256xf32>
    %cst_22 = arith.constant 3.000000e+00 : f32
    %35 = vector.broadcast %cst_22 : f32 to vector<1x256xf32>
    %36 = arith.cmpf oeq, %34, %35 : vector<1x256xf32>
    %37 = arith.extui %36 : vector<1x256xi1> to vector<1x256xi32>
    %38 = arith.sitofp %37 : vector<1x256xi32> to vector<1x256xf32>
    %c0_23 = arith.constant 0 : index
    %c0_24 = arith.constant 0 : index
    %c0_25 = arith.constant 0 : index
    %39 = vector.load %arg6[%c0_23, %c0_24, %c0_25] : memref<1x1x1xf32, #tpu.memory_space<vmem>>, vector<1x1x1xf32>
    %40 = vector.shape_cast %38 : vector<1x256xf32> to vector<1x1x256xf32>
    %cst_26 = arith.constant dense<0.000000e+00> : vector<1xf32>
    %41 = vector.multi_reduction <add>, %40, %cst_26 [1, 2] : vector<1x1x256xf32> to vector<1xf32>
    %42 = vector.shape_cast %41 : vector<1xf32> to vector<1x1x1xf32>
    %43 = vector.extract %42[0, 0, 0] : f32 from vector<1x1x1xf32>
    %44 = vector.broadcast %43 : f32 to vector<1x1x1xf32>
    %45 = arith.addf %39, %44 : vector<1x1x1xf32>
    %c0_27 = arith.constant 0 : index
    %c0_28 = arith.constant 0 : index
    %c0_29 = arith.constant 0 : index
    %46 = vector.load %arg6[%c0_27, %c0_28, %c0_29] : memref<1x1x1xf32, #tpu.memory_space<vmem>>, vector<1x1x1xf32>
    tpu.vector_store %arg6[%c0_27, %c0_28, %c0_29], %45 {strides = array<i32>} : memref<1x1x1xf32, #tpu.memory_space<vmem>>, vector<1x1x1xf32>,
    return
  }
  func.func @transform_0(%arg0: i32, %arg1: i32) -> (i32, i32, i32) {
    %c0_i32 = arith.constant 0 : i32
    %c0_i32_0 = arith.constant 0 : i32
    return %arg0, %c0_i32, %arg1 : i32, i32, i32
  }
  func.func @transform_1(%arg0: i32, %arg1: i32) -> (i32, i32, i32) {
    %c0_i32 = arith.constant 0 : i32
    %c0_i32_0 = arith.constant 0 : i32
    return %arg0, %c0_i32, %arg1 : i32, i32, i32
  }
  func.func @transform_2(%arg0: i32, %arg1: i32) -> (i32, i32, i32) {
    %c0_i32 = arith.constant 0 : i32
    %c0_i32_0 = arith.constant 0 : i32
    %c0_i32_1 = arith.constant 0 : i32
    return %arg0, %c0_i32, %c0_i32_0 : i32, i32, i32
  }
  func.func @transform_3(%arg0: i32, %arg1: i32) -> (i32, i32, i32) {
    %c0_i32 = arith.constant 0 : i32
    %c0_i32_0 = arith.constant 0 : i32
    %c0_i32_1 = arith.constant 0 : i32
    return %arg0, %c0_i32, %c0_i32_0 : i32, i32, i32
  }
  func.func @transform_4(%arg0: i32, %arg1: i32) -> (i32, i32, i32) {
    %c0_i32 = arith.constant 0 : i32
    %c0_i32_0 = arith.constant 0 : i32
    %c0_i32_1 = arith.constant 0 : i32
    return %arg0, %c0_i32, %c0_i32_0 : i32, i32, i32
  }
}

</mosaic_0001>

<bundles_post_ra>
// kernel: _lambda_.6
= control target key start
LH: loop header
LB: loop body
LE: loop exit
PB: predicated region body
PF: predicated region fallthrough
CT: control target
= control target key end

     0   :  { %s3492_s1 = inlined_call_operand.vmem [shape: bf16[128,128], index: 1, kind: input, shape index: {}]   ;;  %s3493_s0 = inlined_call_operand.vmem [shape: bf16[1024,128], index: 0, kind: input, shape index: {}]   ;;  %s3494_s2 = inlined_call_operand.vmem [shape: f32[1,128], index: 2, kind: input, shape index: {}]   ;;  %s3495_s3 = inlined_call_operand.vmem [shape: bf16[1024,128], index: 3, kind: output, shape index: {}]  }
   0x1   :  { %v2859_v0 = vld [vmem:[%s3492_s1] sm:$0xff]   ;;  %v2860_v1 = vld [vmem:[%s3492_s1 + $0x8] sm:$0xff]   ;;  %v2861_v2 = vld [vmem:[%s3492_s1 + $0x10] sm:$0xff]  }
   0x2   :  { %2699 = vmatprep.subr.bf16.mxu0 %v2859_v0  ;;  %2843 = vmatprep.subr.bf16.mxu1 %v2859_v0  ;;  %v2862_v3 = vld [vmem:[%s3492_s1 + $0x18] sm:$0xff]   ;;  %v2867_v4 = vld [vmem:[%s3493_s0] sm:$0xff]   ;;  %v2864_v7 = vld [vmem:[%s3492_s1 + $0x28] sm:$0xff]  }
   0x3   :  { %2700 = vmatpush3.bf16.msra.mxu0 %v2859_v0  ;;  %2851 = vmatpush3.bf16.msra.mxu1 %v2859_v0  ;;  %v2868_v5 = vld [vmem:[%s3493_s0 + $0x100] sm:$0xff]   ;;  %v2865_v8 = vld [vmem:[%s3492_s1 + $0x30] sm:$0xff]   ;;  %v2866_v9 = vld [vmem:[%s3492_s1 + $0x38] sm:$0xff]  }
   0x4   :  { %2701 = vmatprep.subr.bf16.mxu0 %v2860_v1  ;;  %2844 = vmatprep.subr.bf16.mxu1 %v2860_v1  ;;  %v2863_v6 = vld [vmem:[%s3492_s1 + $0x20] sm:$0xff]   ;;  %v2869_v10 = vld [vmem:[%s3493_s0 + $0x8] sm:$0xff]   ;;  %v2871_v12 = vld [vmem:[%s3493_s0 + $0x10] sm:$0xff]  }
   0x5   :  { %2715 = vmatprep.mubr.bf16.mxu0 %v2867_v4  ;;  %2779 = vmatprep.mubr.bf16.mxu1 %v2868_v5  ;;  %v2870_v11 = vld [vmem:[%s3493_s0 + $0x108] sm:$0xff]   ;;  %v2872_v13 = vld [vmem:[%s3493_s0 + $0x110] sm:$0xff]   ;;  %v2873_v14 = vld [vmem:[%s3493_s0 + $0x18] sm:$0xff]  }
   0x6   :  { %v2874_v15 = vld [vmem:[%s3493_s0 + $0x118] sm:$0xff]   ;;  %v2875_v16 = vld [vmem:[%s3493_s0 + $0x20] sm:$0xff]   ;;  %v2877_v18 = vld [vmem:[%s3493_s0 + $0x28] sm:$0xff]  }
   0x7   :  { %2702 = vmatpush3.bf16.msra.mxu0 %v2860_v1  ;;  %2852 = vmatpush3.bf16.msra.mxu1 %v2860_v1  ;;  %v2876_v17 = vld [vmem:[%s3493_s0 + $0x120] sm:$0xff]   ;;  %v2878_v19 = vld [vmem:[%s3493_s0 + $0x128] sm:$0xff]   ;;  %v2879_v20 = vld [vmem:[%s3493_s0 + $0x30] sm:$0xff]  }
   0x8   :  { %2703 = vmatprep.subr.bf16.mxu0 %v2861_v2  ;;  %2845 = vmatprep.subr.bf16.mxu1 %v2861_v2  ;;  %v2880_v21 = vld [vmem:[%s3493_s0 + $0x130] sm:$0xff]   ;;  %v2881_v22 = vld [vmem:[%s3493_s0 + $0x38] sm:$0xff]   ;;  %v2883_v24 = vld [vmem:[%s3493_s0 + $0x40] sm:$0xff]  }
   0x9   :  { %v2882_v23 = vld [vmem:[%s3493_s0 + $0x138] sm:$0xff]   ;;  %v2884_v25 = vld [vmem:[%s3493_s0 + $0x140] sm:$0xff]   ;;  %v2885_v26 = vld [vmem:[%s3493_s0 + $0x48] sm:$0xff]  }
   0xa   :  { %v2886_v27 = vld [vmem:[%s3493_s0 + $0x148] sm:$0xff]   ;;  %v2887_v28 = vld [vmem:[%s3493_s0 + $0x50] sm:$0xff]   ;;  %v2889_v30 = vld [vmem:[%s3493_s0 + $0x58] sm:$0xff]  }
   0xb   :  { %2704 = vmatpush3.bf16.msra.mxu0 %v2861_v2  ;;  %2853 = vmatpush3.bf16.msra.mxu1 %v2861_v2  ;;  %v2888_v29 = vld [vmem:[%s3493_s0 + $0x150] sm:$0xff]   ;;  %v2890_v31 = vld [vmem:[%s3493_s0 + $0x158] sm:$0xff]   ;;  %v2891_v32 = vld [vmem:[%s3493_s0 + $0x60] sm:$0xff]  }
   0xc   :  { %2705 = vmatprep.subr.bf16.mxu0 %v2862_v3  ;;  %2846 = vmatprep.subr.bf16.mxu1 %v2862_v3  ;;  %v2892_v33 = vld [vmem:[%s3493_s0 + $0x160] sm:$0xff]   ;;  %v2893_v34 = vld [vmem:[%s3493_s0 + $0x68] sm:$0xff]   ;;  %v2895_v36 = vld [vmem:[%s3493_s0 + $0x70] sm:$0xff]  }
   0xd   :  { %v2894_v35 = vld [vmem:[%s3493_s0 + $0x168] sm:$0xff]   ;;  %v2896_v37 = vld [vmem:[%s3493_s0 + $0x170] sm:$0xff]   ;;  %v2897_v38 = vld [vmem:[%s3493_s0 + $0x78] sm:$0xff]  }
   0xe   :  { %v2898_v39 = vld [vmem:[%s3493_s0 + $0x178] sm:$0xff]   ;;  %v2899_v40 = vld [vmem:[%s3493_s0 + $0x80] sm:$0xff]   ;;  %v2901_v42 = vld [vmem:[%s3493_s0 + $0x88] sm:$0xff]  }
   0xf   :  { %2706 = vmatpush3.bf16.msra.mxu0 %v2862_v3  ;;  %2854 = vmatpush3.bf16.msra.mxu1 %v2862_v3  ;;  %v2900_v41 = vld [vmem:[%s3493_s0 + $0x180] sm:$0xff]   ;;  %v2902_v43 = vld [vmem:[%s3493_s0 + $0x188] sm:$0xff]   ;;  %v2903_v44 = vld [vmem:[%s3493_s0 + $0x90] sm:$0xff]  }
  0x10   :  { %2707 = vmatprep.subr.bf16.mxu0 %v2863_v6  ;;  %2847 = vmatprep.subr.bf16.mxu1 %v2863_v6  ;;  %v2904_v45 = vld [vmem:[%s3493_s0 + $0x190] sm:$0xff]   ;;  %v2905_v46 = vld [vmem:[%s3493_s0 + $0x98] sm:$0xff]   ;;  %v2907_v48 = vld [vmem:[%s3493_s0 + $0xa0] sm:$0xff]  }
  0x11   :  { %v2906_v47 = vld [vmem:[%s3493_s0 + $0x198] sm:$0xff]   ;;  %v2908_v49 = vld [vmem:[%s3493_s0 + $0x1a0] sm:$0xff]   ;;  %v2909_v50 = vld [vmem:[%s3493_s0 + $0xa8] sm:$0xff]  }
  0x12   :  { %v2910_v51 = vld [vmem:[%s3493_s0 + $0x1a8] sm:$0xff]   ;;  %v2911_v52 = vld [vmem:[%s3493_s0 + $0xb0] sm:$0xff]   ;;  %v2913_v54 = vld [vmem:[%s3493_s0 + $0xb8] sm:$0xff]  }
  0x13   :  { %2708 = vmatpush3.bf16.msra.mxu0 %v2863_v6  ;;  %2855 = vmatpush3.bf16.msra.mxu1 %v2863_v6  ;;  %v2912_v53 = vld [vmem:[%s3493_s0 + $0x1b0] sm:$0xff]   ;;  %v2914_v55 = vld [vmem:[%s3493_s0 + $0x1b8] sm:$0xff]   ;;  %v2915_v56 = vld [vmem:[%s3493_s0 + $0xc0] sm:$0xff]  }
  0x14   :  { %2709 = vmatprep.subr.bf16.mxu0 %v2864_v7  ;;  %2848 = vmatprep.subr.bf16.mxu1 %v2864_v7  ;;  %v2916_v57 = vld [vmem:[%s3493_s0 + $0x1c0] sm:$0xff]   ;;  %v2917_v58 = vld [vmem:[%s3493_s0 + $0xc8] sm:$0xff]   ;;  %v2919_v60 = vld [vmem:[%s3493_s0 + $0xd0] sm:$0xff]  }
  0x15   :  { %v2918_v59 = vld [vmem:[%s3493_s0 + $0x1c8] sm:$0xff]   ;;  %v2920_v61 = vld [vmem:[%s3493_s0 + $0x1d0] sm:$0xff]   ;;  %v2921_v62 = vld [vmem:[%s3493_s0 + $0xd8] sm:$0xff]  }
  0x16   :  { %v2922_v63 = vld [vmem:[%s3493_s0 + $0x1d8] sm:$0xff]   ;;  %v2923_v0 = vld [vmem:[%s3493_s0 + $0xe0] sm:$0xff]   ;;  %v2925_v2 = vld [vmem:[%s3493_s0 + $0xe8] sm:$0xff]  }
  0x17   :  { %2710 = vmatpush3.bf16.msra.mxu0 %v2864_v7  ;;  %2856 = vmatpush3.bf16.msra.mxu1 %v2864_v7  ;;  %v2924_v1 = vld [vmem:[%s3493_s0 + $0x1e0] sm:$0xff]   ;;  %v2926_v3 = vld [vmem:[%s3493_s0 + $0x1e8] sm:$0xff]   ;;  %v2927_v4 = vld [vmem:[%s3493_s0 + $0xf0] sm:$0xff]  }
  0x18   :  { %2711 = vmatprep.subr.bf16.mxu0 %v2865_v8  ;;  %2849 = vmatprep.subr.bf16.mxu1 %v2865_v8  ;;  %v2928_v5 = vld [vmem:[%s3493_s0 + $0x1f0] sm:$0xff]   ;;  %v2929_v6 = vld [vmem:[%s3493_s0 + $0xf8] sm:$0xff]  }
  0x19   :  { %v2930_v7 = vld [vmem:[%s3493_s0 + $0x1f8] sm:$0xff]  }
  0x1b   :  { %2712 = vmatpush3.bf16.msra.mxu0 %v2865_v8  ;;  %2857 = vmatpush3.bf16.msra.mxu1 %v2865_v8  ;;  %v3170_v8 = vld [vmem:[%s3494_s2] ss:$0 sm:$0xff] }
  0x1c   :  { %2713 = vmatprep.subr.bf16.mxu0 %v2866_v9  ;;  %2850 = vmatprep.subr.bf16.mxu1 %v2866_v9 }
  0x1f   :  { %2714 = vmatpush3.bf16.msra.mxu0 %v2866_v9  ;;  %2858 = vmatpush3.bf16.msra.mxu1 %v2866_v9 }
  0x22   :  { %2716 = vmatmul.mubr.bf16.vlgmr.msra.gmra.mrb[0].mxu0 %v2869_v10  ;;  %2780 = vmatmul.mubr.bf16.vlgmr.msra.gmra.mrb[0].mxu1 %v2870_v11 }
  0x23   :  { %2719 = vmatprep.mubr.bf16.mxu0 %v2871_v12  ;;  %2783 = vmatprep.mubr.bf16.mxu1 %v2872_v13 }
  0x2a   :  { %2720 = vmatmul.mubr.bf16.gmra.mrb[4].mxu0 %v2873_v14  ;;  %2784 = vmatmul.mubr.bf16.gmra.mrb[4].mxu1 %v2874_v15 }
  0x2b   :  { %2723 = vmatprep.mubr.bf16.mxu0 %v2875_v16  ;;  %2787 = vmatprep.mubr.bf16.mxu1 %v2876_v17 }
  0x32   :  { %2724 = vmatmul.mubr.bf16.gmra.mrb[8].mxu0 %v2877_v18  ;;  %2788 = vmatmul.mubr.bf16.gmra.mrb[8].mxu1 %v2878_v19 }
  0x33   :  { %2727 = vmatprep.mubr.bf16.mxu0 %v2879_v20  ;;  %2791 = vmatprep.mubr.bf16.mxu1 %v2880_v21 }
  0x3a   :  { %2728 = vmatmul.mubr.bf16.gmra.mrb[12].mxu0 %v2881_v22  ;;  %2792 = vmatmul.mubr.bf16.gmra.mrb[12].mxu1 %v2882_v23 }
  0x3b   :  { %2731 = vmatprep.mubr.bf16.mxu0 %v2883_v24  ;;  %2795 = vmatprep.mubr.bf16.mxu1 %v2884_v25 }
  0x42   :  { %2732 = vmatmul.mubr.bf16.gmra.mrb[16].mxu0 %v2885_v26  ;;  %2796 = vmatmul.mubr.bf16.gmra.mrb[16].mxu1 %v2886_v27 }
  0x43   :  { %2735 = vmatprep.mubr.bf16.mxu0 %v2887_v28  ;;  %2799 = vmatprep.mubr.bf16.mxu1 %v2888_v29 }
  0x4a   :  { %2736 = vmatmul.mubr.bf16.gmra.mrb[20].mxu0 %v2889_v30  ;;  %2800 = vmatmul.mubr.bf16.gmra.mrb[20].mxu1 %v2890_v31 }
  0x4b   :  { %2739 = vmatprep.mubr.bf16.mxu0 %v2891_v32  ;;  %2803 = vmatprep.mubr.bf16.mxu1 %v2892_v33 }
  0x52   :  { %2740 = vmatmul.mubr.bf16.gmra.mrb[24].mxu0 %v2893_v34  ;;  %2804 = vmatmul.mubr.bf16.gmra.mrb[24].mxu1 %v2894_v35 }
  0x53   :  { %2743 = vmatprep.mubr.bf16.mxu0 %v2895_v36  ;;  %2807 = vmatprep.mubr.bf16.mxu1 %v2896_v37 }
  0x5a   :  { %2744 = vmatmul.mubr.bf16.gmra.mrb[28].mxu0 %v2897_v38  ;;  %2808 = vmatmul.mubr.bf16.gmra.mrb[28].mxu1 %v2898_v39 }
  0x5b   :  { %2747 = vmatprep.mubr.bf16.mxu0 %v2899_v40  ;;  %2811 = vmatprep.mubr.bf16.mxu1 %v2900_v41 }
  0x62   :  { %2748 = vmatmul.mubr.bf16.gmra.mrb[32].mxu0 %v2901_v42  ;;  %2812 = vmatmul.mubr.bf16.gmra.mrb[32].mxu1 %v2902_v43 }
  0x63   :  { %2751 = vmatprep.mubr.bf16.mxu0 %v2903_v44  ;;  %2815 = vmatprep.mubr.bf16.mxu1 %v2904_v45 }
  0x6a   :  { %2752 = vmatmul.mubr.bf16.gmra.mrb[36].mxu0 %v2905_v46  ;;  %2816 = vmatmul.mubr.bf16.gmra.mrb[36].mxu1 %v2906_v47 }
  0x6b   :  { %2755 = vmatprep.mubr.bf16.mxu0 %v2907_v48  ;;  %2819 = vmatprep.mubr.bf16.mxu1 %v2908_v49 }
  0x72   :  { %2756 = vmatmul.mubr.bf16.gmra.mrb[40].mxu0 %v2909_v50  ;;  %2820 = vmatmul.mubr.bf16.gmra.mrb[40].mxu1 %v2910_v51 }
  0x73   :  { %2759 = vmatprep.mubr.bf16.mxu0 %v2911_v52  ;;  %2823 = vmatprep.mubr.bf16.mxu1 %v2912_v53 }
  0x7a   :  { %2760 = vmatmul.mubr.bf16.gmra.mrb[44].mxu0 %v2913_v54  ;;  %2824 = vmatmul.mubr.bf16.gmra.mrb[44].mxu1 %v2914_v55 }
  0x7b   :  { %2763 = vmatprep.mubr.bf16.mxu0 %v2915_v56  ;;  %2827 = vmatprep.mubr.bf16.mxu1 %v2916_v57 }
  0x82   :  { %2764 = vmatmul.mubr.bf16.gmra.mrb[48].mxu0 %v2917_v58  ;;  %2828 = vmatmul.mubr.bf16.gmra.mrb[48].mxu1 %v2918_v59 }
  0x83   :  { %2767 = vmatprep.mubr.bf16.mxu0 %v2919_v60  ;;  %2831 = vmatprep.mubr.bf16.mxu1 %v2920_v61 }
  0x8a   :  { %2768 = vmatmul.mubr.bf16.gmra.mrb[52].mxu0 %v2921_v62  ;;  %2832 = vmatmul.mubr.bf16.gmra.mrb[52].mxu1 %v2922_v63 }
  0x8b   :  { %2771 = vmatprep.mubr.bf16.mxu0 %v2923_v0  ;;  %2835 = vmatprep.mubr.bf16.mxu1 %v2924_v1 }
  0x92   :  { %2772 = vmatmul.mubr.bf16.gmra.mrb[56].mxu0 %v2925_v2  ;;  %2836 = vmatmul.mubr.bf16.gmra.mrb[56].mxu1 %v2926_v3 }
  0x93   :  { %2775 = vmatprep.mubr.bf16.mxu0 %v2927_v4  ;;  %2839 = vmatprep.mubr.bf16.mxu1 %v2928_v5 }
  0x9a   :  { %2776 = vmatmul.mubr.bf16.gmra.mrb[60].mxu0 %v2929_v6  ;;  %2840 = vmatmul.mubr.bf16.gmra.mrb[60].mxu1 %v2930_v7 }
  0xf5   :  { %v2717_v9 = vpop.f32.mrb[0].mxu0  ;;  %v2781_v10 = vpop.f32.mrb[0].mxu1 }
  0xf6   :  { %v641_v11 = vadd.f32 %v2717_v9, %v3170_v8  ;;  %v897_v12 = vadd.f32 %v2781_v10, %v3170_v8  ;;  %v632_v13 = vpop.f32.mrb[1].mxu0  ;;  %v888_v14 = vpop.f32.mrb[1].mxu1 }
  0xf7   :  { %v633_v15 = vadd.f32 %v3170_v8, %v632_v13  ;;  %v889_v16 = vadd.f32 %v3170_v8, %v888_v14  ;;  %v2718_v17 = vpop.f32.mrb[2].mxu0  ;;  %v2782_v18 = vpop.f32.mrb[2].mxu1 }
  0xf8   :  { %v644_v19 = vadd.f32 %v2718_v17, %v3170_v8  ;;  %v900_v20 = vadd.f32 %v2782_v18, %v3170_v8  ;;  %v635_v21 = vpop.f32.mrb[3].mxu0  ;;  %v891_v22 = vpop.f32.mrb[3].mxu1  ;;  %v1145_v25 = vmax.f32 %v641_v11, 0.0  ;;  %v1209_v26 = vmax.f32 %v897_v12, 0.0 }
  0xf9   :  { %v636_v23 = vadd.f32 %v3170_v8, %v635_v21  ;;  %v892_v24 = vadd.f32 %v3170_v8, %v891_v22  ;;  %v1143_v29 = vmax.f32 %v633_v15, 0.0  ;;  %v1207_v30 = vmax.f32 %v889_v16, 0.0 }
  0xfa   :  { %v1146_v27 = vmax.f32 %v644_v19, 0.0  ;;  %v1210_v28 = vmax.f32 %v900_v20, 0.0 }
  0xfb   :  { %v1144_v31 = vmax.f32 %v636_v23, 0.0  ;;  %v1208_v32 = vmax.f32 %v892_v24, 0.0 }
  0xfc   :  { %v2252_v33 = vpack.c.bf16 %v1146_v27, %v1145_v25  ;;  %v2412_v34 = vpack.c.bf16 %v1210_v28, %v1209_v26 }
  0xfd   :  { %v2247_v35 = vpack.c.bf16 %v1144_v31, %v1143_v29  ;;  %v2407_v36 = vpack.c.bf16 %v1208_v32, %v1207_v30  ;;  %v2721_v37 = vpop.f32.mrb[4].mxu0  ;;  %v2785_v38 = vpop.f32.mrb[4].mxu1 }
  0xfe   :  { %2564 = vst [vmem:[%s3495_s3 + $0x8] sm:$0xff] %v2252_v33   ;;  %2596 = vst [vmem:[%s3495_s3 + $0x108] sm:$0xff] %v2412_v34   ;;  %v657_v39 = vadd.f32 %v2721_v37, %v3170_v8  ;;  %v913_v40 = vadd.f32 %v2785_v38, %v3170_v8  ;;  %v648_v41 = vpop.f32.mrb[5].mxu0  ;;  %v904_v42 = vpop.f32.mrb[5].mxu1 }
  0xff   :  { %2248 = vst [vmem:[%s3495_s3] sm:$0xff] %v2247_v35   ;;  %2595 = vst [vmem:[%s3495_s3 + $0x100] sm:$0xff] %v2407_v36   ;;  %v649_v43 = vadd.f32 %v3170_v8, %v648_v41  ;;  %v905_v44 = vadd.f32 %v3170_v8, %v904_v42  ;;  %v2722_v45 = vpop.f32.mrb[6].mxu0  ;;  %v2786_v46 = vpop.f32.mrb[6].mxu1 }
 0x100   :  { %v660_v47 = vadd.f32 %v2722_v45, %v3170_v8  ;;  %v916_v48 = vadd.f32 %v2786_v46, %v3170_v8  ;;  %v651_v49 = vpop.f32.mrb[7].mxu0  ;;  %v907_v50 = vpop.f32.mrb[7].mxu1  ;;  %v1149_v53 = vmax.f32 %v657_v39, 0.0  ;;  %v1213_v54 = vmax.f32 %v913_v40, 0.0 }
 0x101   :  { %v652_v51 = vadd.f32 %v3170_v8, %v651_v49  ;;  %v908_v52 = vadd.f32 %v3170_v8, %v907_v50  ;;  %v1147_v57 = vmax.f32 %v649_v43, 0.0  ;;  %v1211_v58 = vmax.f32 %v905_v44, 0.0 }
 0x102   :  { %v1150_v55 = vmax.f32 %v660_v47, 0.0  ;;  %v1214_v56 = vmax.f32 %v916_v48, 0.0 }
 0x103   :  { %v1148_v59 = vmax.f32 %v652_v51, 0.0  ;;  %v1212_v60 = vmax.f32 %v908_v52, 0.0 }
 0x104   :  { %v2262_v61 = vpack.c.bf16 %v1150_v55, %v1149_v53  ;;  %v2422_v62 = vpack.c.bf16 %v1214_v56, %v1213_v54 }
 0x105   :  { %v2257_v63 = vpack.c.bf16 %v1148_v59, %v1147_v57  ;;  %v2417_v0 = vpack.c.bf16 %v1212_v60, %v1211_v58  ;;  %v2725_v1 = vpop.f32.mrb[8].mxu0  ;;  %v2789_v2 = vpop.f32.mrb[8].mxu1 }
 0x106   :  { %2566 = vst [vmem:[%s3495_s3 + $0x18] sm:$0xff] %v2262_v61   ;;  %2598 = vst [vmem:[%s3495_s3 + $0x118] sm:$0xff] %v2422_v62   ;;  %v673_v3 = vadd.f32 %v2725_v1, %v3170_v8  ;;  %v929_v4 = vadd.f32 %v2789_v2, %v3170_v8  ;;  %v664_v5 = vpop.f32.mrb[9].mxu0  ;;  %v920_v6 = vpop.f32.mrb[9].mxu1 }
 0x107   :  { %2565 = vst [vmem:[%s3495_s3 + $0x10] sm:$0xff] %v2257_v63   ;;  %2597 = vst [vmem:[%s3495_s3 + $0x110] sm:$0xff] %v2417_v0   ;;  %v665_v7 = vadd.f32 %v3170_v8, %v664_v5  ;;  %v921_v9 = vadd.f32 %v3170_v8, %v920_v6  ;;  %v2726_v10 = vpop.f32.mrb[10].mxu0  ;;  %v2790_v11 = vpop.f32.mrb[10].mxu1 }
 0x108   :  { %v676_v12 = vadd.f32 %v2726_v10, %v3170_v8  ;;  %v932_v13 = vadd.f32 %v2790_v11, %v3170_v8  ;;  %v667_v14 = vpop.f32.mrb[11].mxu0  ;;  %v923_v15 = vpop.f32.mrb[11].mxu1  ;;  %v1153_v18 = vmax.f32 %v673_v3, 0.0  ;;  %v1217_v19 = vmax.f32 %v929_v4, 0.0 }
 0x109   :  { %v668_v16 = vadd.f32 %v3170_v8, %v667_v14  ;;  %v924_v17 = vadd.f32 %v3170_v8, %v923_v15  ;;  %v1151_v22 = vmax.f32 %v665_v7, 0.0  ;;  %v1215_v23 = vmax.f32 %v921_v9, 0.0 }
 0x10a   :  { %v1154_v20 = vmax.f32 %v676_v12, 0.0  ;;  %v1218_v21 = vmax.f32 %v932_v13, 0.0 }
 0x10b   :  { %v1152_v24 = vmax.f32 %v668_v16, 0.0  ;;  %v1216_v25 = vmax.f32 %v924_v17, 0.0 }
 0x10c   :  { %v2272_v26 = vpack.c.bf16 %v1154_v20, %v1153_v18  ;;  %v2432_v27 = vpack.c.bf16 %v1218_v21, %v1217_v19 }
 0x10d   :  { %v2267_v28 = vpack.c.bf16 %v1152_v24, %v1151_v22  ;;  %v2427_v29 = vpack.c.bf16 %v1216_v25, %v1215_v23  ;;  %v2729_v30 = vpop.f32.mrb[12].mxu0  ;;  %v2793_v31 = vpop.f32.mrb[12].mxu1 }
 0x10e   :  { %2568 = vst [vmem:[%s3495_s3 + $0x28] sm:$0xff] %v2272_v26   ;;  %2600 = vst [vmem:[%s3495_s3 + $0x128] sm:$0xff] %v2432_v27   ;;  %v689_v32 = vadd.f32 %v2729_v30, %v3170_v8  ;;  %v945_v33 = vadd.f32 %v2793_v31, %v3170_v8  ;;  %v680_v34 = vpop.f32.mrb[13].mxu0  ;;  %v936_v35 = vpop.f32.mrb[13].mxu1 }
 0x10f   :  { %2567 = vst [vmem:[%s3495_s3 + $0x20] sm:$0xff] %v2267_v28   ;;  %2599 = vst [vmem:[%s3495_s3 + $0x120] sm:$0xff] %v2427_v29   ;;  %v681_v36 = vadd.f32 %v3170_v8, %v680_v34  ;;  %v937_v37 = vadd.f32 %v3170_v8, %v936_v35  ;;  %v2730_v38 = vpop.f32.mrb[14].mxu0  ;;  %v2794_v39 = vpop.f32.mrb[14].mxu1 }
 0x110   :  { %v692_v40 = vadd.f32 %v2730_v38, %v3170_v8  ;;  %v948_v41 = vadd.f32 %v2794_v39, %v3170_v8  ;;  %v683_v42 = vpop.f32.mrb[15].mxu0  ;;  %v939_v43 = vpop.f32.mrb[15].mxu1  ;;  %v1157_v46 = vmax.f32 %v689_v32, 0.0  ;;  %v1221_v47 = vmax.f32 %v945_v33, 0.0 }
 0x111   :  { %v684_v44 = vadd.f32 %v3170_v8, %v683_v42  ;;  %v940_v45 = vadd.f32 %v3170_v8, %v939_v43  ;;  %v1155_v50 = vmax.f32 %v681_v36, 0.0  ;;  %v1219_v51 = vmax.f32 %v937_v37, 0.0 }
 0x112   :  { %v1158_v48 = vmax.f32 %v692_v40, 0.0  ;;  %v1222_v49 = vmax.f32 %v948_v41, 0.0 }
 0x113   :  { %v1156_v52 = vmax.f32 %v684_v44, 0.0  ;;  %v1220_v53 = vmax.f32 %v940_v45, 0.0 }
 0x114   :  { %v2282_v54 = vpack.c.bf16 %v1158_v48, %v1157_v46  ;;  %v2442_v55 = vpack.c.bf16 %v1222_v49, %v1221_v47 }
 0x115   :  { %v2277_v56 = vpack.c.bf16 %v1156_v52, %v1155_v50  ;;  %v2437_v57 = vpack.c.bf16 %v1220_v53, %v1219_v51  ;;  %v2733_v58 = vpop.f32.mrb[16].mxu0  ;;  %v2797_v59 = vpop.f32.mrb[16].mxu1 }
 0x116   :  { %2570 = vst [vmem:[%s3495_s3 + $0x38] sm:$0xff] %v2282_v54   ;;  %2602 = vst [vmem:[%s3495_s3 + $0x138] sm:$0xff] %v2442_v55   ;;  %v705_v60 = vadd.f32 %v2733_v58, %v3170_v8  ;;  %v961_v61 = vadd.f32 %v2797_v59, %v3170_v8  ;;  %v696_v62 = vpop.f32.mrb[17].mxu0  ;;  %v952_v63 = vpop.f32.mrb[17].mxu1 }
 0x117   :  { %2569 = vst [vmem:[%s3495_s3 + $0x30] sm:$0xff] %v2277_v56   ;;  %2601 = vst [vmem:[%s3495_s3 + $0x130] sm:$0xff] %v2437_v57   ;;  %v697_v0 = vadd.f32 %v3170_v8, %v696_v62  ;;  %v953_v1 = vadd.f32 %v3170_v8, %v952_v63  ;;  %v2734_v2 = vpop.f32.mrb[18].mxu0  ;;  %v2798_v3 = vpop.f32.mrb[18].mxu1 }
 0x118   :  { %v708_v4 = vadd.f32 %v2734_v2, %v3170_v8  ;;  %v964_v5 = vadd.f32 %v2798_v3, %v3170_v8  ;;  %v699_v6 = vpop.f32.mrb[19].mxu0  ;;  %v955_v7 = vpop.f32.mrb[19].mxu1  ;;  %v1161_v11 = vmax.f32 %v705_v60, 0.0  ;;  %v1225_v12 = vmax.f32 %v961_v61, 0.0 }
 0x119   :  { %v700_v9 = vadd.f32 %v3170_v8, %v699_v6  ;;  %v956_v10 = vadd.f32 %v3170_v8, %v955_v7  ;;  %v1159_v15 = vmax.f32 %v697_v0, 0.0  ;;  %v1223_v16 = vmax.f32 %v953_v1, 0.0 }
 0x11a   :  { %v1162_v13 = vmax.f32 %v708_v4, 0.0  ;;  %v1226_v14 = vmax.f32 %v964_v5, 0.0 }
 0x11b   :  { %v1160_v17 = vmax.f32 %v700_v9, 0.0  ;;  %v1224_v18 = vmax.f32 %v956_v10, 0.0 }
 0x11c   :  { %v2292_v19 = vpack.c.bf16 %v1162_v13, %v1161_v11  ;;  %v2452_v20 = vpack.c.bf16 %v1226_v14, %v1225_v12 }
 0x11d   :  { %v2287_v21 = vpack.c.bf16 %v1160_v17, %v1159_v15  ;;  %v2447_v22 = vpack.c.bf16 %v1224_v18, %v1223_v16  ;;  %v2737_v23 = vpop.f32.mrb[20].mxu0  ;;  %v2801_v24 = vpop.f32.mrb[20].mxu1 }
 0x11e   :  { %2572 = vst [vmem:[%s3495_s3 + $0x48] sm:$0xff] %v2292_v19   ;;  %2604 = vst [vmem:[%s3495_s3 + $0x148] sm:$0xff] %v2452_v20   ;;  %v721_v25 = vadd.f32 %v2737_v23, %v3170_v8  ;;  %v977_v26 = vadd.f32 %v2801_v24, %v3170_v8  ;;  %v712_v27 = vpop.f32.mrb[21].mxu0  ;;  %v968_v28 = vpop.f32.mrb[21].mxu1 }
 0x11f   :  { %2571 = vst [vmem:[%s3495_s3 + $0x40] sm:$0xff] %v2287_v21   ;;  %2603 = vst [vmem:[%s3495_s3 + $0x140] sm:$0xff] %v2447_v22   ;;  %v713_v29 = vadd.f32 %v3170_v8, %v712_v27  ;;  %v969_v30 = vadd.f32 %v3170_v8, %v968_v28  ;;  %v2738_v31 = vpop.f32.mrb[22].mxu0  ;;  %v2802_v32 = vpop.f32.mrb[22].mxu1 }
 0x120   :  { %v724_v33 = vadd.f32 %v2738_v31, %v3170_v8  ;;  %v980_v34 = vadd.f32 %v2802_v32, %v3170_v8  ;;  %v715_v35 = vpop.f32.mrb[23].mxu0  ;;  %v971_v36 = vpop.f32.mrb[23].mxu1  ;;  %v1165_v39 = vmax.f32 %v721_v25, 0.0  ;;  %v1229_v40 = vmax.f32 %v977_v26, 0.0 }
 0x121   :  { %v716_v37 = vadd.f32 %v3170_v8, %v715_v35  ;;  %v972_v38 = vadd.f32 %v3170_v8, %v971_v36  ;;  %v1163_v43 = vmax.f32 %v713_v29, 0.0  ;;  %v1227_v44 = vmax.f32 %v969_v30, 0.0 }
 0x122   :  { %v1166_v41 = vmax.f32 %v724_v33, 0.0  ;;  %v1230_v42 = vmax.f32 %v980_v34, 0.0 }
 0x123   :  { %v1164_v45 = vmax.f32 %v716_v37, 0.0  ;;  %v1228_v46 = vmax.f32 %v972_v38, 0.0 }
 0x124   :  { %v2302_v47 = vpack.c.bf16 %v1166_v41, %v1165_v39  ;;  %v2462_v48 = vpack.c.bf16 %v1230_v42, %v1229_v40 }
 0x125   :  { %v2297_v49 = vpack.c.bf16 %v1164_v45, %v1163_v43  ;;  %v2457_v50 = vpack.c.bf16 %v1228_v46, %v1227_v44  ;;  %v2741_v51 = vpop.f32.mrb[24].mxu0  ;;  %v2805_v52 = vpop.f32.mrb[24].mxu1 }
 0x126   :  { %2574 = vst [vmem:[%s3495_s3 + $0x58] sm:$0xff] %v2302_v47   ;;  %2606 = vst [vmem:[%s3495_s3 + $0x158] sm:$0xff] %v2462_v48   ;;  %v737_v53 = vadd.f32 %v2741_v51, %v3170_v8  ;;  %v993_v54 = vadd.f32 %v2805_v52, %v3170_v8  ;;  %v728_v55 = vpop.f32.mrb[25].mxu0  ;;  %v984_v56 = vpop.f32.mrb[25].mxu1 }
 0x127   :  { %2573 = vst [vmem:[%s3495_s3 + $0x50] sm:$0xff] %v2297_v49   ;;  %2605 = vst [vmem:[%s3495_s3 + $0x150] sm:$0xff] %v2457_v50   ;;  %v729_v57 = vadd.f32 %v3170_v8, %v728_v55  ;;  %v985_v58 = vadd.f32 %v3170_v8, %v984_v56  ;;  %v2742_v59 = vpop.f32.mrb[26].mxu0  ;;  %v2806_v60 = vpop.f32.mrb[26].mxu1 }
 0x128   :  { %v740_v61 = vadd.f32 %v2742_v59, %v3170_v8  ;;  %v996_v62 = vadd.f32 %v2806_v60, %v3170_v8  ;;  %v731_v63 = vpop.f32.mrb[27].mxu0  ;;  %v987_v0 = vpop.f32.mrb[27].mxu1  ;;  %v1169_v3 = vmax.f32 %v737_v53, 0.0  ;;  %v1233_v4 = vmax.f32 %v993_v54, 0.0 }
 0x129   :  { %v732_v1 = vadd.f32 %v3170_v8, %v731_v63  ;;  %v988_v2 = vadd.f32 %v3170_v8, %v987_v0  ;;  %v1167_v7 = vmax.f32 %v729_v57, 0.0  ;;  %v1231_v9 = vmax.f32 %v985_v58, 0.0 }
 0x12a   :  { %v1170_v5 = vmax.f32 %v740_v61, 0.0  ;;  %v1234_v6 = vmax.f32 %v996_v62, 0.0 }
 0x12b   :  { %v1168_v10 = vmax.f32 %v732_v1, 0.0  ;;  %v1232_v11 = vmax.f32 %v988_v2, 0.0 }
 0x12c   :  { %v2312_v12 = vpack.c.bf16 %v1170_v5, %v1169_v3  ;;  %v2472_v13 = vpack.c.bf16 %v1234_v6, %v1233_v4 }
 0x12d   :  { %v2307_v14 = vpack.c.bf16 %v1168_v10, %v1167_v7  ;;  %v2467_v15 = vpack.c.bf16 %v1232_v11, %v1231_v9  ;;  %v2745_v16 = vpop.f32.mrb[28].mxu0  ;;  %v2809_v17 = vpop.f32.mrb[28].mxu1 }
 0x12e   :  { %2576 = vst [vmem:[%s3495_s3 + $0x68] sm:$0xff] %v2312_v12   ;;  %2608 = vst [vmem:[%s3495_s3 + $0x168] sm:$0xff] %v2472_v13   ;;  %v753_v18 = vadd.f32 %v2745_v16, %v3170_v8  ;;  %v1009_v19 = vadd.f32 %v2809_v17, %v3170_v8  ;;  %v744_v20 = vpop.f32.mrb[29].mxu0  ;;  %v1000_v21 = vpop.f32.mrb[29].mxu1 }
 0x12f   :  { %2575 = vst [vmem:[%s3495_s3 + $0x60] sm:$0xff] %v2307_v14   ;;  %2607 = vst [vmem:[%s3495_s3 + $0x160] sm:$0xff] %v2467_v15   ;;  %v745_v22 = vadd.f32 %v3170_v8, %v744_v20  ;;  %v1001_v23 = vadd.f32 %v3170_v8, %v1000_v21  ;;  %v2746_v24 = vpop.f32.mrb[30].mxu0  ;;  %v2810_v25 = vpop.f32.mrb[30].mxu1 }
 0x130   :  { %v756_v26 = vadd.f32 %v2746_v24, %v3170_v8  ;;  %v1012_v27 = vadd.f32 %v2810_v25, %v3170_v8  ;;  %v747_v28 = vpop.f32.mrb[31].mxu0  ;;  %v1003_v29 = vpop.f32.mrb[31].mxu1  ;;  %v1173_v32 = vmax.f32 %v753_v18, 0.0  ;;  %v1237_v33 = vmax.f32 %v1009_v19, 0.0 }
 0x131   :  { %v748_v30 = vadd.f32 %v3170_v8, %v747_v28  ;;  %v1004_v31 = vadd.f32 %v3170_v8, %v1003_v29  ;;  %v1171_v36 = vmax.f32 %v745_v22, 0.0  ;;  %v1235_v37 = vmax.f32 %v1001_v23, 0.0 }
 0x132   :  { %v1174_v34 = vmax.f32 %v756_v26, 0.0  ;;  %v1238_v35 = vmax.f32 %v1012_v27, 0.0 }
 0x133   :  { %v1172_v38 = vmax.f32 %v748_v30, 0.0  ;;  %v1236_v39 = vmax.f32 %v1004_v31, 0.0 }
 0x134   :  { %v2322_v40 = vpack.c.bf16 %v1174_v34, %v1173_v32  ;;  %v2482_v41 = vpack.c.bf16 %v1238_v35, %v1237_v33 }
 0x135   :  { %v2317_v42 = vpack.c.bf16 %v1172_v38, %v1171_v36  ;;  %v2477_v43 = vpack.c.bf16 %v1236_v39, %v1235_v37  ;;  %v2749_v44 = vpop.f32.mrb[32].mxu0  ;;  %v2813_v45 = vpop.f32.mrb[32].mxu1 }
 0x136   :  { %2578 = vst [vmem:[%s3495_s3 + $0x78] sm:$0xff] %v2322_v40   ;;  %2610 = vst [vmem:[%s3495_s3 + $0x178] sm:$0xff] %v2482_v41   ;;  %v769_v46 = vadd.f32 %v2749_v44, %v3170_v8  ;;  %v1025_v47 = vadd.f32 %v2813_v45, %v3170_v8  ;;  %v760_v48 = vpop.f32.mrb[33].mxu0  ;;  %v1016_v49 = vpop.f32.mrb[33].mxu1 }
 0x137   :  { %2577 = vst [vmem:[%s3495_s3 + $0x70] sm:$0xff] %v2317_v42   ;;  %2609 = vst [vmem:[%s3495_s3 + $0x170] sm:$0xff] %v2477_v43   ;;  %v761_v50 = vadd.f32 %v3170_v8, %v760_v48  ;;  %v1017_v51 = vadd.f32 %v3170_v8, %v1016_v49  ;;  %v2750_v52 = vpop.f32.mrb[34].mxu0  ;;  %v2814_v53 = vpop.f32.mrb[34].mxu1 }
 0x138   :  { %v772_v54 = vadd.f32 %v2750_v52, %v3170_v8  ;;  %v1028_v55 = vadd.f32 %v2814_v53, %v3170_v8  ;;  %v763_v56 = vpop.f32.mrb[35].mxu0  ;;  %v1019_v57 = vpop.f32.mrb[35].mxu1  ;;  %v1177_v60 = vmax.f32 %v769_v46, 0.0  ;;  %v1241_v61 = vmax.f32 %v1025_v47, 0.0 }
 0x139   :  { %v764_v58 = vadd.f32 %v3170_v8, %v763_v56  ;;  %v1020_v59 = vadd.f32 %v3170_v8, %v1019_v57  ;;  %v1175_v0 = vmax.f32 %v761_v50, 0.0  ;;  %v1239_v1 = vmax.f32 %v1017_v51, 0.0 }
 0x13a   :  { %v1178_v62 = vmax.f32 %v772_v54, 0.0  ;;  %v1242_v63 = vmax.f32 %v1028_v55, 0.0 }
 0x13b   :  { %v1176_v2 = vmax.f32 %v764_v58, 0.0  ;;  %v1240_v3 = vmax.f32 %v1020_v59, 0.0 }
 0x13c   :  { %v2332_v4 = vpack.c.bf16 %v1178_v62, %v1177_v60  ;;  %v2492_v5 = vpack.c.bf16 %v1242_v63, %v1241_v61 }
 0x13d   :  { %v2327_v6 = vpack.c.bf16 %v1176_v2, %v1175_v0  ;;  %v2487_v7 = vpack.c.bf16 %v1240_v3, %v1239_v1  ;;  %v2753_v9 = vpop.f32.mrb[36].mxu0  ;;  %v2817_v10 = vpop.f32.mrb[36].mxu1 }
 0x13e   :  { %2580 = vst [vmem:[%s3495_s3 + $0x88] sm:$0xff] %v2332_v4   ;;  %2612 = vst [vmem:[%s3495_s3 + $0x188] sm:$0xff] %v2492_v5   ;;  %v785_v11 = vadd.f32 %v2753_v9, %v3170_v8  ;;  %v1041_v12 = vadd.f32 %v2817_v10, %v3170_v8  ;;  %v776_v13 = vpop.f32.mrb[37].mxu0  ;;  %v1032_v14 = vpop.f32.mrb[37].mxu1 }
 0x13f   :  { %2579 = vst [vmem:[%s3495_s3 + $0x80] sm:$0xff] %v2327_v6   ;;  %2611 = vst [vmem:[%s3495_s3 + $0x180] sm:$0xff] %v2487_v7   ;;  %v777_v15 = vadd.f32 %v3170_v8, %v776_v13  ;;  %v1033_v16 = vadd.f32 %v3170_v8, %v1032_v14  ;;  %v2754_v17 = vpop.f32.mrb[38].mxu0  ;;  %v2818_v18 = vpop.f32.mrb[38].mxu1 }
 0x140   :  { %v788_v19 = vadd.f32 %v2754_v17, %v3170_v8  ;;  %v1044_v20 = vadd.f32 %v2818_v18, %v3170_v8  ;;  %v779_v21 = vpop.f32.mrb[39].mxu0  ;;  %v1035_v22 = vpop.f32.mrb[39].mxu1  ;;  %v1181_v25 = vmax.f32 %v785_v11, 0.0  ;;  %v1245_v26 = vmax.f32 %v1041_v12, 0.0 }
 0x141   :  { %v780_v23 = vadd.f32 %v3170_v8, %v779_v21  ;;  %v1036_v24 = vadd.f32 %v3170_v8, %v1035_v22  ;;  %v1179_v29 = vmax.f32 %v777_v15, 0.0  ;;  %v1243_v30 = vmax.f32 %v1033_v16, 0.0 }
 0x142   :  { %v1182_v27 = vmax.f32 %v788_v19, 0.0  ;;  %v1246_v28 = vmax.f32 %v1044_v20, 0.0 }
 0x143   :  { %v1180_v31 = vmax.f32 %v780_v23, 0.0  ;;  %v1244_v32 = vmax.f32 %v1036_v24, 0.0 }
 0x144   :  { %v2342_v33 = vpack.c.bf16 %v1182_v27, %v1181_v25  ;;  %v2502_v34 = vpack.c.bf16 %v1246_v28, %v1245_v26 }
 0x145   :  { %v2337_v35 = vpack.c.bf16 %v1180_v31, %v1179_v29  ;;  %v2497_v36 = vpack.c.bf16 %v1244_v32, %v1243_v30  ;;  %v2757_v37 = vpop.f32.mrb[40].mxu0  ;;  %v2821_v38 = vpop.f32.mrb[40].mxu1 }
 0x146   :  { %2582 = vst [vmem:[%s3495_s3 + $0x98] sm:$0xff] %v2342_v33   ;;  %2614 = vst [vmem:[%s3495_s3 + $0x198] sm:$0xff] %v2502_v34   ;;  %v801_v39 = vadd.f32 %v2757_v37, %v3170_v8  ;;  %v1057_v40 = vadd.f32 %v2821_v38, %v3170_v8  ;;  %v792_v41 = vpop.f32.mrb[41].mxu0  ;;  %v1048_v42 = vpop.f32.mrb[41].mxu1 }
 0x147   :  { %2581 = vst [vmem:[%s3495_s3 + $0x90] sm:$0xff] %v2337_v35   ;;  %2613 = vst [vmem:[%s3495_s3 + $0x190] sm:$0xff] %v2497_v36   ;;  %v793_v43 = vadd.f32 %v3170_v8, %v792_v41  ;;  %v1049_v44 = vadd.f32 %v3170_v8, %v1048_v42  ;;  %v2758_v45 = vpop.f32.mrb[42].mxu0  ;;  %v2822_v46 = vpop.f32.mrb[42].mxu1 }
 0x148   :  { %v804_v47 = vadd.f32 %v2758_v45, %v3170_v8  ;;  %v1060_v48 = vadd.f32 %v2822_v46, %v3170_v8  ;;  %v795_v49 = vpop.f32.mrb[43].mxu0  ;;  %v1051_v50 = vpop.f32.mrb[43].mxu1  ;;  %v1185_v53 = vmax.f32 %v801_v39, 0.0  ;;  %v1249_v54 = vmax.f32 %v1057_v40, 0.0 }
 0x149   :  { %v796_v51 = vadd.f32 %v3170_v8, %v795_v49  ;;  %v1052_v52 = vadd.f32 %v3170_v8, %v1051_v50  ;;  %v1183_v57 = vmax.f32 %v793_v43, 0.0  ;;  %v1247_v58 = vmax.f32 %v1049_v44, 0.0 }
 0x14a   :  { %v1186_v55 = vmax.f32 %v804_v47, 0.0  ;;  %v1250_v56 = vmax.f32 %v1060_v48, 0.0 }
 0x14b   :  { %v1184_v59 = vmax.f32 %v796_v51, 0.0  ;;  %v1248_v60 = vmax.f32 %v1052_v52, 0.0 }
 0x14c   :  { %v2352_v61 = vpack.c.bf16 %v1186_v55, %v1185_v53  ;;  %v2512_v62 = vpack.c.bf16 %v1250_v56, %v1249_v54 }
 0x14d   :  { %v2347_v63 = vpack.c.bf16 %v1184_v59, %v1183_v57  ;;  %v2507_v0 = vpack.c.bf16 %v1248_v60, %v1247_v58  ;;  %v2761_v1 = vpop.f32.mrb[44].mxu0  ;;  %v2825_v2 = vpop.f32.mrb[44].mxu1 }
 0x14e   :  { %2584 = vst [vmem:[%s3495_s3 + $0xa8] sm:$0xff] %v2352_v61   ;;  %2616 = vst [vmem:[%s3495_s3 + $0x1a8] sm:$0xff] %v2512_v62   ;;  %v817_v3 = vadd.f32 %v2761_v1, %v3170_v8  ;;  %v1073_v4 = vadd.f32 %v2825_v2, %v3170_v8  ;;  %v808_v5 = vpop.f32.mrb[45].mxu0  ;;  %v1064_v6 = vpop.f32.mrb[45].mxu1 }
 0x14f   :  { %2583 = vst [vmem:[%s3495_s3 + $0xa0] sm:$0xff] %v2347_v63   ;;  %2615 = vst [vmem:[%s3495_s3 + $0x1a0] sm:$0xff] %v2507_v0   ;;  %v809_v7 = vadd.f32 %v3170_v8, %v808_v5  ;;  %v1065_v9 = vadd.f32 %v3170_v8, %v1064_v6  ;;  %v2762_v10 = vpop.f32.mrb[46].mxu0  ;;  %v2826_v11 = vpop.f32.mrb[46].mxu1 }
 0x150   :  { %v820_v12 = vadd.f32 %v2762_v10, %v3170_v8  ;;  %v1076_v13 = vadd.f32 %v2826_v11, %v3170_v8  ;;  %v811_v14 = vpop.f32.mrb[47].mxu0  ;;  %v1067_v15 = vpop.f32.mrb[47].mxu1  ;;  %v1189_v18 = vmax.f32 %v817_v3, 0.0  ;;  %v1253_v19 = vmax.f32 %v1073_v4, 0.0 }
 0x151   :  { %v812_v16 = vadd.f32 %v3170_v8, %v811_v14  ;;  %v1068_v17 = vadd.f32 %v3170_v8, %v1067_v15  ;;  %v1187_v22 = vmax.f32 %v809_v7, 0.0  ;;  %v1251_v23 = vmax.f32 %v1065_v9, 0.0 }
 0x152   :  { %v1190_v20 = vmax.f32 %v820_v12, 0.0  ;;  %v1254_v21 = vmax.f32 %v1076_v13, 0.0 }
 0x153   :  { %v1188_v24 = vmax.f32 %v812_v16, 0.0  ;;  %v1252_v25 = vmax.f32 %v1068_v17, 0.0 }
 0x154   :  { %v2362_v26 = vpack.c.bf16 %v1190_v20, %v1189_v18  ;;  %v2522_v27 = vpack.c.bf16 %v1254_v21, %v1253_v19 }
 0x155   :  { %v2357_v28 = vpack.c.bf16 %v1188_v24, %v1187_v22  ;;  %v2517_v29 = vpack.c.bf16 %v1252_v25, %v1251_v23  ;;  %v2765_v30 = vpop.f32.mrb[48].mxu0  ;;  %v2829_v31 = vpop.f32.mrb[48].mxu1 }
 0x156   :  { %2586 = vst [vmem:[%s3495_s3 + $0xb8] sm:$0xff] %v2362_v26   ;;  %2618 = vst [vmem:[%s3495_s3 + $0x1b8] sm:$0xff] %v2522_v27   ;;  %v833_v32 = vadd.f32 %v2765_v30, %v3170_v8  ;;  %v1089_v33 = vadd.f32 %v2829_v31, %v3170_v8  ;;  %v824_v34 = vpop.f32.mrb[49].mxu0  ;;  %v1080_v35 = vpop.f32.mrb[49].mxu1 }
 0x157   :  { %2585 = vst [vmem:[%s3495_s3 + $0xb0] sm:$0xff] %v2357_v28   ;;  %2617 = vst [vmem:[%s3495_s3 + $0x1b0] sm:$0xff] %v2517_v29   ;;  %v825_v36 = vadd.f32 %v3170_v8, %v824_v34  ;;  %v1081_v37 = vadd.f32 %v3170_v8, %v1080_v35  ;;  %v2766_v38 = vpop.f32.mrb[50].mxu0  ;;  %v2830_v39 = vpop.f32.mrb[50].mxu1 }
 0x158   :  { %v836_v40 = vadd.f32 %v2766_v38, %v3170_v8  ;;  %v1092_v41 = vadd.f32 %v2830_v39, %v3170_v8  ;;  %v827_v42 = vpop.f32.mrb[51].mxu0  ;;  %v1083_v43 = vpop.f32.mrb[51].mxu1  ;;  %v1193_v46 = vmax.f32 %v833_v32, 0.0  ;;  %v1257_v47 = vmax.f32 %v1089_v33, 0.0 }
 0x159   :  { %v828_v44 = vadd.f32 %v3170_v8, %v827_v42  ;;  %v1084_v45 = vadd.f32 %v3170_v8, %v1083_v43  ;;  %v1191_v50 = vmax.f32 %v825_v36, 0.0  ;;  %v1255_v51 = vmax.f32 %v1081_v37, 0.0 }
 0x15a   :  { %v1194_v48 = vmax.f32 %v836_v40, 0.0  ;;  %v1258_v49 = vmax.f32 %v1092_v41, 0.0 }
 0x15b   :  { %v1192_v52 = vmax.f32 %v828_v44, 0.0  ;;  %v1256_v53 = vmax.f32 %v1084_v45, 0.0 }
 0x15c   :  { %v2372_v54 = vpack.c.bf16 %v1194_v48, %v1193_v46  ;;  %v2532_v55 = vpack.c.bf16 %v1258_v49, %v1257_v47 }
 0x15d   :  { %v2367_v56 = vpack.c.bf16 %v1192_v52, %v1191_v50  ;;  %v2527_v57 = vpack.c.bf16 %v1256_v53, %v1255_v51  ;;  %v2769_v58 = vpop.f32.mrb[52].mxu0  ;;  %v2833_v59 = vpop.f32.mrb[52].mxu1 }
 0x15e   :  { %2588 = vst [vmem:[%s3495_s3 + $0xc8] sm:$0xff] %v2372_v54   ;;  %2620 = vst [vmem:[%s3495_s3 + $0x1c8] sm:$0xff] %v2532_v55   ;;  %v849_v60 = vadd.f32 %v2769_v58, %v3170_v8  ;;  %v1105_v61 = vadd.f32 %v2833_v59, %v3170_v8  ;;  %v840_v62 = vpop.f32.mrb[53].mxu0  ;;  %v1096_v63 = vpop.f32.mrb[53].mxu1 }
 0x15f   :  { %2587 = vst [vmem:[%s3495_s3 + $0xc0] sm:$0xff] %v2367_v56   ;;  %2619 = vst [vmem:[%s3495_s3 + $0x1c0] sm:$0xff] %v2527_v57   ;;  %v841_v0 = vadd.f32 %v3170_v8, %v840_v62  ;;  %v1097_v1 = vadd.f32 %v3170_v8, %v1096_v63  ;;  %v2770_v2 = vpop.f32.mrb[54].mxu0  ;;  %v2834_v3 = vpop.f32.mrb[54].mxu1 }
 0x160   :  { %v852_v4 = vadd.f32 %v2770_v2, %v3170_v8  ;;  %v1108_v5 = vadd.f32 %v2834_v3, %v3170_v8  ;;  %v843_v6 = vpop.f32.mrb[55].mxu0  ;;  %v1099_v7 = vpop.f32.mrb[55].mxu1  ;;  %v1197_v11 = vmax.f32 %v849_v60, 0.0  ;;  %v1261_v12 = vmax.f32 %v1105_v61, 0.0 }
 0x161   :  { %v844_v9 = vadd.f32 %v3170_v8, %v843_v6  ;;  %v1100_v10 = vadd.f32 %v3170_v8, %v1099_v7  ;;  %v1195_v15 = vmax.f32 %v841_v0, 0.0  ;;  %v1259_v16 = vmax.f32 %v1097_v1, 0.0 }
 0x162   :  { %v1198_v13 = vmax.f32 %v852_v4, 0.0  ;;  %v1262_v14 = vmax.f32 %v1108_v5, 0.0 }
 0x163   :  { %v1196_v17 = vmax.f32 %v844_v9, 0.0  ;;  %v1260_v18 = vmax.f32 %v1100_v10, 0.0 }
 0x164   :  { %v2382_v19 = vpack.c.bf16 %v1198_v13, %v1197_v11  ;;  %v2542_v20 = vpack.c.bf16 %v1262_v14, %v1261_v12 }
 0x165   :  { %v2377_v21 = vpack.c.bf16 %v1196_v17, %v1195_v15  ;;  %v2537_v22 = vpack.c.bf16 %v1260_v18, %v1259_v16  ;;  %v2773_v23 = vpop.f32.mrb[56].mxu0  ;;  %v2837_v24 = vpop.f32.mrb[56].mxu1 }
 0x166   :  { %2590 = vst [vmem:[%s3495_s3 + $0xd8] sm:$0xff] %v2382_v19   ;;  %2622 = vst [vmem:[%s3495_s3 + $0x1d8] sm:$0xff] %v2542_v20   ;;  %v865_v25 = vadd.f32 %v2773_v23, %v3170_v8  ;;  %v1121_v26 = vadd.f32 %v2837_v24, %v3170_v8  ;;  %v856_v27 = vpop.f32.mrb[57].mxu0  ;;  %v1112_v28 = vpop.f32.mrb[57].mxu1 }
 0x167   :  { %2589 = vst [vmem:[%s3495_s3 + $0xd0] sm:$0xff] %v2377_v21   ;;  %2621 = vst [vmem:[%s3495_s3 + $0x1d0] sm:$0xff] %v2537_v22   ;;  %v857_v29 = vadd.f32 %v3170_v8, %v856_v27  ;;  %v1113_v30 = vadd.f32 %v3170_v8, %v1112_v28  ;;  %v2774_v31 = vpop.f32.mrb[58].mxu0  ;;  %v2838_v32 = vpop.f32.mrb[58].mxu1 }
 0x168   :  { %v868_v33 = vadd.f32 %v2774_v31, %v3170_v8  ;;  %v1124_v34 = vadd.f32 %v2838_v32, %v3170_v8  ;;  %v859_v35 = vpop.f32.mrb[59].mxu0  ;;  %v1115_v36 = vpop.f32.mrb[59].mxu1  ;;  %v1201_v39 = vmax.f32 %v865_v25, 0.0  ;;  %v1265_v40 = vmax.f32 %v1121_v26, 0.0 }
 0x169   :  { %v860_v37 = vadd.f32 %v3170_v8, %v859_v35  ;;  %v1116_v38 = vadd.f32 %v3170_v8, %v1115_v36  ;;  %v1199_v43 = vmax.f32 %v857_v29, 0.0  ;;  %v1263_v44 = vmax.f32 %v1113_v30, 0.0 }
 0x16a   :  { %v1202_v41 = vmax.f32 %v868_v33, 0.0  ;;  %v1266_v42 = vmax.f32 %v1124_v34, 0.0 }
 0x16b   :  { %v1200_v45 = vmax.f32 %v860_v37, 0.0  ;;  %v1264_v46 = vmax.f32 %v1116_v38, 0.0 }
 0x16c   :  { %v2392_v47 = vpack.c.bf16 %v1202_v41, %v1201_v39  ;;  %v2552_v48 = vpack.c.bf16 %v1266_v42, %v1265_v40 }
 0x16d   :  { %v2387_v49 = vpack.c.bf16 %v1200_v45, %v1199_v43  ;;  %v2547_v50 = vpack.c.bf16 %v1264_v46, %v1263_v44  ;;  %v2777_v51 = vpop.f32.mrb[60].mxu0  ;;  %v2841_v52 = vpop.f32.mrb[60].mxu1 }
 0x16e   :  { %2592 = vst [vmem:[%s3495_s3 + $0xe8] sm:$0xff] %v2392_v47   ;;  %2624 = vst [vmem:[%s3495_s3 + $0x1e8] sm:$0xff] %v2552_v48   ;;  %v881_v53 = vadd.f32 %v2777_v51, %v3170_v8  ;;  %v1137_v54 = vadd.f32 %v2841_v52, %v3170_v8  ;;  %v872_v55 = vpop.f32.mrb[61].mxu0  ;;  %v1128_v56 = vpop.f32.mrb[61].mxu1 }
 0x16f   :  { %2591 = vst [vmem:[%s3495_s3 + $0xe0] sm:$0xff] %v2387_v49   ;;  %2623 = vst [vmem:[%s3495_s3 + $0x1e0] sm:$0xff] %v2547_v50   ;;  %v873_v57 = vadd.f32 %v3170_v8, %v872_v55  ;;  %v1129_v58 = vadd.f32 %v3170_v8, %v1128_v56  ;;  %v2778_v59 = vpop.f32.mrb[62].mxu0  ;;  %v2842_v60 = vpop.f32.mrb[62].mxu1 }
 0x170   :  { %v884_v61 = vadd.f32 %v2778_v59, %v3170_v8  ;;  %v1140_v62 = vadd.f32 %v2842_v60, %v3170_v8  ;;  %v875_v63 = vpop.f32.mrb[63].mxu0  ;;  %v1131_v0 = vpop.f32.mrb[63].mxu1  ;;  %v1205_v3 = vmax.f32 %v881_v53, 0.0  ;;  %v1269_v4 = vmax.f32 %v1137_v54, 0.0 }
 0x171   :  { %v876_v1 = vadd.f32 %v3170_v8, %v875_v63  ;;  %v1132_v2 = vadd.f32 %v3170_v8, %v1131_v0  ;;  %v1203_v7 = vmax.f32 %v873_v57, 0.0  ;;  %v1267_v9 = vmax.f32 %v1129_v58, 0.0 }
 0x172   :  { %v1206_v5 = vmax.f32 %v884_v61, 0.0  ;;  %v1270_v6 = vmax.f32 %v1140_v62, 0.0 }
 0x173   :  { %v1204_v10 = vmax.f32 %v876_v1, 0.0  ;;  %v1268_v11 = vmax.f32 %v1132_v2, 0.0 }
 0x174   :  { %v2402_v12 = vpack.c.bf16 %v1206_v5, %v1205_v3  ;;  %v2562_v13 = vpack.c.bf16 %v1270_v6, %v1269_v4 }
 0x175   :  { %v2397_v14 = vpack.c.bf16 %v1204_v10, %v1203_v7  ;;  %v2557_v15 = vpack.c.bf16 %v1268_v11, %v1267_v9 }
 0x176   :  { %2594 = vst [vmem:[%s3495_s3 + $0xf8] sm:$0xff] %v2402_v12   ;;  %2626 = vst [vmem:[%s3495_s3 + $0x1f8] sm:$0xff] %v2562_v13  }
 0x177   :  { %2593 = vst [vmem:[%s3495_s3 + $0xf0] sm:$0xff] %v2397_v14   ;;  %2625 = vst [vmem:[%s3495_s3 + $0x1f0] sm:$0xff] %v2557_v15  }

// kernel: _lambda_.9
= control target key start
LH: loop header
LB: loop body
LE: loop exit
PB: predicated region body
PF: predicated region fallthrough
CT: control target
= control target key end

     0   :  { %s1608_s12 = smov 0   ;;  %s1610_s13 = smov 0   ;;  %s1970_s0 = inlined_call_operand.vmem [shape: bf16[4,256,128], index: 0, kind: input, shape index: {}, may-alias: {0,1}]   ;;  %s1971_s1 = inlined_call_operand.vmem [shape: bf16[4,256,128], index: 1, kind: input, shape index: {}, may-alias: {0,1}]   ;;  %s1972_s2 = inlined_call_operand.vmem [shape: f32[2,1,1], index: 2, kind: output, shape index: {0}]   ;;  %s1973_s3 = inlined_call_operand.vmem [shape: f32[2,1,1], index: 3, kind: output, shape index: {1}]  }
   0x1   :  { %s1612_s14 = smov 0  }
   0x2 LB: > { %s26_s15 = sadd.s32 1, %s1581_s13  ;;  %p1397_p0 = scmp.ge.s32.totalorder %s1585_s14, 1  ;;  %s1585_s14 = sphi %s1612_s14, %s14_s14   ;;  %s1581_s13 = sphi %s1610_s13, %s1975_s13   ;;  %s1577_s12 = sphi %s1608_s12, %s1974_s12  }
   0x3   : > { %p28_p1 = scmp.ge.s32.totalorder %s26_s15, 2  ;;  %p180_p2 = scmp.lt.s32.totalorder %s1585_s14, 3 }
   0x5   : > { %s1977_s15 = smov (%p28_p1, %s26_s15), 0  ;;  %p181_p3 = pnand %p1397_p0, %p180_p2 }
   0x6   : > { %s229_s16 = sadd.s32 (!%p181_p3), 2, %s1577_s12  ;;  %p220_p4 = scmp.lt.s32.totalorder (!%p181_p3), %s1577_s12, 3  ;;  %vm251_vm0 = vcmask (!%p181_p3), 0  }
   0x7   : > { %184 = sbr.rel (%p181_p3) target bundleno = 639 (0x27f), region = 28  ;;  %p231_p5 = scmp.lt.s32.totalorder (!%p181_p3), %s229_s16, 3 }
   0x8   : > { %p241_p6 = scmp.lt.s32.totalorder (!%p181_p3), %s1577_s12, 1 }
   0xe   : > { %s221_s17 = scalar_select %p220_p4, %s1577_s12, 3 }
   0xf   : > { %s1979_s16 = smov (!%p231_p5, %s229_s16), 3  ;;  %s1981_s12 = smov (!%p241_p6, %s1577_s12), 1 }
  0x10   : > { %s1436_s18 = sshll.u32 %s221_s17, 7  ;;  %s1437_s19 = sshll.u32 %s1979_s16, 7 }
  0x11   : > { %s1634_s22 = scalar_lea.vmem %s1971_s1, %s1437_s19  ;;  %s1646_s25 = scalar_lea.vmem %s1970_s0, %s1436_s18 }
  0x12   : > { %v1637_v0 = vld [vmem:[%s1634_s22 + $0x40] sm:$0xff]   ;;  %v1641_v2 = vld [vmem:[%s1634_s22 + $0x48] sm:$0xff]   ;;  %v1656_v5 = vld [vmem:[%s1634_s22 + $0x50] sm:$0xff]   ;;  %s243_s28 = scalar_lea.vmem %s1972_s2, %s1981_s12  ;;  %s246_s6 = scalar_lea.vmem %s1973_s3, %s1981_s12 }
  0x13   : > { %v349_v1 = vld [vmem:[%s1634_s22] sm:$0xff]   ;;  %v1649_v3 = vld [vmem:[%s1634_s22 + $0x8] sm:$0xff]   ;;  %858 = vxpose.xlu0.c.b16.start [1/8] %v1637_v0, 128  ;;  %v1659_v6 = vld [vmem:[%s1634_s22 + $0x10] sm:$0xff]   ;;  %v430_v10 = vunpack.c.h.bf16 %v1637_v0  ;;  %v429_v11 = vunpack.c.l.bf16 %v1637_v0  ;;  %v431_v15 = vunpack.c.l.bf16 %v1641_v2  ;;  %v432_v17 = vunpack.c.h.bf16 %v1641_v2 }
  0x14   : > { %v1653_v4 = vld [vmem:[%s1646_s25 + $0x40] sm:$0xff]   ;;  %826 = vxpose.xlu1.c.b16.start [1/8] %v349_v1, 128  ;;  %1438 = vmatprep.subr.bf16.mxu1 %v349_v1  ;;  %v414_v13 = vunpack.c.h.bf16 %v349_v1  ;;  %v413_v14 = vunpack.c.l.bf16 %v349_v1  ;;  %v1673_v16 = vld [vmem:[%s1634_s22 + $0x58] sm:$0xff]   ;;  %v415_v18 = vunpack.c.l.bf16 %v1649_v3  ;;  %v416_v19 = vunpack.c.h.bf16 %v1649_v3  ;;  %v1705_v37 = vld [vmem:[%s1646_s25 + $0x48] sm:$0xff]  }
  0x15   : > { %874 = vmatprep.subr.bf16.mxu0 %v349_v1  ;;  %v398_v7 = vunpack.c.h.bf16 %v1653_v4  ;;  %v397_v8 = vunpack.c.l.bf16 %v1653_v4  ;;  %v1664_v9 = vld [vmem:[%s1646_s25] sm:$0xff]   ;;  %v433_v20 = vunpack.c.l.bf16 %v1656_v5  ;;  %v1680_v21 = vld [vmem:[%s1634_s22 + $0x18] sm:$0xff]   ;;  %v434_v22 = vunpack.c.h.bf16 %v1656_v5  ;;  %v1708_v38 = vld [vmem:[%s1646_s25 + $0x8] sm:$0xff]  }
  0x16   : > { %v382_v12 = vunpack.c.h.bf16 %v1664_v9  ;;  %v417_v23 = vunpack.c.l.bf16 %v1659_v6  ;;  %v418_v24 = vunpack.c.h.bf16 %v1659_v6  ;;  %v435_v25 = vunpack.c.l.bf16 %v1673_v16  ;;  %v1691_v29 = vld [vmem:[%s1634_s22 + $0x60] sm:$0xff]   ;;  %v1715_v42 = vld [vmem:[%s1634_s22 + $0x68] sm:$0xff]   ;;  %1454 = vmatpush1.bf16.msra.mxu1 %v1664_v9  ;;  %v1726_v49 = vld [vmem:[%s1646_s25 + $0x50] sm:$0xff]   ;;  %875 = vmatpush1.bf16.msra.mxu0 %v1664_v9 }
  0x17   : > { %859 = vxpose.xlu0.c.b16.cont [2/8] %v1641_v2, 128  ;;  %v436_v26 = vunpack.c.h.bf16 %v1673_v16  ;;  %v419_v27 = vunpack.c.l.bf16 %v1680_v21  ;;  %v420_v28 = vunpack.c.h.bf16 %v1680_v21  ;;  %v437_v30 = vunpack.c.l.bf16 %v1691_v29  ;;  %v1697_v32 = vld [vmem:[%s1634_s22 + $0x20] sm:$0xff]   ;;  %1439 = vmatprep.subr.bf16.mxu1 %v1649_v3  ;;  %v1730_v50 = vld [vmem:[%s1634_s22 + $0x28] sm:$0xff]   ;;  %v1738_v58 = vld [vmem:[%s1646_s25 + $0x10] sm:$0xff]  }
  0x18   : > { %827 = vxpose.xlu1.c.b16.cont [2/8] %v1649_v3, 128  ;;  %v438_v31 = vunpack.c.h.bf16 %v1691_v29  ;;  %v1699_v33 = vsub.f32 %v398_v7, %v430_v10  ;;  %v1701_v34 = vsub.f32 %v397_v8, %v429_v11  ;;  %v446_v35 = vsub.f32 %v382_v12, %v414_v13  ;;  %876 = vmatprep.subr.bf16.mxu0 %v1649_v3  ;;  %v1743_v59 = vld [vmem:[%s1634_s22 + $0x70] sm:$0xff]   ;;  %v1754_v8 = vld [vmem:[%s1646_s25 + $0x58] sm:$0xff]  }
  0x19   : > { %v381_v36 = vunpack.c.l.bf16 %v1664_v9  ;;  %v421_v39 = vunpack.c.l.bf16 %v1697_v32  ;;  %v399_v40 = vunpack.c.l.bf16 %v1705_v37  ;;  %v400_v41 = vunpack.c.h.bf16 %v1705_v37  ;;  %v1759_v11 = vld [vmem:[%s1634_s22 + $0x30] sm:$0xff]  }
  0x1a   : > { %v479_v43 = vand.u32 2147483647, %v446_v35  ;;  %v383_v45 = vunpack.c.l.bf16 %v1708_v38  ;;  %v384_v48 = vunpack.c.h.bf16 %v1708_v38  ;;  %v401_v53 = vunpack.c.l.bf16 %v1726_v49  ;;  %1455 = vmatpush1.bf16.msra.mxu1 %v1708_v38  ;;  %877 = vmatpush1.bf16.msra.mxu0 %v1708_v38 }
  0x1b   : > { %860 = vxpose.xlu0.c.b16.cont [3/8] %v1656_v5, 128  ;;  %v445_v44 = vsub.f32 %v381_v36, %v413_v14  ;;  %v1720_v46 = vsub.f32 %v399_v40, %v431_v15  ;;  %v1722_v47 = vsub.f32 %v400_v41, %v432_v17  ;;  %v402_v54 = vunpack.c.h.bf16 %v1726_v49  ;;  %1440 = vmatprep.subr.bf16.mxu1 %v1659_v6  ;;  %v1788_v41 = vld [vmem:[%s1646_s25 + $0x60] sm:$0xff]  }
  0x1c   : > { %828 = vxpose.xlu1.c.b16.cont [3/8] %v1659_v6, 128  ;;  %v447_v52 = vsub.f32 %v383_v45, %v415_v18  ;;  %v422_v55 = vunpack.c.h.bf16 %v1697_v32  ;;  %v439_v56 = vunpack.c.l.bf16 %v1715_v42  ;;  %v448_v57 = vsub.f32 %v384_v48, %v416_v19  ;;  %v1765_v18 = vld [vmem:[%s1646_s25 + $0x18] sm:$0xff]   ;;  %878 = vmatprep.subr.bf16.mxu0 %v1659_v6 }
  0x1d   : > { %v478_v51 = vand.u32 2147483647, %v445_v44  ;;  %v1745_v62 = vsub.f32 %v401_v53, %v433_v20  ;;  %v1747_v63 = vsub.f32 %v402_v54, %v434_v22  ;;  %v385_v7 = vunpack.c.l.bf16 %v1738_v58  ;;  %v1770_v19 = vld [vmem:[%s1634_s22 + $0x78] sm:$0xff]  }
  0x1e   : > { %v480_v61 = vand.u32 2147483647, %v447_v52  ;;  %v481_v1 = vand.u32 2147483647, %v448_v57  ;;  %v386_v3 = vunpack.c.h.bf16 %v1738_v58  ;;  %v440_v10 = vunpack.c.h.bf16 %v1715_v42  ;;  %1456 = vmatpush1.bf16.msra.mxu1 %v1738_v58  ;;  %879 = vmatpush1.bf16.msra.mxu0 %v1738_v58 }
  0x1f   : > { %861 = vxpose.xlu0.c.b16.cont [4/8] %v1673_v16, 128  ;;  %v510_v60 = vadd.f32 %v479_v43, %v478_v51  ;;  %v403_v13 = vunpack.c.l.bf16 %v1754_v8  ;;  %v449_v14 = vsub.f32 %v385_v7, %v417_v23  ;;  %v404_v17 = vunpack.c.h.bf16 %v1754_v8  ;;  %1441 = vmatprep.subr.bf16.mxu1 %v1680_v21  ;;  %v1800_v51 = vld [vmem:[%s1646_s25 + $0x20] sm:$0xff]  }
  0x20   : > { %829 = vxpose.xlu1.c.b16.cont [4/8] %v1680_v21, 128  ;;  %v450_v15 = vsub.f32 %v386_v3, %v418_v24  ;;  %v387_v35 = vunpack.c.l.bf16 %v1765_v18  ;;  %v388_v23 = vunpack.c.h.bf16 %v1765_v18  ;;  %v1781_v24 = vld [vmem:[%s1634_s22 + $0x38] sm:$0xff]   ;;  %v405_v44 = vunpack.c.l.bf16 %v1788_v41  ;;  %880 = vmatprep.subr.bf16.mxu0 %v1680_v21 }
  0x21   : > { %v511_v12 = vadd.f32 %v510_v60, %v480_v61  ;;  %v1774_v22 = vsub.f32 %v403_v13, %v435_v25  ;;  %v482_v6 = vand.u32 2147483647, %v449_v14  ;;  %v1785_v40 = vsub.f32 %v404_v17, %v436_v26  ;;  %v1817_v60 = vld [vmem:[%s1646_s25 + $0x68] sm:$0xff]  }
  0x22   : > { %v483_v36 = vand.u32 2147483647, %v450_v15  ;;  %v451_v25 = vsub.f32 %v387_v35, %v419_v27  ;;  %v452_v43 = vsub.f32 %v388_v23, %v420_v28  ;;  %v423_v45 = vunpack.c.l.bf16 %v1730_v50  ;;  %1457 = vmatpush1.bf16.msra.mxu1 %v1765_v18  ;;  %881 = vmatpush1.bf16.msra.mxu0 %v1765_v18  ;;  %v1830_v13 = vld [vmem:[%s1646_s25 + $0x28] sm:$0xff]   ;;  %v1846_v23 = vld [vmem:[%s1646_s25 + $0x70] sm:$0xff]  }
  0x23   : > { %862 = vxpose.xlu0.c.b16.cont [5/8] %v1691_v29, 128  ;;  %v512_v20 = vadd.f32 %v511_v12, %v481_v1  ;;  %v406_v26 = vunpack.c.h.bf16 %v1788_v41  ;;  %v1806_v28 = vsub.f32 %v405_v44, %v437_v30  ;;  %v389_v52 = vunpack.c.l.bf16 %v1800_v51  ;;  %1442 = vmatprep.subr.bf16.mxu1 %v1697_v32 }
  0x24   : > { %830 = vxpose.xlu1.c.b16.cont [5/8] %v1697_v32, 128  ;;  %v484_v27 = vand.u32 2147483647, %v451_v25  ;;  %v485_v54 = vand.u32 2147483647, %v452_v43  ;;  %v390_v21 = vunpack.c.h.bf16 %v1800_v51  ;;  %v407_v61 = vunpack.c.l.bf16 %v1817_v60  ;;  %882 = vmatprep.subr.bf16.mxu0 %v1697_v32  ;;  %v1853_v43 = vld [vmem:[%s1646_s25 + $0x30] sm:$0xff]  }
  0x25   : > { %v513_v48 = vadd.f32 %v512_v20, %v482_v6  ;;  %v1813_v57 = vsub.f32 %v406_v26, %v438_v31  ;;  %v453_v30 = vsub.f32 %v389_v52, %v421_v39  ;;  %v408_v1 = vunpack.c.h.bf16 %v1817_v60 }
  0x26   : > { %v424_v7 = vunpack.c.h.bf16 %v1730_v50  ;;  %v441_v31 = vunpack.c.l.bf16 %v1743_v59  ;;  %v454_v12 = vsub.f32 %v390_v21, %v422_v55  ;;  %v1836_v14 = vsub.f32 %v407_v61, %v439_v56  ;;  %1458 = vmatpush1.bf16.msra.mxu1 %v1800_v51  ;;  %883 = vmatpush1.bf16.msra.mxu0 %v1800_v51 }
  0x27   : > { %863 = vxpose.xlu0.c.b16.cont [6/8] %v1715_v42, 128  ;;  %v514_v53 = vadd.f32 %v513_v48, %v483_v36  ;;  %v486_v39 = vand.u32 2147483647, %v453_v30  ;;  %v1838_v15 = vsub.f32 %v408_v1, %v440_v10  ;;  %v391_v17 = vunpack.c.l.bf16 %v1830_v13  ;;  %1443 = vmatprep.subr.bf16.mxu1 %v1730_v50  ;;  %v1867_v30 = vld [vmem:[%s1646_s25 + $0x38] sm:$0xff]  }
  0x28   : > { %831 = vxpose.xlu1.c.b16.cont [6/8] %v1730_v50, 128  ;;  %v425_v55 = vunpack.c.l.bf16 %v1759_v11  ;;  %v487_v32 = vand.u32 2147483647, %v454_v12  ;;  %v392_v35 = vunpack.c.h.bf16 %v1830_v13  ;;  %v426_v56 = vunpack.c.h.bf16 %v1759_v11  ;;  %884 = vmatprep.subr.bf16.mxu0 %v1730_v50 }
  0x29   : > { %v515_v3 = vadd.f32 %v514_v53, %v484_v27  ;;  %v455_v10 = vsub.f32 %v391_v17, %v423_v45  ;;  %v409_v6 = vunpack.c.l.bf16 %v1846_v23  ;;  %v393_v26 = vunpack.c.l.bf16 %v1853_v43 }
  0x2a   : > { %v456_v25 = vsub.f32 %v392_v35, %v424_v7  ;;  %v394_v45 = vunpack.c.h.bf16 %v1853_v43  ;;  %1459 = vmatpush1.bf16.msra.mxu1 %v1830_v13  ;;  %v427_v27 = vunpack.c.l.bf16 %v1781_v24  ;;  %v428_v52 = vunpack.c.h.bf16 %v1781_v24  ;;  %885 = vmatpush1.bf16.msra.mxu0 %v1830_v13 }
  0x2b   : > { %864 = vxpose.xlu0.c.b16.cont [7/8] %v1743_v59, 128  ;;  %v516_v20 = vadd.f32 %v515_v3, %v485_v54  ;;  %v488_v44 = vand.u32 2147483647, %v455_v10  ;;  %v1857_v48 = vsub.f32 %v409_v6, %v441_v31  ;;  %1444 = vmatprep.subr.bf16.mxu1 %v1759_v11  ;;  %v457_v50 = vsub.f32 %v393_v26, %v425_v55 }
  0x2c   : > { %832 = vxpose.xlu1.c.b16.cont [7/8] %v1759_v11, 128  ;;  %v489_v54 = vand.u32 2147483647, %v456_v25  ;;  %v458_v21 = vsub.f32 %v394_v45, %v426_v56  ;;  %v395_v1 = vunpack.c.l.bf16 %v1867_v30  ;;  %v396_v7 = vunpack.c.h.bf16 %v1867_v30  ;;  %886 = vmatprep.subr.bf16.mxu0 %v1759_v11 }
  0x2d   : > { %v517_v36 = vadd.f32 %v516_v20, %v486_v39  ;;  %v494_v20 = vand.u32 2147483647, %v1701_v34  ;;  %v496_v35 = vand.u32 2147483647, %v1720_v46 }
  0x2e   : > { %1460 = vmatpush1.bf16.msra.mxu1 %v1853_v43  ;;  %v491_v3 = vand.u32 2147483647, %v458_v21  ;;  %v459_v12 = vsub.f32 %v395_v1, %v427_v27  ;;  %v460_v39 = vsub.f32 %v396_v7, %v428_v52  ;;  %887 = vmatpush1.bf16.msra.mxu0 %v1853_v43 }
  0x2f   : > { %865 = vxpose.xlu0.c.b16.end [8/8] %v1770_v19, 128  ;;  %v518_v53 = vadd.f32 %v517_v36, %v487_v32  ;;  %1445 = vmatprep.subr.bf16.mxu1 %v1781_v24 }
  0x30   : > { %833 = vxpose.xlu1.c.b16.end [8/8] %v1781_v24, 128  ;;  %v492_v55 = vand.u32 2147483647, %v459_v12  ;;  %888 = vmatprep.subr.bf16.mxu0 %v1781_v24  ;;  %v495_v24 = vand.u32 2147483647, %v1699_v33  ;;  %v501_v12 = vand.u32 2147483647, %v1785_v40  ;;  %v443_v40 = vunpack.c.l.bf16 %v1770_v19 }
  0x31   : > { %v519_v61 = vadd.f32 %v518_v53, %v488_v44 }
  0x32   : > { %1461 = vmatpush1.bf16.msra.mxu1 %v1867_v30  ;;  %889 = vmatpush1.bf16.msra.mxu0 %v1867_v30 }
  0x33   : > { %842 = vxpose.xlu0.c.b16.start [1/8] %v1653_v4, 128  ;;  %v520_v31 = vadd.f32 %v519_v61, %v489_v54  ;;  %1446 = vmatprep.subr.bf16.mxu1 %v1637_v0 }
  0x34   : > { %810 = vxpose.xlu1.c.b16.start [1/8] %v1664_v9, 128  ;;  %v490_v9 = vand.u32 2147483647, %v457_v50  ;;  %890 = vmatprep.subr.bf16.mxu0 %v1637_v0  ;;  %v497_v0 = vand.u32 2147483647, %v1722_v47 }
  0x36   : > { %v521_v17 = vadd.f32 %v520_v31, %v490_v9  ;;  %1462 = vmatpush1.bf16.msra.mxu1 %v1653_v4  ;;  %891 = vmatpush1.bf16.msra.mxu0 %v1653_v4  ;;  %v498_v4 = vand.u32 2147483647, %v1745_v62  ;;  %v499_v31 = vand.u32 2147483647, %v1747_v63  ;;  %v410_v63 = vunpack.c.h.bf16 %v1846_v23 }
  0x37   : > { %843 = vxpose.xlu0.c.b16.cont [2/8] %v1705_v37, 128  ;;  %1447 = vmatprep.subr.bf16.mxu1 %v1641_v2 }
  0x38   : > { %811 = vxpose.xlu1.c.b16.cont [2/8] %v1708_v38, 128  ;;  %v522_v11 = vadd.f32 %v521_v17, %v491_v3  ;;  %v493_v38 = vand.u32 2147483647, %v460_v39  ;;  %892 = vmatprep.subr.bf16.mxu0 %v1641_v2  ;;  %v1906_v2 = vld [vmem:[%s1646_s25 + $0x78] sm:$0xff]   ;;  %v500_v3 = vand.u32 2147483647, %v1774_v22 }
  0x39   : > { %v502_v17 = vand.u32 2147483647, %v1806_v28  ;;  %v506_v28 = vand.u32 2147483647, %v1857_v48 }
  0x3a   : > { %v523_v32 = vadd.f32 %v522_v11, %v492_v55  ;;  %1463 = vmatpush1.bf16.msra.mxu1 %v1705_v37  ;;  %893 = vmatpush1.bf16.msra.mxu0 %v1705_v37  ;;  %v503_v11 = vand.u32 2147483647, %v1813_v57 }
  0x3b   : > { %844 = vxpose.xlu0.c.b16.cont [3/8] %v1726_v49, 128  ;;  %1448 = vmatprep.subr.bf16.mxu1 %v1656_v5 }
  0x3c   : > { %812 = vxpose.xlu1.c.b16.cont [3/8] %v1738_v58, 128  ;;  %v524_v58 = vadd.f32 %v523_v32, %v493_v38  ;;  %894 = vmatprep.subr.bf16.mxu0 %v1656_v5 }
  0x3e   : > { %v525_v34 = vadd.f32 %v524_v58, %v494_v20  ;;  %1464 = vmatpush1.bf16.msra.mxu1 %v1726_v49  ;;  %895 = vmatpush1.bf16.msra.mxu0 %v1726_v49  ;;  %v504_v20 = vand.u32 2147483647, %v1836_v14  ;;  %v505_v58 = vand.u32 2147483647, %v1838_v15  ;;  %v444_v14 = vunpack.c.h.bf16 %v1770_v19 }
  0x3f   : > { %845 = vxpose.xlu0.c.b16.cont [4/8] %v1754_v8, 128  ;;  %1449 = vmatprep.subr.bf16.mxu1 %v1673_v16 }
  0x40   : > { %813 = vxpose.xlu1.c.b16.cont [4/8] %v1765_v18, 128  ;;  %v526_v33 = vadd.f32 %v525_v34, %v495_v24  ;;  %896 = vmatprep.subr.bf16.mxu0 %v1673_v16  ;;  %v442_v24 = vunpack.c.h.bf16 %v1743_v59 }
  0x42   : > { %v527_v46 = vadd.f32 %v526_v33, %v496_v35  ;;  %1465 = vmatpush1.bf16.msra.mxu1 %v1754_v8  ;;  %897 = vmatpush1.bf16.msra.mxu0 %v1754_v8  ;;  %v411_v35 = vunpack.c.l.bf16 %v1906_v2  ;;  %v412_v33 = vunpack.c.h.bf16 %v1906_v2 }
  0x43   : > { %846 = vxpose.xlu0.c.b16.cont [5/8] %v1788_v41, 128  ;;  %1450 = vmatprep.subr.bf16.mxu1 %v1691_v29 }
  0x44   : > { %814 = vxpose.xlu1.c.b16.cont [5/8] %v1800_v51, 128  ;;  %v528_v47 = vadd.f32 %v527_v46, %v497_v0  ;;  %898 = vmatprep.subr.bf16.mxu0 %v1691_v29  ;;  %v474_v0 = vsub.f32 %v410_v63, %v442_v24  ;;  %v476_v15 = vsub.f32 %v412_v33, %v444_v14 }
  0x46   : > { %v1910_v18 = vadd.f32 %v528_v47, %v498_v4  ;;  %1466 = vmatpush1.bf16.msra.mxu1 %v1788_v41  ;;  %899 = vmatpush1.bf16.msra.mxu0 %v1788_v41  ;;  %v475_v4 = vsub.f32 %v411_v35, %v443_v40 }
  0x47   : > { %847 = vxpose.xlu0.c.b16.cont [6/8] %v1817_v60, 128  ;;  %1451 = vmatprep.subr.bf16.mxu1 %v1715_v42 }
  0x48   : > { %815 = vxpose.xlu1.c.b16.cont [6/8] %v1830_v13, 128  ;;  %900 = vmatprep.subr.bf16.mxu0 %v1715_v42  ;;  %v530_v39 = vadd.f32 %v1910_v18, %v499_v31  ;;  %v508_v47 = vand.u32 2147483647, %v475_v4  ;;  %v509_v18 = vand.u32 2147483647, %v476_v15 }
  0x4a   : > { %1467 = vmatpush1.bf16.msra.mxu1 %v1817_v60  ;;  %901 = vmatpush1.bf16.msra.mxu0 %v1817_v60  ;;  %v531_v55 = vadd.f32 %v530_v39, %v500_v3 }
  0x4b   : > { %848 = vxpose.xlu0.c.b16.cont [7/8] %v1846_v23, 128  ;;  %1452 = vmatprep.subr.bf16.mxu1 %v1743_v59 }
  0x4c   : > { %816 = vxpose.xlu1.c.b16.cont [7/8] %v1853_v43, 128  ;;  %902 = vmatprep.subr.bf16.mxu0 %v1743_v59  ;;  %v532_v38 = vadd.f32 %v531_v55, %v501_v12  ;;  %v507_v59 = vand.u32 2147483647, %v474_v0 }
  0x4e   : > { %1468 = vmatpush1.bf16.msra.mxu1 %v1846_v23  ;;  %903 = vmatpush1.bf16.msra.mxu0 %v1846_v23  ;;  %v533_v32 = vadd.f32 %v532_v38, %v502_v17 }
  0x4f   : > { %849 = vxpose.xlu0.c.b16.end [8/8] %v1906_v2, 128  ;;  %1453 = vmatprep.subr.bf16.mxu1 %v1770_v19 }
  0x50   : > { %817 = vxpose.xlu1.c.b16.end [8/8] %v1867_v30, 128  ;;  %904 = vmatprep.subr.bf16.mxu0 %v1770_v19  ;;  %v534_v22 = vadd.f32 %v533_v32, %v503_v11 }
  0x52   : > { %1469 = vmatpush1.bf16.msra.mxu1 %v1906_v2  ;;  %905 = vmatpush1.bf16.msra.mxu0 %v1906_v2  ;;  %v535_v34 = vadd.f32 %v534_v22, %v504_v20 }
  0x54   : > { %v536_v57 = vadd.f32 %v535_v34, %v505_v58 }
  0x56   : > { %v537_v46 = vadd.f32 %v536_v57, %v506_v28 }
  0x58   : > { %v538_v23 = vadd.f32 %v537_v46, %v507_v59 }
  0x79   : > { %v866_v5 = vpop.trf.xlu0 }
  0x7a   : > { %986 = vmatprep.mubr.bf16.mxu1 %v866_v5  ;;  %v834_v16 = vpop.trf.xlu1  ;;  %v539_v5 = vadd.f32 %v538_v23, %v508_v47 }
  0x7b   : > { %987 = vmatmul.mubr.bf16.vlgmr.msra.gmra.mrb[0].mxu1 %v834_v16 }
  0x7c   : > { %v540_v16 = vadd.f32 %v539_v5, %v509_v18 }
  0x7d   : > { %v867_v29 = vpop.trf.xlu0 }
  0x7e   : > { %v835_v37 = vpop.trf.xlu1  ;;  %996 = vmatprep.mubr.bf16.mxu1 %v867_v29  ;;  %541 = vadd.xlane.f32.xlu0 %v540_v16 }
  0x81   : > { %v868_v42 = vpop.trf.xlu0 }
  0x82   : > { %v836_v49 = vpop.trf.xlu1 }
  0x83   : > { %997 = vmatmul.mubr.bf16.gmra.mrb[4].mxu1 %v835_v37 }
  0x84   : > { %1006 = vmatprep.mubr.bf16.mxu1 %v868_v42 }
  0x85   : > { %v869_v62 = vpop.trf.xlu0 }
  0x86   : > { %v837_v8 = vpop.trf.xlu1 }
  0x89   : > { %v870_v41 = vpop.trf.xlu0 }
  0x8a   : > { %v838_v51 = vpop.trf.xlu1 }
  0x8b   : > { %1007 = vmatmul.mubr.bf16.gmra.mrb[8].mxu1 %v836_v49 }
  0x8c   : > { %1016 = vmatprep.mubr.bf16.mxu1 %v869_v62 }
  0x8d   : > { %v871_v60 = vpop.trf.xlu0 }
  0x8e   : > { %v839_v13 = vpop.trf.xlu1 }
  0x91   : > { %v872_v56 = vpop.trf.xlu0 }
  0x92   : > { %v840_v10 = vpop.trf.xlu1 }
  0x93   : > { %1017 = vmatmul.mubr.bf16.gmra.mrb[12].mxu1 %v837_v8 }
  0x94   : > { %1026 = vmatprep.mubr.bf16.mxu1 %v870_v41 }
  0x95   : > { %v873_v6 = vpop.trf.xlu0 }
  0x96   : > { %v841_v36 = vpop.trf.xlu1 }
  0x99   : > { %v850_v25 = vpop.trf.xlu0 }
  0x9a   : > { %906 = vmatprep.mubr.bf16.mxu0 %v850_v25  ;;  %v818_v43 = vpop.trf.xlu1 }
  0x9b   : > { %907 = vmatmul.mubr.bf16.vlgmr.msra.gmra.mrb[0].mxu0 %v818_v43  ;;  %1027 = vmatmul.mubr.bf16.gmra.mrb[16].mxu1 %v838_v51 }
  0x9c   : > { %1036 = vmatprep.mubr.bf16.mxu1 %v871_v60 }
  0x9d   : > { %v851_v44 = vpop.trf.xlu0 }
  0x9e   : > { %916 = vmatprep.mubr.bf16.mxu0 %v851_v44  ;;  %v819_v26 = vpop.trf.xlu1 }
  0xa1   : > { %v852_v45 = vpop.trf.xlu0 }
  0xa2   : > { %v820_v27 = vpop.trf.xlu1 }
  0xa3   : > { %917 = vmatmul.mubr.bf16.gmra.mrb[4].mxu0 %v819_v26  ;;  %1037 = vmatmul.mubr.bf16.gmra.mrb[20].mxu1 %v839_v13 }
  0xa4   : > { %1046 = vmatprep.mubr.bf16.mxu1 %v872_v56  ;;  %926 = vmatprep.mubr.bf16.mxu0 %v852_v45 }
  0xa5   : > { %v853_v52 = vpop.trf.xlu0 }
  0xa6   : > { %v821_v53 = vpop.trf.xlu1 }
  0xa9   : > { %v854_v54 = vpop.trf.xlu0 }
  0xaa   : > { %v822_v50 = vpop.trf.xlu1 }
  0xab   : > { %927 = vmatmul.mubr.bf16.gmra.mrb[8].mxu0 %v820_v27  ;;  %1047 = vmatmul.mubr.bf16.gmra.mrb[24].mxu1 %v840_v10 }
  0xac   : > { %1056 = vmatprep.mubr.bf16.mxu1 %v873_v6  ;;  %936 = vmatprep.mubr.bf16.mxu0 %v853_v52 }
  0xad   : > { %v855_v21 = vpop.trf.xlu0 }
  0xae   : > { %v823_v30 = vpop.trf.xlu1 }
  0xb1   : > { %v856_v61 = vpop.trf.xlu0 }
  0xb2   : > { %v824_v1 = vpop.trf.xlu1 }
  0xb3   : > { %937 = vmatmul.mubr.bf16.gmra.mrb[12].mxu0 %v821_v53  ;;  %1057 = vmatmul.mubr.bf16.gmra.mrb[28].mxu1 %v841_v36 }
  0xb4   : > { %946 = vmatprep.mubr.bf16.mxu0 %v854_v54 }
  0xb5   : > { %v857_v7 = vpop.trf.xlu0 }
  0xb6   : > { %v825_v9 = vpop.trf.xlu1 }
  0xbb   : > { %947 = vmatmul.mubr.bf16.gmra.mrb[16].mxu0 %v822_v50 }
  0xbc   : > { %956 = vmatprep.mubr.bf16.mxu0 %v855_v21 }
  0xc3   : > { %957 = vmatmul.mubr.bf16.gmra.mrb[20].mxu0 %v823_v30 }
  0xc4   : > { %966 = vmatprep.mubr.bf16.mxu0 %v856_v61 }
  0xcb   : > { %967 = vmatmul.mubr.bf16.gmra.mrb[24].mxu0 %v824_v1 }
  0xcc   : > { %976 = vmatprep.mubr.bf16.mxu0 %v857_v7 }
  0xd3   : > { %977 = vmatmul.mubr.bf16.gmra.mrb[28].mxu0 %v825_v9 }
 0x14e   : > { %v988_v29 = vpop.f32.mrb[0].mxu1 }
 0x14f   : > { %v990_v37 = vpop.f32.mrb[1].mxu1 }
 0x150   : > { %v992_v42 = vpop.f32.mrb[2].mxu1 }
 0x151   : > { %v994_v48 = vpop.f32.mrb[3].mxu1 }
 0x156   : > { %v998_v49 = vpop.f32.mrb[4].mxu1 }
 0x157   : > { %v1000_v62 = vpop.f32.mrb[5].mxu1 }
 0x158   : > { %v1002_v8 = vpop.f32.mrb[6].mxu1 }
 0x159   : > { %v1004_v2 = vpop.f32.mrb[7].mxu1 }
 0x15e   : > { %v1008_v41 = vpop.f32.mrb[8].mxu1 }
 0x15f   : > { %v1010_v19 = vpop.f32.mrb[9].mxu1 }
 0x160   : > { %v1012_v51 = vpop.f32.mrb[10].mxu1 }
 0x161   : > { %v1014_v60 = vpop.f32.mrb[11].mxu1 }
 0x166   : > { %v1018_v13 = vpop.f32.mrb[12].mxu1 }
 0x167   : > { %v1020_v56 = vpop.f32.mrb[13].mxu1 }
 0x168   : > { %v1022_v10 = vpop.f32.mrb[14].mxu1 }
 0x169   : > { %v1024_v6 = vpop.f32.mrb[15].mxu1 }
 0x16e   : > { %v908_v36 = vpop.f32.mrb[0].mxu0  ;;  %v1028_v25 = vpop.f32.mrb[16].mxu1 }
 0x16f   : > { %v1230_v43 = vsub.f32 %v908_v36, %v990_v37  ;;  %v910_v44 = vpop.f32.mrb[1].mxu0  ;;  %v1030_v26 = vpop.f32.mrb[17].mxu1 }
 0x170   : > { %v912_v45 = vpop.f32.mrb[2].mxu0  ;;  %v1032_v27 = vpop.f32.mrb[18].mxu1 }
 0x171   : > { %v1231_v52 = vsub.f32 %v912_v45, %v994_v48  ;;  %v914_v53 = vpop.f32.mrb[3].mxu0  ;;  %v1034_v54 = vpop.f32.mrb[19].mxu1  ;;  %v1246_v50 = vand.u32 2147483647, %v1230_v43 }
 0x173   : > { %v1247_v21 = vand.u32 2147483647, %v1231_v52 }
 0x175   : > { %v1262_v30 = vadd.f32 %v1247_v21, %v1246_v50 }
 0x176   : > { %v918_v61 = vpop.f32.mrb[4].mxu0  ;;  %v1038_v1 = vpop.f32.mrb[20].mxu1 }
 0x177   : > { %v1232_v7 = vsub.f32 %v918_v61, %v1000_v62  ;;  %v920_v9 = vpop.f32.mrb[5].mxu0  ;;  %v1040_v31 = vpop.f32.mrb[21].mxu1 }
 0x178   : > { %v922_v3 = vpop.f32.mrb[6].mxu0  ;;  %v1042_v12 = vpop.f32.mrb[22].mxu1 }
 0x179   : > { %v1248_v39 = vand.u32 2147483647, %v1232_v7  ;;  %v1233_v17 = vsub.f32 %v922_v3, %v1004_v2  ;;  %v924_v55 = vpop.f32.mrb[7].mxu0  ;;  %v1044_v11 = vpop.f32.mrb[23].mxu1 }
 0x17b   : > { %v1263_v38 = vadd.f32 %v1262_v30, %v1248_v39  ;;  %v1249_v20 = vand.u32 2147483647, %v1233_v17 }
 0x17d   : > { %v1264_v32 = vadd.f32 %v1263_v38, %v1249_v20 }
 0x17e   : > { %v928_v24 = vpop.f32.mrb[8].mxu0  ;;  %v1048_v58 = vpop.f32.mrb[24].mxu1 }
 0x17f   : > { %v1234_v63 = vsub.f32 %v928_v24, %v1010_v19  ;;  %v930_v22 = vpop.f32.mrb[9].mxu0  ;;  %v1050_v40 = vpop.f32.mrb[25].mxu1 }
 0x180   : > { %v932_v35 = vpop.f32.mrb[10].mxu0  ;;  %v1052_v34 = vpop.f32.mrb[26].mxu1 }
 0x181   : > { %v1250_v28 = vand.u32 2147483647, %v1234_v63  ;;  %v1235_v0 = vsub.f32 %v932_v35, %v1014_v60  ;;  %v934_v57 = vpop.f32.mrb[11].mxu0  ;;  %v1054_v33 = vpop.f32.mrb[27].mxu1 }
 0x183   : > { %v1265_v14 = vadd.f32 %v1264_v32, %v1250_v28  ;;  %v1251_v4 = vand.u32 2147483647, %v1235_v0 }
 0x185   : > { %v1266_v59 = vadd.f32 %v1265_v14, %v1251_v4  ;;  %v1587_v14 = vmov 0.0  }
 0x186   : > { %v938_v46 = vpop.f32.mrb[12].mxu0  ;;  %v1058_v15 = vpop.f32.mrb[28].mxu1  ;;  %252 = vst.msk [vmem:[%s243_s28] sm:$0x1] %vm251_vm0, %v1587_v14 }
 0x187   : > { %v1236_v47 = vsub.f32 %v938_v46, %v1020_v56  ;;  %v940_v23 = vpop.f32.mrb[13].mxu0  ;;  %v1060_v18 = vpop.f32.mrb[29].mxu1 }
 0x188   : > { %v942_v5 = vpop.f32.mrb[14].mxu0  ;;  %v1062_v16 = vpop.f32.mrb[30].mxu1 }
 0x189   : > { %v1252_v29 = vand.u32 2147483647, %v1236_v47  ;;  %v1237_v37 = vsub.f32 %v942_v5, %v1024_v6  ;;  %v944_v42 = vpop.f32.mrb[15].mxu0  ;;  %v1064_v48 = vpop.f32.mrb[31].mxu1 }
 0x18b   : > { %v1267_v49 = vadd.f32 %v1266_v59, %v1252_v29  ;;  %v1253_v62 = vand.u32 2147483647, %v1237_v37 }
 0x18d   : > { %v1268_v8 = vadd.f32 %v1267_v49, %v1253_v62  ;;  %v477_v4 = vld [vmem:[%s243_s28] sm:$0x1] }
 0x18e   : > { %v948_v2 = vpop.f32.mrb[16].mxu0 }
 0x18f   : > { %v1238_v41 = vsub.f32 %v948_v2, %v1030_v26  ;;  %v950_v19 = vpop.f32.mrb[17].mxu0 }
 0x190   : > { %v952_v51 = vpop.f32.mrb[18].mxu0 }
 0x191   : > { %v1254_v60 = vand.u32 2147483647, %v1238_v41  ;;  %v1239_v13 = vsub.f32 %v952_v51, %v1034_v54  ;;  %v954_v10 = vpop.f32.mrb[19].mxu0 }
 0x193   : > { %v1269_v36 = vadd.f32 %v1268_v8, %v1254_v60  ;;  %v1255_v56 = vand.u32 2147483647, %v1239_v13 }
 0x195   : > { %v1270_v25 = vadd.f32 %v1269_v36, %v1255_v56 }
 0x196   : > { %v958_v43 = vpop.f32.mrb[20].mxu0 }
 0x197   : > { %v1240_v44 = vsub.f32 %v958_v43, %v1040_v31  ;;  %v960_v45 = vpop.f32.mrb[21].mxu0 }
 0x198   : > { %v962_v27 = vpop.f32.mrb[22].mxu0 }
 0x199   : > { %v1256_v6 = vand.u32 2147483647, %v1240_v44  ;;  %v1241_v52 = vsub.f32 %v962_v27, %v1044_v11  ;;  %v964_v53 = vpop.f32.mrb[23].mxu0 }
 0x19b   : > { %v1271_v50 = vadd.f32 %v1270_v25, %v1256_v6  ;;  %v1257_v21 = vand.u32 2147483647, %v1241_v52 }
 0x19d   : > { %v1272_v30 = vadd.f32 %v1271_v50, %v1257_v21 }
 0x19e   : > { %v968_v61 = vpop.f32.mrb[24].mxu0 }
 0x19f   : > { %v1242_v26 = vsub.f32 %v968_v61, %v1050_v40  ;;  %v970_v1 = vpop.f32.mrb[25].mxu0  ;;  %v542_v40 = vpop.xlane.xlu0 %541 }
 0x1a0   : > { %v972_v7 = vpop.f32.mrb[26].mxu0  ;;  %v543_v35 = vrot.slane %v542_v40, 4 }
 0x1a1   : > { %v1258_v9 = vand.u32 2147483647, %v1242_v26  ;;  %v1243_v54 = vsub.f32 %v972_v7, %v1054_v33  ;;  %v974_v3 = vpop.f32.mrb[27].mxu0 }
 0x1a2   : > { %v544_v34 = vadd.f32 %v543_v35, %v542_v40 }
 0x1a3   : > { %v1273_v12 = vadd.f32 %v1272_v30, %v1258_v9  ;;  %v1259_v39 = vand.u32 2147483647, %v1243_v54 }
 0x1a4   : > { %v545_v28 = vrot.slane %v544_v34, 2 }
 0x1a5   : > { %v1274_v17 = vadd.f32 %v1273_v12, %v1259_v39 }
 0x1a6   : > { %v978_v55 = vpop.f32.mrb[28].mxu0  ;;  %v546_v0 = vadd.f32 %v545_v28, %v544_v34 }
 0x1a7   : > { %v1244_v31 = vsub.f32 %v978_v55, %v1060_v18  ;;  %v980_v38 = vpop.f32.mrb[29].mxu0 }
 0x1a8   : > { %v982_v20 = vpop.f32.mrb[30].mxu0  ;;  %v547_v57 = vrot.slane %v546_v0, 1 }
 0x1a9   : > { %v1260_v11 = vand.u32 2147483647, %v1244_v31  ;;  %v1245_v32 = vsub.f32 %v982_v20, %v1064_v48  ;;  %v984_v24 = vpop.f32.mrb[31].mxu0 }
 0x1aa   : > { %v548_v33 = vadd.f32 %v547_v57, %v546_v0 }
 0x1ab   : > { %v1275_v58 = vadd.f32 %v1274_v17, %v1260_v11  ;;  %v1261_v63 = vand.u32 2147483647, %v1245_v32 }
 0x1ac   : > { %1470 = vpush %v548_v33 }
 0x1ad   : > { %v1276_v22 = vadd.f32 %v1275_v58, %v1261_v63 }
 0x1af   : > { %1277 = vadd.xlane.f32.xlu1 %v1276_v22 }
 0x1dd   : > { %s1471_s29 = spop %1470 }
 0x1de   : > { %v550_v59 = vstv %s1471_s29 }
 0x1df   : > { %v551_v46 = vadd.f32 %v550_v59, %v477_v4 }
 0x1e1   : > { %553 = vst.msk [vmem:[%s243_s28] sm:$0x1] %vm251_vm0, %v551_v46 }
 0x23c   : > { %v1278_v15 = vpop.xlane.xlu1 %1277 }
 0x23d   : > { %v1279_v47 = vrot.slane %v1278_v15, 4 }
 0x23f   : > { %v1280_v23 = vadd.f32 %v1279_v47, %v1278_v15 }
 0x241   : > { %v1281_v18 = vrot.slane %v1280_v23, 2 }
 0x243   : > { %v1282_v5 = vadd.f32 %v1281_v18, %v1280_v23 }
 0x245   : > { %v1283_v16 = vrot.slane %v1282_v5, 1 }
 0x247   : > { %v1284_v29 = vadd.f32 %v1283_v16, %v1282_v5 }
 0x249   : > { %1472 = vpush %v1284_v29 }
 0x27a   : > { %s1473_s30 = spop %1472 }
 0x27b   : > { %s1286_s7 = smul.f32 0.00024414063, %s1473_s30 }
 0x27d   : > { %v1287_v37 = vstv %s1286_s7 }
 0x27e   : > { %1288 = vst.msk [vmem:[%s246_s6] sm:$0x1] %vm251_vm0, %v1287_v37 }
 0x27f PF: > { %s14_s14 = sadd.s32 1, %s1585_s14   ;;  %s1974_s12 = smov %s1581_s13 }
 0x280   : > { %p11_p7 = scmp.ge.s32.totalorder %s14_s14, 4   ;;  %s1975_s13 = smov %s1977_s15 }
 0x282   :  { %13 = sbr.rel (!%p11_p7) target bundleno = 2 (0x2), region = 81 }

// kernel: _lambda_.8
= control target key start
LH: loop header
LB: loop body
LE: loop exit
PB: predicated region body
PF: predicated region fallthrough
CT: control target
= control target key end

     0   :  { %s1608_s12 = smov 0   ;;  %s1610_s13 = smov 0   ;;  %s1970_s0 = inlined_call_operand.vmem [shape: bf16[4,256,128], index: 0, kind: input, shape index: {}, may-alias: {0,1}]   ;;  %s1971_s1 = inlined_call_operand.vmem [shape: bf16[4,256,128], index: 1, kind: input, shape index: {}, may-alias: {0,1}]   ;;  %s1972_s2 = inlined_call_operand.vmem [shape: f32[2,1,1], index: 2, kind: output, shape index: {0}]   ;;  %s1973_s3 = inlined_call_operand.vmem [shape: f32[2,1,1], index: 3, kind: output, shape index: {1}]  }
   0x1   :  { %s1612_s14 = smov 0  }
   0x2 LB: > { %s26_s15 = sadd.s32 1, %s1581_s13  ;;  %p1397_p0 = scmp.ge.s32.totalorder %s1585_s14, 1  ;;  %s1585_s14 = sphi %s1612_s14, %s14_s14   ;;  %s1581_s13 = sphi %s1610_s13, %s1975_s13   ;;  %s1577_s12 = sphi %s1608_s12, %s1974_s12  }
   0x3   : > { %p28_p1 = scmp.ge.s32.totalorder %s26_s15, 2  ;;  %p180_p2 = scmp.lt.s32.totalorder %s1585_s14, 3 }
   0x5   : > { %s1977_s15 = smov (%p28_p1, %s26_s15), 0  ;;  %p181_p3 = pnand %p1397_p0, %p180_p2 }
   0x6   : > { %s229_s16 = sadd.s32 (!%p181_p3), 2, %s1577_s12  ;;  %p220_p4 = scmp.lt.s32.totalorder (!%p181_p3), %s1577_s12, 3  ;;  %vm251_vm0 = vcmask (!%p181_p3), 0  }
   0x7   : > { %184 = sbr.rel (%p181_p3) target bundleno = 639 (0x27f), region = 28  ;;  %p231_p5 = scmp.lt.s32.totalorder (!%p181_p3), %s229_s16, 3 }
   0x8   : > { %p241_p6 = scmp.lt.s32.totalorder (!%p181_p3), %s1577_s12, 1 }
   0xe   : > { %s221_s17 = scalar_select %p220_p4, %s1577_s12, 3 }
   0xf   : > { %s1979_s16 = smov (!%p231_p5, %s229_s16), 3  ;;  %s1981_s12 = smov (!%p241_p6, %s1577_s12), 1 }
  0x10   : > { %s1436_s18 = sshll.u32 %s221_s17, 7  ;;  %s1437_s19 = sshll.u32 %s1979_s16, 7 }
  0x11   : > { %s1634_s22 = scalar_lea.vmem %s1971_s1, %s1437_s19  ;;  %s1646_s25 = scalar_lea.vmem %s1970_s0, %s1436_s18 }
  0x12   : > { %v1637_v0 = vld [vmem:[%s1634_s22 + $0x40] sm:$0xff]   ;;  %v1641_v2 = vld [vmem:[%s1634_s22 + $0x48] sm:$0xff]   ;;  %v1656_v5 = vld [vmem:[%s1634_s22 + $0x50] sm:$0xff]   ;;  %s243_s28 = scalar_lea.vmem %s1972_s2, %s1981_s12  ;;  %s246_s6 = scalar_lea.vmem %s1973_s3, %s1981_s12 }
  0x13   : > { %v349_v1 = vld [vmem:[%s1634_s22] sm:$0xff]   ;;  %v1649_v3 = vld [vmem:[%s1634_s22 + $0x8] sm:$0xff]   ;;  %858 = vxpose.xlu0.c.b16.start [1/8] %v1637_v0, 128  ;;  %v1659_v6 = vld [vmem:[%s1634_s22 + $0x10] sm:$0xff]   ;;  %v430_v10 = vunpack.c.h.bf16 %v1637_v0  ;;  %v429_v11 = vunpack.c.l.bf16 %v1637_v0  ;;  %v431_v15 = vunpack.c.l.bf16 %v1641_v2  ;;  %v432_v17 = vunpack.c.h.bf16 %v1641_v2 }
  0x14   : > { %v1653_v4 = vld [vmem:[%s1646_s25 + $0x40] sm:$0xff]   ;;  %826 = vxpose.xlu1.c.b16.start [1/8] %v349_v1, 128  ;;  %1438 = vmatprep.subr.bf16.mxu1 %v349_v1  ;;  %v414_v13 = vunpack.c.h.bf16 %v349_v1  ;;  %v413_v14 = vunpack.c.l.bf16 %v349_v1  ;;  %v1673_v16 = vld [vmem:[%s1634_s22 + $0x58] sm:$0xff]   ;;  %v415_v18 = vunpack.c.l.bf16 %v1649_v3  ;;  %v416_v19 = vunpack.c.h.bf16 %v1649_v3  ;;  %v1705_v37 = vld [vmem:[%s1646_s25 + $0x48] sm:$0xff]  }
  0x15   : > { %874 = vmatprep.subr.bf16.mxu0 %v349_v1  ;;  %v398_v7 = vunpack.c.h.bf16 %v1653_v4  ;;  %v397_v8 = vunpack.c.l.bf16 %v1653_v4  ;;  %v1664_v9 = vld [vmem:[%s1646_s25] sm:$0xff]   ;;  %v433_v20 = vunpack.c.l.bf16 %v1656_v5  ;;  %v1680_v21 = vld [vmem:[%s1634_s22 + $0x18] sm:$0xff]   ;;  %v434_v22 = vunpack.c.h.bf16 %v1656_v5  ;;  %v1708_v38 = vld [vmem:[%s1646_s25 + $0x8] sm:$0xff]  }
  0x16   : > { %v382_v12 = vunpack.c.h.bf16 %v1664_v9  ;;  %v417_v23 = vunpack.c.l.bf16 %v1659_v6  ;;  %v418_v24 = vunpack.c.h.bf16 %v1659_v6  ;;  %v435_v25 = vunpack.c.l.bf16 %v1673_v16  ;;  %v1691_v29 = vld [vmem:[%s1634_s22 + $0x60] sm:$0xff]   ;;  %v1715_v42 = vld [vmem:[%s1634_s22 + $0x68] sm:$0xff]   ;;  %1454 = vmatpush1.bf16.msra.mxu1 %v1664_v9  ;;  %v1726_v49 = vld [vmem:[%s1646_s25 + $0x50] sm:$0xff]   ;;  %875 = vmatpush1.bf16.msra.mxu0 %v1664_v9 }
  0x17   : > { %859 = vxpose.xlu0.c.b16.cont [2/8] %v1641_v2, 128  ;;  %v436_v26 = vunpack.c.h.bf16 %v1673_v16  ;;  %v419_v27 = vunpack.c.l.bf16 %v1680_v21  ;;  %v420_v28 = vunpack.c.h.bf16 %v1680_v21  ;;  %v437_v30 = vunpack.c.l.bf16 %v1691_v29  ;;  %v1697_v32 = vld [vmem:[%s1634_s22 + $0x20] sm:$0xff]   ;;  %1439 = vmatprep.subr.bf16.mxu1 %v1649_v3  ;;  %v1730_v50 = vld [vmem:[%s1634_s22 + $0x28] sm:$0xff]   ;;  %v1738_v58 = vld [vmem:[%s1646_s25 + $0x10] sm:$0xff]  }
  0x18   : > { %827 = vxpose.xlu1.c.b16.cont [2/8] %v1649_v3, 128  ;;  %v438_v31 = vunpack.c.h.bf16 %v1691_v29  ;;  %v1699_v33 = vsub.f32 %v398_v7, %v430_v10  ;;  %v1701_v34 = vsub.f32 %v397_v8, %v429_v11  ;;  %v446_v35 = vsub.f32 %v382_v12, %v414_v13  ;;  %876 = vmatprep.subr.bf16.mxu0 %v1649_v3  ;;  %v1743_v59 = vld [vmem:[%s1634_s22 + $0x70] sm:$0xff]   ;;  %v1754_v8 = vld [vmem:[%s1646_s25 + $0x58] sm:$0xff]  }
  0x19   : > { %v381_v36 = vunpack.c.l.bf16 %v1664_v9  ;;  %v421_v39 = vunpack.c.l.bf16 %v1697_v32  ;;  %v399_v40 = vunpack.c.l.bf16 %v1705_v37  ;;  %v400_v41 = vunpack.c.h.bf16 %v1705_v37  ;;  %v1759_v11 = vld [vmem:[%s1634_s22 + $0x30] sm:$0xff]  }
  0x1a   : > { %v479_v43 = vand.u32 2147483647, %v446_v35  ;;  %v383_v45 = vunpack.c.l.bf16 %v1708_v38  ;;  %v384_v48 = vunpack.c.h.bf16 %v1708_v38  ;;  %v401_v53 = vunpack.c.l.bf16 %v1726_v49  ;;  %1455 = vmatpush1.bf16.msra.mxu1 %v1708_v38  ;;  %877 = vmatpush1.bf16.msra.mxu0 %v1708_v38 }
  0x1b   : > { %860 = vxpose.xlu0.c.b16.cont [3/8] %v1656_v5, 128  ;;  %v445_v44 = vsub.f32 %v381_v36, %v413_v14  ;;  %v1720_v46 = vsub.f32 %v399_v40, %v431_v15  ;;  %v1722_v47 = vsub.f32 %v400_v41, %v432_v17  ;;  %v402_v54 = vunpack.c.h.bf16 %v1726_v49  ;;  %1440 = vmatprep.subr.bf16.mxu1 %v1659_v6  ;;  %v1788_v41 = vld [vmem:[%s1646_s25 + $0x60] sm:$0xff]  }
  0x1c   : > { %828 = vxpose.xlu1.c.b16.cont [3/8] %v1659_v6, 128  ;;  %v447_v52 = vsub.f32 %v383_v45, %v415_v18  ;;  %v422_v55 = vunpack.c.h.bf16 %v1697_v32  ;;  %v439_v56 = vunpack.c.l.bf16 %v1715_v42  ;;  %v448_v57 = vsub.f32 %v384_v48, %v416_v19  ;;  %v1765_v18 = vld [vmem:[%s1646_s25 + $0x18] sm:$0xff]   ;;  %878 = vmatprep.subr.bf16.mxu0 %v1659_v6 }
  0x1d   : > { %v478_v51 = vand.u32 2147483647, %v445_v44  ;;  %v1745_v62 = vsub.f32 %v401_v53, %v433_v20  ;;  %v1747_v63 = vsub.f32 %v402_v54, %v434_v22  ;;  %v385_v7 = vunpack.c.l.bf16 %v1738_v58  ;;  %v1770_v19 = vld [vmem:[%s1634_s22 + $0x78] sm:$0xff]  }
  0x1e   : > { %v480_v61 = vand.u32 2147483647, %v447_v52  ;;  %v481_v1 = vand.u32 2147483647, %v448_v57  ;;  %v386_v3 = vunpack.c.h.bf16 %v1738_v58  ;;  %v440_v10 = vunpack.c.h.bf16 %v1715_v42  ;;  %1456 = vmatpush1.bf16.msra.mxu1 %v1738_v58  ;;  %879 = vmatpush1.bf16.msra.mxu0 %v1738_v58 }
  0x1f   : > { %861 = vxpose.xlu0.c.b16.cont [4/8] %v1673_v16, 128  ;;  %v510_v60 = vadd.f32 %v479_v43, %v478_v51  ;;  %v403_v13 = vunpack.c.l.bf16 %v1754_v8  ;;  %v449_v14 = vsub.f32 %v385_v7, %v417_v23  ;;  %v404_v17 = vunpack.c.h.bf16 %v1754_v8  ;;  %1441 = vmatprep.subr.bf16.mxu1 %v1680_v21  ;;  %v1800_v51 = vld [vmem:[%s1646_s25 + $0x20] sm:$0xff]  }
  0x20   : > { %829 = vxpose.xlu1.c.b16.cont [4/8] %v1680_v21, 128  ;;  %v450_v15 = vsub.f32 %v386_v3, %v418_v24  ;;  %v387_v35 = vunpack.c.l.bf16 %v1765_v18  ;;  %v388_v23 = vunpack.c.h.bf16 %v1765_v18  ;;  %v1781_v24 = vld [vmem:[%s1634_s22 + $0x38] sm:$0xff]   ;;  %v405_v44 = vunpack.c.l.bf16 %v1788_v41  ;;  %880 = vmatprep.subr.bf16.mxu0 %v1680_v21 }
  0x21   : > { %v511_v12 = vadd.f32 %v510_v60, %v480_v61  ;;  %v1774_v22 = vsub.f32 %v403_v13, %v435_v25  ;;  %v482_v6 = vand.u32 2147483647, %v449_v14  ;;  %v1785_v40 = vsub.f32 %v404_v17, %v436_v26  ;;  %v1817_v60 = vld [vmem:[%s1646_s25 + $0x68] sm:$0xff]  }
  0x22   : > { %v483_v36 = vand.u32 2147483647, %v450_v15  ;;  %v451_v25 = vsub.f32 %v387_v35, %v419_v27  ;;  %v452_v43 = vsub.f32 %v388_v23, %v420_v28  ;;  %v423_v45 = vunpack.c.l.bf16 %v1730_v50  ;;  %1457 = vmatpush1.bf16.msra.mxu1 %v1765_v18  ;;  %881 = vmatpush1.bf16.msra.mxu0 %v1765_v18  ;;  %v1830_v13 = vld [vmem:[%s1646_s25 + $0x28] sm:$0xff]   ;;  %v1846_v23 = vld [vmem:[%s1646_s25 + $0x70] sm:$0xff]  }
  0x23   : > { %862 = vxpose.xlu0.c.b16.cont [5/8] %v1691_v29, 128  ;;  %v512_v20 = vadd.f32 %v511_v12, %v481_v1  ;;  %v406_v26 = vunpack.c.h.bf16 %v1788_v41  ;;  %v1806_v28 = vsub.f32 %v405_v44, %v437_v30  ;;  %v389_v52 = vunpack.c.l.bf16 %v1800_v51  ;;  %1442 = vmatprep.subr.bf16.mxu1 %v1697_v32 }
  0x24   : > { %830 = vxpose.xlu1.c.b16.cont [5/8] %v1697_v32, 128  ;;  %v484_v27 = vand.u32 2147483647, %v451_v25  ;;  %v485_v54 = vand.u32 2147483647, %v452_v43  ;;  %v390_v21 = vunpack.c.h.bf16 %v1800_v51  ;;  %v407_v61 = vunpack.c.l.bf16 %v1817_v60  ;;  %882 = vmatprep.subr.bf16.mxu0 %v1697_v32  ;;  %v1853_v43 = vld [vmem:[%s1646_s25 + $0x30] sm:$0xff]  }
  0x25   : > { %v513_v48 = vadd.f32 %v512_v20, %v482_v6  ;;  %v1813_v57 = vsub.f32 %v406_v26, %v438_v31  ;;  %v453_v30 = vsub.f32 %v389_v52, %v421_v39  ;;  %v408_v1 = vunpack.c.h.bf16 %v1817_v60 }
  0x26   : > { %v424_v7 = vunpack.c.h.bf16 %v1730_v50  ;;  %v441_v31 = vunpack.c.l.bf16 %v1743_v59  ;;  %v454_v12 = vsub.f32 %v390_v21, %v422_v55  ;;  %v1836_v14 = vsub.f32 %v407_v61, %v439_v56  ;;  %1458 = vmatpush1.bf16.msra.mxu1 %v1800_v51  ;;  %883 = vmatpush1.bf16.msra.mxu0 %v1800_v51 }
  0x27   : > { %863 = vxpose.xlu0.c.b16.cont [6/8] %v1715_v42, 128  ;;  %v514_v53 = vadd.f32 %v513_v48, %v483_v36  ;;  %v486_v39 = vand.u32 2147483647, %v453_v30  ;;  %v1838_v15 = vsub.f32 %v408_v1, %v440_v10  ;;  %v391_v17 = vunpack.c.l.bf16 %v1830_v13  ;;  %1443 = vmatprep.subr.bf16.mxu1 %v1730_v50  ;;  %v1867_v30 = vld [vmem:[%s1646_s25 + $0x38] sm:$0xff]  }
  0x28   : > { %831 = vxpose.xlu1.c.b16.cont [6/8] %v1730_v50, 128  ;;  %v425_v55 = vunpack.c.l.bf16 %v1759_v11  ;;  %v487_v32 = vand.u32 2147483647, %v454_v12  ;;  %v392_v35 = vunpack.c.h.bf16 %v1830_v13  ;;  %v426_v56 = vunpack.c.h.bf16 %v1759_v11  ;;  %884 = vmatprep.subr.bf16.mxu0 %v1730_v50 }
  0x29   : > { %v515_v3 = vadd.f32 %v514_v53, %v484_v27  ;;  %v455_v10 = vsub.f32 %v391_v17, %v423_v45  ;;  %v409_v6 = vunpack.c.l.bf16 %v1846_v23  ;;  %v393_v26 = vunpack.c.l.bf16 %v1853_v43 }
  0x2a   : > { %v456_v25 = vsub.f32 %v392_v35, %v424_v7  ;;  %v394_v45 = vunpack.c.h.bf16 %v1853_v43  ;;  %1459 = vmatpush1.bf16.msra.mxu1 %v1830_v13  ;;  %v427_v27 = vunpack.c.l.bf16 %v1781_v24  ;;  %v428_v52 = vunpack.c.h.bf16 %v1781_v24  ;;  %885 = vmatpush1.bf16.msra.mxu0 %v1830_v13 }
  0x2b   : > { %864 = vxpose.xlu0.c.b16.cont [7/8] %v1743_v59, 128  ;;  %v516_v20 = vadd.f32 %v515_v3, %v485_v54  ;;  %v488_v44 = vand.u32 2147483647, %v455_v10  ;;  %v1857_v48 = vsub.f32 %v409_v6, %v441_v31  ;;  %1444 = vmatprep.subr.bf16.mxu1 %v1759_v11  ;;  %v457_v50 = vsub.f32 %v393_v26, %v425_v55 }
  0x2c   : > { %832 = vxpose.xlu1.c.b16.cont [7/8] %v1759_v11, 128  ;;  %v489_v54 = vand.u32 2147483647, %v456_v25  ;;  %v458_v21 = vsub.f32 %v394_v45, %v426_v56  ;;  %v395_v1 = vunpack.c.l.bf16 %v1867_v30  ;;  %v396_v7 = vunpack.c.h.bf16 %v1867_v30  ;;  %886 = vmatprep.subr.bf16.mxu0 %v1759_v11 }
  0x2d   : > { %v517_v36 = vadd.f32 %v516_v20, %v486_v39  ;;  %v494_v20 = vand.u32 2147483647, %v1701_v34  ;;  %v496_v35 = vand.u32 2147483647, %v1720_v46 }
  0x2e   : > { %1460 = vmatpush1.bf16.msra.mxu1 %v1853_v43  ;;  %v491_v3 = vand.u32 2147483647, %v458_v21  ;;  %v459_v12 = vsub.f32 %v395_v1, %v427_v27  ;;  %v460_v39 = vsub.f32 %v396_v7, %v428_v52  ;;  %887 = vmatpush1.bf16.msra.mxu0 %v1853_v43 }
  0x2f   : > { %865 = vxpose.xlu0.c.b16.end [8/8] %v1770_v19, 128  ;;  %v518_v53 = vadd.f32 %v517_v36, %v487_v32  ;;  %1445 = vmatprep.subr.bf16.mxu1 %v1781_v24 }
  0x30   : > { %833 = vxpose.xlu1.c.b16.end [8/8] %v1781_v24, 128  ;;  %v492_v55 = vand.u32 2147483647, %v459_v12  ;;  %888 = vmatprep.subr.bf16.mxu0 %v1781_v24  ;;  %v495_v24 = vand.u32 2147483647, %v1699_v33  ;;  %v501_v12 = vand.u32 2147483647, %v1785_v40  ;;  %v443_v40 = vunpack.c.l.bf16 %v1770_v19 }
  0x31   : > { %v519_v61 = vadd.f32 %v518_v53, %v488_v44 }
  0x32   : > { %1461 = vmatpush1.bf16.msra.mxu1 %v1867_v30  ;;  %889 = vmatpush1.bf16.msra.mxu0 %v1867_v30 }
  0x33   : > { %842 = vxpose.xlu0.c.b16.start [1/8] %v1653_v4, 128  ;;  %v520_v31 = vadd.f32 %v519_v61, %v489_v54  ;;  %1446 = vmatprep.subr.bf16.mxu1 %v1637_v0 }
  0x34   : > { %810 = vxpose.xlu1.c.b16.start [1/8] %v1664_v9, 128  ;;  %v490_v9 = vand.u32 2147483647, %v457_v50  ;;  %890 = vmatprep.subr.bf16.mxu0 %v1637_v0  ;;  %v497_v0 = vand.u32 2147483647, %v1722_v47 }
  0x36   : > { %v521_v17 = vadd.f32 %v520_v31, %v490_v9  ;;  %1462 = vmatpush1.bf16.msra.mxu1 %v1653_v4  ;;  %891 = vmatpush1.bf16.msra.mxu0 %v1653_v4  ;;  %v498_v4 = vand.u32 2147483647, %v1745_v62  ;;  %v499_v31 = vand.u32 2147483647, %v1747_v63  ;;  %v410_v63 = vunpack.c.h.bf16 %v1846_v23 }
  0x37   : > { %843 = vxpose.xlu0.c.b16.cont [2/8] %v1705_v37, 128  ;;  %1447 = vmatprep.subr.bf16.mxu1 %v1641_v2 }
  0x38   : > { %811 = vxpose.xlu1.c.b16.cont [2/8] %v1708_v38, 128  ;;  %v522_v11 = vadd.f32 %v521_v17, %v491_v3  ;;  %v493_v38 = vand.u32 2147483647, %v460_v39  ;;  %892 = vmatprep.subr.bf16.mxu0 %v1641_v2  ;;  %v1906_v2 = vld [vmem:[%s1646_s25 + $0x78] sm:$0xff]   ;;  %v500_v3 = vand.u32 2147483647, %v1774_v22 }
  0x39   : > { %v502_v17 = vand.u32 2147483647, %v1806_v28  ;;  %v506_v28 = vand.u32 2147483647, %v1857_v48 }
  0x3a   : > { %v523_v32 = vadd.f32 %v522_v11, %v492_v55  ;;  %1463 = vmatpush1.bf16.msra.mxu1 %v1705_v37  ;;  %893 = vmatpush1.bf16.msra.mxu0 %v1705_v37  ;;  %v503_v11 = vand.u32 2147483647, %v1813_v57 }
  0x3b   : > { %844 = vxpose.xlu0.c.b16.cont [3/8] %v1726_v49, 128  ;;  %1448 = vmatprep.subr.bf16.mxu1 %v1656_v5 }
  0x3c   : > { %812 = vxpose.xlu1.c.b16.cont [3/8] %v1738_v58, 128  ;;  %v524_v58 = vadd.f32 %v523_v32, %v493_v38  ;;  %894 = vmatprep.subr.bf16.mxu0 %v1656_v5 }
  0x3e   : > { %v525_v34 = vadd.f32 %v524_v58, %v494_v20  ;;  %1464 = vmatpush1.bf16.msra.mxu1 %v1726_v49  ;;  %895 = vmatpush1.bf16.msra.mxu0 %v1726_v49  ;;  %v504_v20 = vand.u32 2147483647, %v1836_v14  ;;  %v505_v58 = vand.u32 2147483647, %v1838_v15  ;;  %v444_v14 = vunpack.c.h.bf16 %v1770_v19 }
  0x3f   : > { %845 = vxpose.xlu0.c.b16.cont [4/8] %v1754_v8, 128  ;;  %1449 = vmatprep.subr.bf16.mxu1 %v1673_v16 }
  0x40   : > { %813 = vxpose.xlu1.c.b16.cont [4/8] %v1765_v18, 128  ;;  %v526_v33 = vadd.f32 %v525_v34, %v495_v24  ;;  %896 = vmatprep.subr.bf16.mxu0 %v1673_v16  ;;  %v442_v24 = vunpack.c.h.bf16 %v1743_v59 }
  0x42   : > { %v527_v46 = vadd.f32 %v526_v33, %v496_v35  ;;  %1465 = vmatpush1.bf16.msra.mxu1 %v1754_v8  ;;  %897 = vmatpush1.bf16.msra.mxu0 %v1754_v8  ;;  %v411_v35 = vunpack.c.l.bf16 %v1906_v2  ;;  %v412_v33 = vunpack.c.h.bf16 %v1906_v2 }
  0x43   : > { %846 = vxpose.xlu0.c.b16.cont [5/8] %v1788_v41, 128  ;;  %1450 = vmatprep.subr.bf16.mxu1 %v1691_v29 }
  0x44   : > { %814 = vxpose.xlu1.c.b16.cont [5/8] %v1800_v51, 128  ;;  %v528_v47 = vadd.f32 %v527_v46, %v497_v0  ;;  %898 = vmatprep.subr.bf16.mxu0 %v1691_v29  ;;  %v474_v0 = vsub.f32 %v410_v63, %v442_v24  ;;  %v476_v15 = vsub.f32 %v412_v33, %v444_v14 }
  0x46   : > { %v1910_v18 = vadd.f32 %v528_v47, %v498_v4  ;;  %1466 = vmatpush1.bf16.msra.mxu1 %v1788_v41  ;;  %899 = vmatpush1.bf16.msra.mxu0 %v1788_v41  ;;  %v475_v4 = vsub.f32 %v411_v35, %v443_v40 }
  0x47   : > { %847 = vxpose.xlu0.c.b16.cont [6/8] %v1817_v60, 128  ;;  %1451 = vmatprep.subr.bf16.mxu1 %v1715_v42 }
  0x48   : > { %815 = vxpose.xlu1.c.b16.cont [6/8] %v1830_v13, 128  ;;  %900 = vmatprep.subr.bf16.mxu0 %v1715_v42  ;;  %v530_v39 = vadd.f32 %v1910_v18, %v499_v31  ;;  %v508_v47 = vand.u32 2147483647, %v475_v4  ;;  %v509_v18 = vand.u32 2147483647, %v476_v15 }
  0x4a   : > { %1467 = vmatpush1.bf16.msra.mxu1 %v1817_v60  ;;  %901 = vmatpush1.bf16.msra.mxu0 %v1817_v60  ;;  %v531_v55 = vadd.f32 %v530_v39, %v500_v3 }
  0x4b   : > { %848 = vxpose.xlu0.c.b16.cont [7/8] %v1846_v23, 128  ;;  %1452 = vmatprep.subr.bf16.mxu1 %v1743_v59 }
  0x4c   : > { %816 = vxpose.xlu1.c.b16.cont [7/8] %v1853_v43, 128  ;;  %902 = vmatprep.subr.bf16.mxu0 %v1743_v59  ;;  %v532_v38 = vadd.f32 %v531_v55, %v501_v12  ;;  %v507_v59 = vand.u32 2147483647, %v474_v0 }
  0x4e   : > { %1468 = vmatpush1.bf16.msra.mxu1 %v1846_v23  ;;  %903 = vmatpush1.bf16.msra.mxu0 %v1846_v23  ;;  %v533_v32 = vadd.f32 %v532_v38, %v502_v17 }
  0x4f   : > { %849 = vxpose.xlu0.c.b16.end [8/8] %v1906_v2, 128  ;;  %1453 = vmatprep.subr.bf16.mxu1 %v1770_v19 }
  0x50   : > { %817 = vxpose.xlu1.c.b16.end [8/8] %v1867_v30, 128  ;;  %904 = vmatprep.subr.bf16.mxu0 %v1770_v19  ;;  %v534_v22 = vadd.f32 %v533_v32, %v503_v11 }
  0x52   : > { %1469 = vmatpush1.bf16.msra.mxu1 %v1906_v2  ;;  %905 = vmatpush1.bf16.msra.mxu0 %v1906_v2  ;;  %v535_v34 = vadd.f32 %v534_v22, %v504_v20 }
  0x54   : > { %v536_v57 = vadd.f32 %v535_v34, %v505_v58 }
  0x56   : > { %v537_v46 = vadd.f32 %v536_v57, %v506_v28 }
  0x58   : > { %v538_v23 = vadd.f32 %v537_v46, %v507_v59 }
  0x79   : > { %v866_v5 = vpop.trf.xlu0 }
  0x7a   : > { %986 = vmatprep.mubr.bf16.mxu1 %v866_v5  ;;  %v834_v16 = vpop.trf.xlu1  ;;  %v539_v5 = vadd.f32 %v538_v23, %v508_v47 }
  0x7b   : > { %987 = vmatmul.mubr.bf16.vlgmr.msra.gmra.mrb[0].mxu1 %v834_v16 }
  0x7c   : > { %v540_v16 = vadd.f32 %v539_v5, %v509_v18 }
  0x7d   : > { %v867_v29 = vpop.trf.xlu0 }
  0x7e   : > { %v835_v37 = vpop.trf.xlu1  ;;  %996 = vmatprep.mubr.bf16.mxu1 %v867_v29  ;;  %541 = vadd.xlane.f32.xlu0 %v540_v16 }
  0x81   : > { %v868_v42 = vpop.trf.xlu0 }
  0x82   : > { %v836_v49 = vpop.trf.xlu1 }
  0x83   : > { %997 = vmatmul.mubr.bf16.gmra.mrb[4].mxu1 %v835_v37 }
  0x84   : > { %1006 = vmatprep.mubr.bf16.mxu1 %v868_v42 }
  0x85   : > { %v869_v62 = vpop.trf.xlu0 }
  0x86   : > { %v837_v8 = vpop.trf.xlu1 }
  0x89   : > { %v870_v41 = vpop.trf.xlu0 }
  0x8a   : > { %v838_v51 = vpop.trf.xlu1 }
  0x8b   : > { %1007 = vmatmul.mubr.bf16.gmra.mrb[8].mxu1 %v836_v49 }
  0x8c   : > { %1016 = vmatprep.mubr.bf16.mxu1 %v869_v62 }
  0x8d   : > { %v871_v60 = vpop.trf.xlu0 }
  0x8e   : > { %v839_v13 = vpop.trf.xlu1 }
  0x91   : > { %v872_v56 = vpop.trf.xlu0 }
  0x92   : > { %v840_v10 = vpop.trf.xlu1 }
  0x93   : > { %1017 = vmatmul.mubr.bf16.gmra.mrb[12].mxu1 %v837_v8 }
  0x94   : > { %1026 = vmatprep.mubr.bf16.mxu1 %v870_v41 }
  0x95   : > { %v873_v6 = vpop.trf.xlu0 }
  0x96   : > { %v841_v36 = vpop.trf.xlu1 }
  0x99   : > { %v850_v25 = vpop.trf.xlu0 }
  0x9a   : > { %906 = vmatprep.mubr.bf16.mxu0 %v850_v25  ;;  %v818_v43 = vpop.trf.xlu1 }
  0x9b   : > { %907 = vmatmul.mubr.bf16.vlgmr.msra.gmra.mrb[0].mxu0 %v818_v43  ;;  %1027 = vmatmul.mubr.bf16.gmra.mrb[16].mxu1 %v838_v51 }
  0x9c   : > { %1036 = vmatprep.mubr.bf16.mxu1 %v871_v60 }
  0x9d   : > { %v851_v44 = vpop.trf.xlu0 }
  0x9e   : > { %916 = vmatprep.mubr.bf16.mxu0 %v851_v44  ;;  %v819_v26 = vpop.trf.xlu1 }
  0xa1   : > { %v852_v45 = vpop.trf.xlu0 }
  0xa2   : > { %v820_v27 = vpop.trf.xlu1 }
  0xa3   : > { %917 = vmatmul.mubr.bf16.gmra.mrb[4].mxu0 %v819_v26  ;;  %1037 = vmatmul.mubr.bf16.gmra.mrb[20].mxu1 %v839_v13 }
  0xa4   : > { %1046 = vmatprep.mubr.bf16.mxu1 %v872_v56  ;;  %926 = vmatprep.mubr.bf16.mxu0 %v852_v45 }
  0xa5   : > { %v853_v52 = vpop.trf.xlu0 }
  0xa6   : > { %v821_v53 = vpop.trf.xlu1 }
  0xa9   : > { %v854_v54 = vpop.trf.xlu0 }
  0xaa   : > { %v822_v50 = vpop.trf.xlu1 }
  0xab   : > { %927 = vmatmul.mubr.bf16.gmra.mrb[8].mxu0 %v820_v27  ;;  %1047 = vmatmul.mubr.bf16.gmra.mrb[24].mxu1 %v840_v10 }
  0xac   : > { %1056 = vmatprep.mubr.bf16.mxu1 %v873_v6  ;;  %936 = vmatprep.mubr.bf16.mxu0 %v853_v52 }
  0xad   : > { %v855_v21 = vpop.trf.xlu0 }
  0xae   : > { %v823_v30 = vpop.trf.xlu1 }
  0xb1   : > { %v856_v61 = vpop.trf.xlu0 }
  0xb2   : > { %v824_v1 = vpop.trf.xlu1 }
  0xb3   : > { %937 = vmatmul.mubr.bf16.gmra.mrb[12].mxu0 %v821_v53  ;;  %1057 = vmatmul.mubr.bf16.gmra.mrb[28].mxu1 %v841_v36 }
  0xb4   : > { %946 = vmatprep.mubr.bf16.mxu0 %v854_v54 }
  0xb5   : > { %v857_v7 = vpop.trf.xlu0 }
  0xb6   : > { %v825_v9 = vpop.trf.xlu1 }
  0xbb   : > { %947 = vmatmul.mubr.bf16.gmra.mrb[16].mxu0 %v822_v50 }
  0xbc   : > { %956 = vmatprep.mubr.bf16.mxu0 %v855_v21 }
  0xc3   : > { %957 = vmatmul.mubr.bf16.gmra.mrb[20].mxu0 %v823_v30 }
  0xc4   : > { %966 = vmatprep.mubr.bf16.mxu0 %v856_v61 }
  0xcb   : > { %967 = vmatmul.mubr.bf16.gmra.mrb[24].mxu0 %v824_v1 }
  0xcc   : > { %976 = vmatprep.mubr.bf16.mxu0 %v857_v7 }
  0xd3   : > { %977 = vmatmul.mubr.bf16.gmra.mrb[28].mxu0 %v825_v9 }
 0x14e   : > { %v988_v29 = vpop.f32.mrb[0].mxu1 }
 0x14f   : > { %v990_v37 = vpop.f32.mrb[1].mxu1 }
 0x150   : > { %v992_v42 = vpop.f32.mrb[2].mxu1 }
 0x151   : > { %v994_v48 = vpop.f32.mrb[3].mxu1 }
 0x156   : > { %v998_v49 = vpop.f32.mrb[4].mxu1 }
 0x157   : > { %v1000_v62 = vpop.f32.mrb[5].mxu1 }
 0x158   : > { %v1002_v8 = vpop.f32.mrb[6].mxu1 }
 0x159   : > { %v1004_v2 = vpop.f32.mrb[7].mxu1 }
 0x15e   : > { %v1008_v41 = vpop.f32.mrb[8].mxu1 }
 0x15f   : > { %v1010_v19 = vpop.f32.mrb[9].mxu1 }
 0x160   : > { %v1012_v51 = vpop.f32.mrb[10].mxu1 }
 0x161   : > { %v1014_v60 = vpop.f32.mrb[11].mxu1 }
 0x166   : > { %v1018_v13 = vpop.f32.mrb[12].mxu1 }
 0x167   : > { %v1020_v56 = vpop.f32.mrb[13].mxu1 }
 0x168   : > { %v1022_v10 = vpop.f32.mrb[14].mxu1 }
 0x169   : > { %v1024_v6 = vpop.f32.mrb[15].mxu1 }
 0x16e   : > { %v908_v36 = vpop.f32.mrb[0].mxu0  ;;  %v1028_v25 = vpop.f32.mrb[16].mxu1 }
 0x16f   : > { %v1230_v43 = vsub.f32 %v908_v36, %v990_v37  ;;  %v910_v44 = vpop.f32.mrb[1].mxu0  ;;  %v1030_v26 = vpop.f32.mrb[17].mxu1 }
 0x170   : > { %v912_v45 = vpop.f32.mrb[2].mxu0  ;;  %v1032_v27 = vpop.f32.mrb[18].mxu1 }
 0x171   : > { %v1231_v52 = vsub.f32 %v912_v45, %v994_v48  ;;  %v914_v53 = vpop.f32.mrb[3].mxu0  ;;  %v1034_v54 = vpop.f32.mrb[19].mxu1  ;;  %v1246_v50 = vand.u32 2147483647, %v1230_v43 }
 0x173   : > { %v1247_v21 = vand.u32 2147483647, %v1231_v52 }
 0x175   : > { %v1262_v30 = vadd.f32 %v1247_v21, %v1246_v50 }
 0x176   : > { %v918_v61 = vpop.f32.mrb[4].mxu0  ;;  %v1038_v1 = vpop.f32.mrb[20].mxu1 }
 0x177   : > { %v1232_v7 = vsub.f32 %v918_v61, %v1000_v62  ;;  %v920_v9 = vpop.f32.mrb[5].mxu0  ;;  %v1040_v31 = vpop.f32.mrb[21].mxu1 }
 0x178   : > { %v922_v3 = vpop.f32.mrb[6].mxu0  ;;  %v1042_v12 = vpop.f32.mrb[22].mxu1 }
 0x179   : > { %v1248_v39 = vand.u32 2147483647, %v1232_v7  ;;  %v1233_v17 = vsub.f32 %v922_v3, %v1004_v2  ;;  %v924_v55 = vpop.f32.mrb[7].mxu0  ;;  %v1044_v11 = vpop.f32.mrb[23].mxu1 }
 0x17b   : > { %v1263_v38 = vadd.f32 %v1262_v30, %v1248_v39  ;;  %v1249_v20 = vand.u32 2147483647, %v1233_v17 }
 0x17d   : > { %v1264_v32 = vadd.f32 %v1263_v38, %v1249_v20 }
 0x17e   : > { %v928_v24 = vpop.f32.mrb[8].mxu0  ;;  %v1048_v58 = vpop.f32.mrb[24].mxu1 }
 0x17f   : > { %v1234_v63 = vsub.f32 %v928_v24, %v1010_v19  ;;  %v930_v22 = vpop.f32.mrb[9].mxu0  ;;  %v1050_v40 = vpop.f32.mrb[25].mxu1 }
 0x180   : > { %v932_v35 = vpop.f32.mrb[10].mxu0  ;;  %v1052_v34 = vpop.f32.mrb[26].mxu1 }
 0x181   : > { %v1250_v28 = vand.u32 2147483647, %v1234_v63  ;;  %v1235_v0 = vsub.f32 %v932_v35, %v1014_v60  ;;  %v934_v57 = vpop.f32.mrb[11].mxu0  ;;  %v1054_v33 = vpop.f32.mrb[27].mxu1 }
 0x183   : > { %v1265_v14 = vadd.f32 %v1264_v32, %v1250_v28  ;;  %v1251_v4 = vand.u32 2147483647, %v1235_v0 }
 0x185   : > { %v1266_v59 = vadd.f32 %v1265_v14, %v1251_v4  ;;  %v1587_v14 = vmov 0.0  }
 0x186   : > { %v938_v46 = vpop.f32.mrb[12].mxu0  ;;  %v1058_v15 = vpop.f32.mrb[28].mxu1  ;;  %252 = vst.msk [vmem:[%s243_s28] sm:$0x1] %vm251_vm0, %v1587_v14 }
 0x187   : > { %v1236_v47 = vsub.f32 %v938_v46, %v1020_v56  ;;  %v940_v23 = vpop.f32.mrb[13].mxu0  ;;  %v1060_v18 = vpop.f32.mrb[29].mxu1 }
 0x188   : > { %v942_v5 = vpop.f32.mrb[14].mxu0  ;;  %v1062_v16 = vpop.f32.mrb[30].mxu1 }
 0x189   : > { %v1252_v29 = vand.u32 2147483647, %v1236_v47  ;;  %v1237_v37 = vsub.f32 %v942_v5, %v1024_v6  ;;  %v944_v42 = vpop.f32.mrb[15].mxu0  ;;  %v1064_v48 = vpop.f32.mrb[31].mxu1 }
 0x18b   : > { %v1267_v49 = vadd.f32 %v1266_v59, %v1252_v29  ;;  %v1253_v62 = vand.u32 2147483647, %v1237_v37 }
 0x18d   : > { %v1268_v8 = vadd.f32 %v1267_v49, %v1253_v62  ;;  %v477_v4 = vld [vmem:[%s243_s28] sm:$0x1] }
 0x18e   : > { %v948_v2 = vpop.f32.mrb[16].mxu0 }
 0x18f   : > { %v1238_v41 = vsub.f32 %v948_v2, %v1030_v26  ;;  %v950_v19 = vpop.f32.mrb[17].mxu0 }
 0x190   : > { %v952_v51 = vpop.f32.mrb[18].mxu0 }
 0x191   : > { %v1254_v60 = vand.u32 2147483647, %v1238_v41  ;;  %v1239_v13 = vsub.f32 %v952_v51, %v1034_v54  ;;  %v954_v10 = vpop.f32.mrb[19].mxu0 }
 0x193   : > { %v1269_v36 = vadd.f32 %v1268_v8, %v1254_v60  ;;  %v1255_v56 = vand.u32 2147483647, %v1239_v13 }
 0x195   : > { %v1270_v25 = vadd.f32 %v1269_v36, %v1255_v56 }
 0x196   : > { %v958_v43 = vpop.f32.mrb[20].mxu0 }
 0x197   : > { %v1240_v44 = vsub.f32 %v958_v43, %v1040_v31  ;;  %v960_v45 = vpop.f32.mrb[21].mxu0 }
 0x198   : > { %v962_v27 = vpop.f32.mrb[22].mxu0 }
 0x199   : > { %v1256_v6 = vand.u32 2147483647, %v1240_v44  ;;  %v1241_v52 = vsub.f32 %v962_v27, %v1044_v11  ;;  %v964_v53 = vpop.f32.mrb[23].mxu0 }
 0x19b   : > { %v1271_v50 = vadd.f32 %v1270_v25, %v1256_v6  ;;  %v1257_v21 = vand.u32 2147483647, %v1241_v52 }
 0x19d   : > { %v1272_v30 = vadd.f32 %v1271_v50, %v1257_v21 }
 0x19e   : > { %v968_v61 = vpop.f32.mrb[24].mxu0 }
 0x19f   : > { %v1242_v26 = vsub.f32 %v968_v61, %v1050_v40  ;;  %v970_v1 = vpop.f32.mrb[25].mxu0  ;;  %v542_v40 = vpop.xlane.xlu0 %541 }
 0x1a0   : > { %v972_v7 = vpop.f32.mrb[26].mxu0  ;;  %v543_v35 = vrot.slane %v542_v40, 4 }
 0x1a1   : > { %v1258_v9 = vand.u32 2147483647, %v1242_v26  ;;  %v1243_v54 = vsub.f32 %v972_v7, %v1054_v33  ;;  %v974_v3 = vpop.f32.mrb[27].mxu0 }
 0x1a2   : > { %v544_v34 = vadd.f32 %v543_v35, %v542_v40 }
 0x1a3   : > { %v1273_v12 = vadd.f32 %v1272_v30, %v1258_v9  ;;  %v1259_v39 = vand.u32 2147483647, %v1243_v54 }
 0x1a4   : > { %v545_v28 = vrot.slane %v544_v34, 2 }
 0x1a5   : > { %v1274_v17 = vadd.f32 %v1273_v12, %v1259_v39 }
 0x1a6   : > { %v978_v55 = vpop.f32.mrb[28].mxu0  ;;  %v546_v0 = vadd.f32 %v545_v28, %v544_v34 }
 0x1a7   : > { %v1244_v31 = vsub.f32 %v978_v55, %v1060_v18  ;;  %v980_v38 = vpop.f32.mrb[29].mxu0 }
 0x1a8   : > { %v982_v20 = vpop.f32.mrb[30].mxu0  ;;  %v547_v57 = vrot.slane %v546_v0, 1 }
 0x1a9   : > { %v1260_v11 = vand.u32 2147483647, %v1244_v31  ;;  %v1245_v32 = vsub.f32 %v982_v20, %v1064_v48  ;;  %v984_v24 = vpop.f32.mrb[31].mxu0 }
 0x1aa   : > { %v548_v33 = vadd.f32 %v547_v57, %v546_v0 }
 0x1ab   : > { %v1275_v58 = vadd.f32 %v1274_v17, %v1260_v11  ;;  %v1261_v63 = vand.u32 2147483647, %v1245_v32 }
 0x1ac   : > { %1470 = vpush %v548_v33 }
 0x1ad   : > { %v1276_v22 = vadd.f32 %v1275_v58, %v1261_v63 }
 0x1af   : > { %1277 = vadd.xlane.f32.xlu1 %v1276_v22 }
 0x1dd   : > { %s1471_s29 = spop %1470 }
 0x1de   : > { %v550_v59 = vstv %s1471_s29 }
 0x1df   : > { %v551_v46 = vadd.f32 %v550_v59, %v477_v4 }
 0x1e1   : > { %553 = vst.msk [vmem:[%s243_s28] sm:$0x1] %vm251_vm0, %v551_v46 }
 0x23c   : > { %v1278_v15 = vpop.xlane.xlu1 %1277 }
 0x23d   : > { %v1279_v47 = vrot.slane %v1278_v15, 4 }
 0x23f   : > { %v1280_v23 = vadd.f32 %v1279_v47, %v1278_v15 }
 0x241   : > { %v1281_v18 = vrot.slane %v1280_v23, 2 }
 0x243   : > { %v1282_v5 = vadd.f32 %v1281_v18, %v1280_v23 }
 0x245   : > { %v1283_v16 = vrot.slane %v1282_v5, 1 }
 0x247   : > { %v1284_v29 = vadd.f32 %v1283_v16, %v1282_v5 }
 0x249   : > { %1472 = vpush %v1284_v29 }
 0x27a   : > { %s1473_s30 = spop %1472 }
 0x27b   : > { %s1286_s7 = smul.f32 0.00048828125, %s1473_s30 }
 0x27d   : > { %v1287_v37 = vstv %s1286_s7 }
 0x27e   : > { %1288 = vst.msk [vmem:[%s246_s6] sm:$0x1] %vm251_vm0, %v1287_v37 }
 0x27f PF: > { %s14_s14 = sadd.s32 1, %s1585_s14   ;;  %s1974_s12 = smov %s1581_s13 }
 0x280   : > { %p11_p7 = scmp.ge.s32.totalorder %s14_s14, 4   ;;  %s1975_s13 = smov %s1977_s15 }
 0x282   :  { %13 = sbr.rel (!%p11_p7) target bundleno = 2 (0x2), region = 81 }

// kernel: _lambda_.5
= control target key start
LH: loop header
LB: loop body
LE: loop exit
PB: predicated region body
PF: predicated region fallthrough
CT: control target
= control target key end

     0   :  { %s598_s15 = smov 0   ;;  %s600_s16 = smov 0   ;;  %s673_s0 = inlined_call_operand.vmem [shape: f32[2,3,256], index: 0, kind: input, shape index: {}]   ;;  %s674_s1 = inlined_call_operand.vmem [shape: f32[2,3,256], index: 1, kind: input, shape index: {}]   ;;  %s675_s2 = inlined_call_operand.vmem [shape: f32[2,1,1], index: 2, kind: output, shape index: {0}]   ;;  %s676_s3 = inlined_call_operand.vmem [shape: f32[2,1,1], index: 3, kind: output, shape index: {1}]   ;;  %s677_s4 = inlined_call_operand.vmem [shape: f32[2,1,1], index: 4, kind: output, shape index: {2}]  }
   0x1   :  { %s602_s17 = smov 0  }
   0x2 LB: > { %s27_s18 = sadd.s32 1, %s566_s16  ;;  %p505_p0 = scmp.ge.s32.totalorder %s570_s17, 1  ;;  %s570_s17 = sphi %s602_s17, %s15_s17   ;;  %s566_s16 = sphi %s600_s16, %s679_s16   ;;  %s562_s15 = sphi %s598_s15, %s678_s15  }
   0x3   : > { %p29_p1 = scmp.ge.s32.totalorder %s27_s18, 2  ;;  %p203_p2 = scmp.lt.s32.totalorder %s570_s17, 3 }
   0x5   : > { %s681_s18 = smov (%p29_p1, %s27_s18), 0  ;;  %p204_p3 = pnand %p505_p0, %p203_p2 }
   0x6   : > { %p247_p4 = scmp.lt.s32.totalorder (!%p204_p3), %s562_s15, 1  ;;  %vm291_vm0 = vcmask (!%p204_p3), 1042432   ;;  %v572_v13 = vmov (!%p204_p3), 0.0   ;;  %vm356_vm2 = vcmask (!%p204_p3), 1040384   ;;  %vm279_vm5 = vcmask (!%p204_p3), 0  }
   0x7   : > { %207 = sbr.rel (%p204_p3) target bundleno = 255 (0xff), region = 28 }
   0xe   : > { %s683_s15 = smov (!%p247_p4, %s562_s15), 1 }
   0xf   : > { %s515_s19 = sshll.u32 %s683_s15, 3  ;;  %s635_s28 = scalar_lea.vmem %s675_s2, %s683_s15 }
  0x10   : > { %s254_s22 = scalar_lea.vmem %s673_s0, %s515_s19  ;;  %s264_s25 = scalar_lea.vmem %s674_s1, %s515_s19  ;;  %280 = vst.msk [vmem:[%s635_s28] sm:$0x1] %vm279_vm5, %v572_v13 }
  0x11   : > { %v283_v0 = vld [vmem:[%s254_s22] sm:$0x77]  ;;  %s643_s5 = scalar_lea.vmem %s676_s3, %s683_s15  ;;  %s651_s8 = scalar_lea.vmem %s677_s4, %s683_s15 }
  0x12   : > { %v284_v1 = vld [vmem:[%s264_s25] sm:$0x77]  ;;  %281 = vst.msk [vmem:[%s643_s5] sm:$0x1] %vm279_vm5, %v572_v13  ;;  %282 = vst.msk [vmem:[%s651_s8] sm:$0x1] %vm279_vm5, %v572_v13 }
  0x13   : > { %v285_v2 = vsub.f32 %v283_v0, %v284_v1 }
  0x15   : > { %v287_v3 = vand.u32 2147483647, %v285_v2  ;;  %v309_v4 = vmul.f32 %v285_v2, %v285_v2 }
  0x17   : > { %v289_v5 = vcombine.high %v287_v3, %v287_v3  ;;  %v292_v6 = vsel %vm291_vm0, %v287_v3, 0.0  ;;  %v328_v7 = vmul.f32 255.0, %v287_v3  ;;  %v311_v8 = vcombine.high %v309_v4, %v309_v4  ;;  %v286_v57 = vld [vmem:[%s635_s28] sm:$0x1] }
  0x18   : > { %v313_v10 = vsel %vm291_vm0, %v309_v4, 0.0 }
  0x19   : > { %v293_v9 = vsel %vm291_vm0, %v289_v5, 0.0  ;;  %v314_v11 = vsel %vm291_vm0, %v311_v8, 0.0  ;;  %vm329_vm1 = vcmp.le.f32.partialorder %v328_v7, 0.1  ;;  %v308_v60 = vld [vmem:[%s643_s5] sm:$0x1] }
  0x1a   : > { %v294_v12 = vadd.f32 %v293_v9, %v292_v6  ;;  %v510_v14 = vsel %vm329_vm1, 1.0, %v572_v13  ;;  %v315_v17 = vadd.f32 %v314_v11, %v313_v10  ;;  %v355_v63 = vld [vmem:[%s651_s8] sm:$0x1] }
  0x1b   : > { %v333_v15 = vcombine.high %v510_v14, %v510_v14  ;;  %v335_v16 = vsel %vm291_vm0, %v510_v14, 0.0 }
  0x1c   : > { %295 = vadd.xlane.f32.xlu0 %v294_v12  ;;  %v336_v18 = vrot.slane %v335_v16, 4 }
  0x1d   : > { %v342_v19 = vsel %vm291_vm0, %v333_v15, 0.0 }
  0x1e   : > { %v337_v20 = vadd.f32 %v336_v18, %v335_v16  ;;  %v343_v21 = vrot.slane %v342_v19, 4 }
  0x20   : > { %316 = vadd.xlane.f32.xlu0 %v315_v17  ;;  %v338_v22 = vrot.slane %v337_v20, 2  ;;  %v344_v23 = vadd.f32 %v343_v21, %v342_v19 }
  0x22   : > { %v339_v24 = vadd.f32 %v338_v22, %v337_v20  ;;  %v345_v25 = vrot.slane %v344_v23, 2 }
  0x24   : > { %v340_v26 = vrot.slane %v339_v24, 1  ;;  %v346_v27 = vadd.f32 %v345_v25, %v344_v23 }
  0x26   : > { %v341_v28 = vadd.f32 %v340_v26, %v339_v24  ;;  %v347_v29 = vrot.slane %v346_v27, 1 }
  0x28   : > { %v348_v30 = vadd.f32 %v347_v29, %v346_v27  ;;  %vm349_vm3 = vcmp.eq.f32.partialorder %v341_v28, 3.0 }
  0x29   : > { %v511_v31 = vsel %vm349_vm3, 1.0, %v572_v13 }
  0x2a   : > { %vm350_vm4 = vcmp.eq.f32.partialorder %v348_v30, 3.0  ;;  %v357_v32 = vsel %vm356_vm2, %v511_v31, 0.0 }
  0x2b   : > { %v512_v33 = vsel %vm350_vm4, 1.0, %v572_v13 }
  0x2c   : > { %v358_v34 = vsel %vm356_vm2, %v512_v33, 0.0 }
  0x2d   : > { %v359_v35 = vadd.f32 %v358_v34, %v357_v32 }
  0x2f   : > { %360 = vadd.xlane.f32.xlu1 %v359_v35 }
  0xa9   : > { %v296_v36 = vpop.xlane.xlu0 %295 }
  0xaa   : > { %v297_v37 = vrot.slane %v296_v36, 4 }
  0xac   : > { %v298_v38 = vadd.f32 %v297_v37, %v296_v36 }
  0xad   : > { %v317_v39 = vpop.xlane.xlu0 %316 }
  0xae   : > { %v299_v40 = vrot.slane %v298_v38, 2  ;;  %v318_v41 = vrot.slane %v317_v39, 4 }
  0xb0   : > { %v319_v42 = vadd.f32 %v318_v41, %v317_v39  ;;  %v300_v43 = vadd.f32 %v299_v40, %v298_v38 }
  0xb2   : > { %v320_v44 = vrot.slane %v319_v42, 2  ;;  %v301_v45 = vrot.slane %v300_v43, 1 }
  0xb4   : > { %v321_v46 = vadd.f32 %v320_v44, %v319_v42  ;;  %v302_v47 = vadd.f32 %v301_v45, %v300_v43 }
  0xb6   : > { %517 = vpush %v302_v47  ;;  %v322_v48 = vrot.slane %v321_v46, 1 }
  0xb8   : > { %v323_v49 = vadd.f32 %v322_v48, %v321_v46 }
  0xba   : > { %519 = vpush %v323_v49 }
  0xbc   : > { %v361_v50 = vpop.xlane.xlu1 %360 }
  0xbd   : > { %v362_v51 = vrot.slane %v361_v50, 4 }
  0xbf   : > { %v363_v52 = vadd.f32 %v362_v51, %v361_v50 }
  0xc1   : > { %v364_v53 = vrot.slane %v363_v52, 2 }
  0xc3   : > { %v365_v54 = vadd.f32 %v364_v53, %v363_v52 }
  0xc5   : > { %v366_v55 = vrot.slane %v365_v54, 1 }
  0xc7   : > { %v367_v56 = vadd.f32 %v366_v55, %v365_v54 }
  0xc9   : > { %521 = vpush %v367_v56 }
  0xe7   : > { %s518_s9 = spop %517 }
  0xe8   : > { %v304_v58 = vstv %s518_s9 }
  0xe9   : > { %v305_v59 = vadd.f32 %v304_v58, %v286_v57 }
  0xeb   : > { %307 = vst.msk [vmem:[%s635_s28] sm:$0x1] %vm279_vm5, %v305_v59  ;;  %s520_s10 = spop %519 }
  0xec   : > { %v325_v61 = vstv %s520_s10 }
  0xed   : > { %v326_v62 = vadd.f32 %v325_v61, %v308_v60 }
  0xef   : > { %327 = vst.msk [vmem:[%s643_s5] sm:$0x1] %vm279_vm5, %v326_v62 }
  0xfa   : > { %s522_s11 = spop %521 }
  0xfb   : > { %v369_v0 = vstv %s522_s11 }
  0xfc   : > { %v370_v1 = vadd.f32 %v369_v0, %v355_v63 }
  0xfe   : > { %371 = vst.msk [vmem:[%s651_s8] sm:$0x1] %vm279_vm5, %v370_v1 }
  0xff PF: > { %s15_s17 = sadd.s32 1, %s570_s17   ;;  %s678_s15 = smov %s566_s16 }
 0x100   : > { %p12_p5 = scmp.ge.s32.totalorder %s15_s17, 4   ;;  %s679_s16 = smov %s681_s18 }
 0x102   :  { %14 = sbr.rel (!%p12_p5) target bundleno = 2 (0x2), region = 89 }

</bundles_post_ra>
